<compile_context>
chip_gen: v5e
topology: v5e:2x2
jax: 0.10.0
libtpu: 0.0.40
codegen_flags: <defaults>
</compile_context>

<pallas_src>
import functools

import jax
import jax.numpy as jnp
from jax.experimental import pallas as pl
from jax.experimental.pallas import tpu as pltpu


def _round_up(v, m):
    return -(-v // m) * m


def _dropblock_kernel(x_ref, m_ref, out_ref, psum_ref, *, block_size, h, w):
    """One channel tile.

    x_ref:    (H, W, TC)         activations (channel-last)
    m_ref:    (HP, WP, TC) int8  zero-padded Bernoulli mask (HP>=H+bs-1, WP>=W+bs-1)
    out_ref:  (H, W, TC)         un-normalised x * keep
    psum_ref: (8, 128) f32       this tile's keep-sum (broadcast over the block)
    """
    m = m_ref[...].astype(jnp.float32)           # widen once; mask math in f32

    # Separable (bs x bs, stride 1) max pool.
    # Stage 1: H direction -- slices along the leading (un-tiled) axis.
    colmax = m[0:h]
    for di in range(1, block_size):
        colmax = jnp.maximum(colmax, m[di:di + h])
    # Stage 2: W direction (sublane axis).
    bm = colmax[:, 0:w, :]
    for dj in range(1, block_size):
        bm = jnp.maximum(bm, colmax[:, dj:dj + w, :])

    keep = 1.0 - bm                              # f32 block mask (1 = keep)

    # Per-tile partial sum for the global normalisation (f32 accumulation).
    psum_ref[...] = jnp.zeros((8, 128), jnp.float32) + jnp.sum(keep)

    # Single fused elementwise pass over the activations; lane-dense store.
    out_ref[...] = (x_ref[...].astype(jnp.float32) * keep).astype(out_ref.dtype)


def _pick_nc_tile(ncp, h, w, hp, wp, x_itemsize):
    """Largest channel tile (multiple of 128) whose double-buffered working set
    stays well under the per-generation scoped-VMEM limits (v7x is tightest)."""
    budget = 12 * 1024 * 1024
    for cand in (1024, 512, 256, 128):
        if ncp % cand == 0:
            per_step = cand * (2 * h * w * x_itemsize + hp * wp * 1)  # x + out + int8 mask
            if 2 * per_step <= budget:           # x2: pipeline double-buffering
                return cand
    # TODO(synk): add (H, W) halo tiling for very large feature maps where even
    # a 128-channel tile does not fit VMEM.
    return 128


def dropblock2d(x, key, *, drop_prob=0.1, block_size=7, training=True):
    """Functional equivalent of DropBlock2D.forward (PyTorch, NCHW input)."""
    if (not training) or drop_prob == 0.0:
        return x

    n, c, h, w = x.shape
    if h < block_size:
        raise ValueError("input.shape[2] can not be smaller than block_size")
    if block_size % 2 != 1:
        raise ValueError("block_size must be odd (required by the reference module)")

    # NOTE: matches the PyTorch module exactly -- gamma uses only H (shape[2]).
    gamma = drop_prob / block_size ** 2 * (h ** 2 / (h - block_size + 1) ** 2)
    mh = h - (block_size - 1)
    mw = w - (block_size - 1)
    nc = n * c

    # Bernoulli(gamma) sample drawn directly in channel-last layout (same
    # distribution as the NCHW-ordered PyTorch sample); int8 cuts mask HBM 4x.
    mask = jax.random.bernoulli(key, gamma, (mh, mw, nc)).astype(jnp.int8)

    # F.pad(bs//2) followed by max_pool2d(padding=bs//2) is, for non-negative
    # values, one zero-pad of (bs-1) per side before a VALID bs x bs max pool.
    sp = block_size - 1
    hp = h + sp
    wp = _round_up(w + sp, 32)         # extra zero cols: layout-friendly, never read
    ncp = _round_up(nc, 128)           # lane-dense channel axis

    mask_p = jnp.pad(mask, ((sp, sp), (sp, sp + (wp - (w + sp))), (0, 0)))
    # Padded (fake) channels get mask==1 everywhere -> keep==0 there, so they
    # contribute nothing to the normalisation sum and their output is dropped.
    mask_p = jnp.pad(mask_p, ((0, 0), (0, 0), (0, ncp - nc)), constant_values=1)

    # Channel-last, lane-padded activations (layout plumbing; if activations
    # are already NHWC/channel-last, feed them directly and skip this).
    x_cl = jnp.transpose(x.reshape(nc, h, w), (1, 2, 0))
    x_cl = jnp.pad(x_cl, ((0, 0), (0, 0), (0, ncp - nc)))

    nc_tile = _pick_nc_tile(ncp, h, w, hp, wp, x.dtype.itemsize)
    num_tiles = ncp // nc_tile

    kernel = functools.partial(_dropblock_kernel, block_size=block_size, h=h, w=w)

    out_cl, psums = pl.pallas_call(
        kernel,
        grid=(num_tiles,),
        in_specs=[
            pl.BlockSpec((h, w, nc_tile), lambda j: (0, 0, j)),
            pl.BlockSpec((hp, wp, nc_tile), lambda j: (0, 0, j)),
        ],
        out_specs=[
            pl.BlockSpec((h, w, nc_tile), lambda j: (0, 0, j)),
            pl.BlockSpec((8, 128), lambda j: (0, j)),
        ],
        out_shape=[
            jax.ShapeDtypeStruct((h, w, ncp), x.dtype),
            jax.ShapeDtypeStruct((8, 128 * num_tiles), jnp.float32),
        ],
        compiler_params=pltpu.CompilerParams(
            dimension_semantics=("parallel",),
            vmem_limit_bytes=32 * 1024 * 1024,
        ),
    )(x_cl, mask_p)

    # Global normalisation scale, guarded against the everything-dropped case.
    total = jnp.sum(psums[0, ::128])                 # one value per channel tile
    numel = jnp.float32(nc * h * w)
    scale = jnp.where(total > 0, numel / total, jnp.float32(0.0))

    # The scalar scale fuses into the channel-last -> NCHW transpose-back.
    out = (out_cl[:, :, :nc].astype(jnp.float32) * scale).astype(x.dtype)
    return jnp.transpose(out, (2, 0, 1)).reshape(n, c, h, w)


def _reference(x, mask_cl, block_size):
    """Pure-JAX reference using the same channel-last Bernoulli sample."""
    n, c, h, w = x.shape
    sp = block_size - 1
    m = jnp.pad(mask_cl.astype(jnp.float32), ((sp, sp), (sp, sp), (0, 0)))
    bm = jax.lax.reduce_window(
        m, -jnp.inf, jax.lax.max,
        window_dimensions=(block_size, block_size, 1),
        window_strides=(1, 1, 1), padding="VALID")
    keep = 1.0 - bm                                       # (h, w, nc)
    keep = jnp.transpose(keep, (2, 0, 1)).reshape(n, c, h, w).astype(x.dtype)
    out = x * keep
    return out * keep.size / jnp.sum(keep.astype(jnp.float32))


if __name__ == "__main__":
    key = jax.random.PRNGKey(0)
    kx, km = jax.random.split(key)

    N, C, H, W = 2, 4, 16, 16
    BLOCK_SIZE = 7
    DROP_PROB = 0.1

    x = jax.random.normal(kx, (N, C, H, W), dtype=jnp.float32)

    out = dropblock2d(x, km, drop_prob=DROP_PROB, block_size=BLOCK_SIZE, training=True)
    out = jax.block_until_ready(out)
    assert out.shape == x.shape and out.dtype == x.dtype

    # Exact reference check: rebuild the same channel-last Bernoulli sample.
    gamma = DROP_PROB / BLOCK_SIZE ** 2 * (H ** 2 / (H - BLOCK_SIZE + 1) ** 2)
    mh = H - (BLOCK_SIZE - 1)
    mw = W - (BLOCK_SIZE - 1)
    mask_cl = jax.random.bernoulli(km, gamma, (mh, mw, N * C)).astype(jnp.float32)
    ref = _reference(x, mask_cl, BLOCK_SIZE)
    assert jnp.allclose(out, ref, rtol=1e-5, atol=1e-5), "mismatch vs reference"

    # eval-mode / drop_prob=0 passthrough
    assert jnp.array_equal(dropblock2d(x, km, drop_prob=0.0, block_size=BLOCK_SIZE), x)
    assert jnp.array_equal(dropblock2d(x, km, training=False), x)

    print("KERNEL_OK")
</pallas_src>

<mosaic_0001>
module attributes {stable_mosaic.version = 11 : i64} {
  func.func @_dropblock_kernel(%arg0: i32, %arg1: memref<16x16x128xf32, #tpu.memory_space<vmem>>, %arg2: memref<22x32x128xi8, #tpu.memory_space<vmem>>, %arg3: memref<16x16x128xf32, #tpu.memory_space<vmem>>, %arg4: memref<8x128xf32, #tpu.memory_space<vmem>>) attributes {dimension_semantics = [#tpu.dimension_semantics<parallel>], iteration_bounds = array<i64: 1>, scalar_prefetch = 0 : i64, scratch_operands = 0 : i64, tpu.core_type = #tpu.core_type<tc>, window_params = [{transform_indices = @transform_0, window_bounds = array<i64: 16, 16, 128>}, {transform_indices = @transform_1, window_bounds = array<i64: 22, 32, 128>}, {transform_indices = @transform_2, window_bounds = array<i64: 16, 16, 128>}, {transform_indices = @transform_3, window_bounds = array<i64: 8, 128>}]} {
    %c0 = arith.constant 0 : index
    %c0_0 = arith.constant 0 : index
    %c0_1 = arith.constant 0 : index
    %0 = vector.load %arg2[%c0, %c0_0, %c0_1] : memref<22x32x128xi8, #tpu.memory_space<vmem>>, vector<22x32x128xi8>
    %1 = arith.sitofp %0 : vector<22x32x128xi8> to vector<22x32x128xf32>
    %2 = vector.extract_strided_slice %1 {offsets = [0, 0, 0], sizes = [16, 32, 128], strides = [1, 1, 1]} : vector<22x32x128xf32> to vector<16x32x128xf32>
    %3 = vector.extract_strided_slice %1 {offsets = [1, 0, 0], sizes = [16, 32, 128], strides = [1, 1, 1]} : vector<22x32x128xf32> to vector<16x32x128xf32>
    %4 = arith.maximumf %2, %3 : vector<16x32x128xf32>
    %5 = vector.extract_strided_slice %1 {offsets = [2, 0, 0], sizes = [16, 32, 128], strides = [1, 1, 1]} : vector<22x32x128xf32> to vector<16x32x128xf32>
    %6 = arith.maximumf %4, %5 : vector<16x32x128xf32>
    %7 = vector.extract_strided_slice %1 {offsets = [3, 0, 0], sizes = [16, 32, 128], strides = [1, 1, 1]} : vector<22x32x128xf32> to vector<16x32x128xf32>
    %8 = arith.maximumf %6, %7 : vector<16x32x128xf32>
    %9 = vector.extract_strided_slice %1 {offsets = [4, 0, 0], sizes = [16, 32, 128], strides = [1, 1, 1]} : vector<22x32x128xf32> to vector<16x32x128xf32>
    %10 = arith.maximumf %8, %9 : vector<16x32x128xf32>
    %11 = vector.extract_strided_slice %1 {offsets = [5, 0, 0], sizes = [16, 32, 128], strides = [1, 1, 1]} : vector<22x32x128xf32> to vector<16x32x128xf32>
    %12 = arith.maximumf %10, %11 : vector<16x32x128xf32>
    %13 = vector.extract_strided_slice %1 {offsets = [6, 0, 0], sizes = [16, 32, 128], strides = [1, 1, 1]} : vector<22x32x128xf32> to vector<16x32x128xf32>
    %14 = arith.maximumf %12, %13 : vector<16x32x128xf32>
    %15 = vector.extract_strided_slice %14 {offsets = [0, 0, 0], sizes = [16, 16, 128], strides = [1, 1, 1]} : vector<16x32x128xf32> to vector<16x16x128xf32>
    %16 = vector.extract_strided_slice %14 {offsets = [0, 1, 0], sizes = [16, 16, 128], strides = [1, 1, 1]} : vector<16x32x128xf32> to vector<16x16x128xf32>
    %17 = arith.maximumf %15, %16 : vector<16x16x128xf32>
    %18 = vector.extract_strided_slice %14 {offsets = [0, 2, 0], sizes = [16, 16, 128], strides = [1, 1, 1]} : vector<16x32x128xf32> to vector<16x16x128xf32>
    %19 = arith.maximumf %17, %18 : vector<16x16x128xf32>
    %20 = vector.extract_strided_slice %14 {offsets = [0, 3, 0], sizes = [16, 16, 128], strides = [1, 1, 1]} : vector<16x32x128xf32> to vector<16x16x128xf32>
    %21 = arith.maximumf %19, %20 : vector<16x16x128xf32>
    %22 = vector.extract_strided_slice %14 {offsets = [0, 4, 0], sizes = [16, 16, 128], strides = [1, 1, 1]} : vector<16x32x128xf32> to vector<16x16x128xf32>
    %23 = arith.maximumf %21, %22 : vector<16x16x128xf32>
    %24 = vector.extract_strided_slice %14 {offsets = [0, 5, 0], sizes = [16, 16, 128], strides = [1, 1, 1]} : vector<16x32x128xf32> to vector<16x16x128xf32>
    %25 = arith.maximumf %23, %24 : vector<16x16x128xf32>
    %26 = vector.extract_strided_slice %14 {offsets = [0, 6, 0], sizes = [16, 16, 128], strides = [1, 1, 1]} : vector<16x32x128xf32> to vector<16x16x128xf32>
    %27 = arith.maximumf %25, %26 : vector<16x16x128xf32>
    %cst = arith.constant 1.000000e+00 : f32
    %28 = vector.broadcast %cst : f32 to vector<16x16x128xf32>
    %29 = arith.subf %28, %27 : vector<16x16x128xf32>
    %cst_2 = arith.constant 0.000000e+00 : f32
    %30 = vector.broadcast %cst_2 : f32 to vector<8x128xf32>
    %31 = vector.shape_cast %29 : vector<16x16x128xf32> to vector<1x16x16x128xf32>
    %cst_3 = arith.constant dense<0.000000e+00> : vector<1xf32>
    %32 = vector.multi_reduction <add>, %31, %cst_3 [1, 2, 3] : vector<1x16x16x128xf32> to vector<1xf32>
    %33 = vector.shape_cast %32 : vector<1xf32> to vector<1x1x1x1xf32>
    %34 = vector.extract %33[0, 0, 0, 0] : f32 from vector<1x1x1x1xf32>
    %35 = vector.broadcast %34 : f32 to vector<8x128xf32>
    %36 = arith.addf %30, %35 : vector<8x128xf32>
    %c0_4 = arith.constant 0 : index
    %c0_5 = arith.constant 0 : index
    %37 = vector.load %arg4[%c0_4, %c0_5] : memref<8x128xf32, #tpu.memory_space<vmem>>, vector<8x128xf32>
    tpu.vector_store %arg4[%c0_4, %c0_5], %36 {strides = array<i32>} : memref<8x128xf32, #tpu.memory_space<vmem>>, vector<8x128xf32>,
    %c0_6 = arith.constant 0 : index
    %c0_7 = arith.constant 0 : index
    %c0_8 = arith.constant 0 : index
    %38 = vector.load %arg1[%c0_6, %c0_7, %c0_8] : memref<16x16x128xf32, #tpu.memory_space<vmem>>, vector<16x16x128xf32>
    %39 = arith.mulf %38, %29 : vector<16x16x128xf32>
    %c0_9 = arith.constant 0 : index
    %c0_10 = arith.constant 0 : index
    %c0_11 = arith.constant 0 : index
    %40 = vector.load %arg3[%c0_9, %c0_10, %c0_11] : memref<16x16x128xf32, #tpu.memory_space<vmem>>, vector<16x16x128xf32>
    tpu.vector_store %arg3[%c0_9, %c0_10, %c0_11], %39 {strides = array<i32>} : memref<16x16x128xf32, #tpu.memory_space<vmem>>, vector<16x16x128xf32>,
    return
  }
  func.func @transform_0(%arg0: i32) -> (i32, i32, i32) {
    %c0_i32 = arith.constant 0 : i32
    %c0_i32_0 = arith.constant 0 : i32
    %c0_i32_1 = arith.constant 0 : i32
    return %c0_i32, %c0_i32_0, %arg0 : i32, i32, i32
  }
  func.func @transform_1(%arg0: i32) -> (i32, i32, i32) {
    %c0_i32 = arith.constant 0 : i32
    %c0_i32_0 = arith.constant 0 : i32
    %c0_i32_1 = arith.constant 0 : i32
    return %c0_i32, %c0_i32_0, %arg0 : i32, i32, i32
  }
  func.func @transform_2(%arg0: i32) -> (i32, i32, i32) {
    %c0_i32 = arith.constant 0 : i32
    %c0_i32_0 = arith.constant 0 : i32
    %c0_i32_1 = arith.constant 0 : i32
    return %c0_i32, %c0_i32_0, %arg0 : i32, i32, i32
  }
  func.func @transform_3(%arg0: i32) -> (i32, i32) {
    %c0_i32 = arith.constant 0 : i32
    %c0_i32_0 = arith.constant 0 : i32
    return %c0_i32, %arg0 : i32, i32
  }
}

</mosaic_0001>

<bundles_post_ra>
// kernel: tpu_custom_call.1
= control target key start
LH: loop header
LB: loop body
LE: loop exit
PB: predicated region body
PF: predicated region fallthrough
CT: control target
= control target key end

     0   :  { %9 = vsyncpa [#allocation3], 0  ;;  %s4260_s0 = inlined_call_operand.hbm [shape: f32[16,16,128], index: 0, kind: input, shape index: {}]   ;;  %s4261_s1 = inlined_call_operand.hbm [shape: s8[22,32,128], index: 1, kind: input, shape index: {}]   ;;  %s4262_s2 = inlined_call_operand.hbm [shape: f32[16,16,128], index: 2, kind: output, shape index: {0}]   ;;  %s4263_s3 = inlined_call_operand.hbm [shape: f32[8,128], index: 3, kind: output, shape index: {1}]  }
   0x1   :  { %10 = vsyncpa [#allocation6], 0 }
   0x2   :  { %11 = vsyncpa [#allocation4], 0 }
   0x3   :  { %12 = vsyncpa [#allocation9], 0  ;;  %s17_s14 = sshll.u32 %s4260_s0, 4  ;;  %s1726_s15 = smov [#allocation2]   ;;  %s18_s14 = int_to_ptr.hbm [resolvable:$true] %s17_s14 }
   0x4   :  { %s19_s16 = sshll.u32 %s1726_s15, 4  ;;  %s30_s19 = sshll.u32 %s4261_s1, 4  ;;  %s20_s16 = int_to_ptr.vmem [resolvable:$true] %s19_s16  ;;  %s31_s19 = int_to_ptr.hbm [resolvable:$true] %s30_s19 }
   0x5   :  { %s1727_s20 = smov 128   ;;  %s1728_s21 = smov 8  }
   0x6   :  { %25 = dma.hbm_to_vmem [thread:$0]  %s18_s14, 4096, %s20_s16, [#allocation3], %s1727_s20, %s1727_s20, %s1728_s21  }
   0x7   :  { %s1729_s22 = smov [#allocation5]  }
   0x8   :  { %s32_s23 = sshll.u32 %s1729_s22, 4  ;;  %s33_s23 = int_to_ptr.vmem [resolvable:$true] %s32_s23 }
   0x9   :  { %38 = dma.hbm_to_vmem [thread:$0]  %s31_s19, 2816, %s33_s23, [#allocation6], %s1727_s20, %s1727_s20, %s1728_s21  }
   0xa   :  { %1718 = dma.done.wait [#allocation3], 4096  }
   0xb   :  { %1719 = vsyncadd [#allocation3], 4294963200 }
   0xc   :  { %1720 = dma.done.wait [#allocation6], 2816  }
   0xd   :  { %1721 = vsyncadd [#allocation6], 4294964480  ;;  %v1764_v0 = vld [vmem:[#allocation5] sm:$0xff]  ;;  %v1766_v1 = vld [vmem:[#allocation5 + $0x8] sm:$0xff]  ;;  %vm537_vm0 = vcmask 1046528   ;;  %vm682_vm1 = vcmask 1045504  }
   0xe   :  { %v1768_v2 = vld [vmem:[#allocation5 + $0x10] sm:$0xff]  ;;  %v1770_v3 = vld [vmem:[#allocation5 + $0x18] sm:$0xff]  ;;  %v1772_v4 = vld [vmem:[#allocation5 + $0x20] sm:$0xff]  ;;  %v69_v6 = vunpack.c.0.s8 %v1764_v0  ;;  %v70_v7 = vunpack.c.1.s8 %v1764_v0  ;;  %v71_v8 = vunpack.c.2.s8 %v1764_v0  ;;  %v72_v9 = vunpack.c.0.s8 %v1766_v1  ;;  %s1730_s0 = smov [#allocation7]   ;;  %s1584_s26 = sshll.u32 %s4262_s2, 4  ;;  %s1585_s26 = int_to_ptr.hbm [resolvable:$true] %s1584_s26 }
   0xf   :  { %v1774_v5 = vld [vmem:[#allocation5 + $0x28] sm:$0xff]  ;;  %v1780_v10 = vld [vmem:[#allocation5 + $0x30] sm:$0xff]  ;;  %v73_v11 = vunpack.c.1.s8 %v1766_v1  ;;  %v74_v12 = vunpack.c.2.s8 %v1766_v1  ;;  %v75_v13 = vunpack.c.0.s8 %v1768_v2  ;;  %v76_v14 = vunpack.c.1.s8 %v1768_v2  ;;  %v1786_v15 = vld [vmem:[#allocation5 + $0x38] sm:$0xff]  ;;  %s1582_s1 = sshll.u32 %s1730_s0, 4  ;;  %s1731_s27 = smov [#allocation8]   ;;  %s1583_s1 = int_to_ptr.vmem [resolvable:$true] %s1582_s1 }
  0x10   :  { %v77_v16 = vunpack.c.2.s8 %v1768_v2  ;;  %v78_v17 = vunpack.c.0.s8 %v1770_v3  ;;  %v79_v18 = vunpack.c.1.s8 %v1770_v3  ;;  %v80_v19 = vunpack.c.2.s8 %v1770_v3  ;;  %v1792_v20 = vld [vmem:[#allocation5 + $0x40] sm:$0xff]  ;;  %v1794_v21 = vld [vmem:[#allocation5 + $0x48] sm:$0xff]  ;;  %v1800_v26 = vld [vmem:[#allocation5 + $0x50] sm:$0xff]  ;;  %s1596_s28 = sshll.u32 %s1731_s27, 4  ;;  %s1598_s4 = sshll.u32 %s4263_s3, 4  ;;  %s1597_s28 = int_to_ptr.vmem [resolvable:$true] %s1596_s28  ;;  %s1599_s4 = int_to_ptr.hbm [resolvable:$true] %s1598_s4 }
  0x11   :  { %v81_v22 = vunpack.c.0.s8 %v1772_v4  ;;  %v82_v23 = vunpack.c.1.s8 %v1772_v4  ;;  %v83_v24 = vunpack.c.2.s8 %v1772_v4  ;;  %v84_v25 = vunpack.c.0.s8 %v1774_v5  ;;  %v1806_v31 = vld [vmem:[#allocation5 + $0x58] sm:$0xff]  ;;  %v1812_v36 = vld [vmem:[#allocation5 + $0x60] sm:$0xff]  ;;  %v1814_v37 = vld [vmem:[#allocation5 + $0x68] sm:$0xff] }
  0x12   :  { %v85_v27 = vunpack.c.1.s8 %v1774_v5  ;;  %v86_v28 = vunpack.c.2.s8 %v1774_v5  ;;  %v87_v29 = vunpack.c.0.s8 %v1780_v10  ;;  %v88_v30 = vunpack.c.1.s8 %v1780_v10  ;;  %v1820_v42 = vld [vmem:[#allocation5 + $0x70] sm:$0xff]  ;;  %v1826_v47 = vld [vmem:[#allocation5 + $0x78] sm:$0xff]  ;;  %v1832_v52 = vld [vmem:[#allocation5 + $0x80] sm:$0xff] }
  0x13   :  { %v89_v32 = vunpack.c.2.s8 %v1780_v10  ;;  %v90_v33 = vunpack.c.0.s8 %v1786_v15  ;;  %v91_v34 = vunpack.c.1.s8 %v1786_v15  ;;  %v92_v35 = vunpack.c.2.s8 %v1786_v15  ;;  %v1834_v53 = vld [vmem:[#allocation5 + $0x88] sm:$0xff]  ;;  %v1840_v58 = vld [vmem:[#allocation5 + $0x90] sm:$0xff]  ;;  %v1846_v63 = vld [vmem:[#allocation5 + $0x98] sm:$0xff] }
  0x14   :  { %v93_v38 = vunpack.c.0.s8 %v1792_v20  ;;  %v94_v39 = vunpack.c.1.s8 %v1792_v20  ;;  %v95_v40 = vunpack.c.2.s8 %v1792_v20  ;;  %v96_v41 = vunpack.c.0.s8 %v1794_v21  ;;  %v1852_v51 = vld [vmem:[#allocation5 + $0xa0] sm:$0xff]  ;;  %v1854_v50 = vld [vmem:[#allocation5 + $0xa8] sm:$0xff] }
  0x15   :  { %v97_v43 = vunpack.c.1.s8 %v1794_v21  ;;  %v98_v44 = vunpack.c.2.s8 %v1794_v21  ;;  %v99_v45 = vunpack.c.0.s8 %v1800_v26  ;;  %v100_v46 = vunpack.c.1.s8 %v1800_v26 }
  0x16   :  { %v1876_v49 = vcvt.s32.f32 %v69_v6  ;;  %v1880_v60 = vcvt.s32.f32 %v70_v7  ;;  %v1884_v62 = vcvt.s32.f32 %v71_v8  ;;  %v1888_v54 = vcvt.s32.f32 %v72_v9 }
  0x17   :  { %v1892_v56 = vcvt.s32.f32 %v73_v11  ;;  %v1896_v6 = vcvt.s32.f32 %v74_v12  ;;  %v1900_v7 = vcvt.s32.f32 %v75_v13  ;;  %v1904_v0 = vcvt.s32.f32 %v76_v14 }
  0x18   :  { %v1908_v8 = vcvt.s32.f32 %v77_v16  ;;  %v1912_v9 = vcvt.s32.f32 %v78_v17  ;;  %v1916_v1 = vcvt.s32.f32 %v79_v18  ;;  %v1920_v11 = vcvt.s32.f32 %v80_v19 }
  0x19   :  { %v1924_v12 = vcvt.s32.f32 %v81_v22  ;;  %v1928_v2 = vcvt.s32.f32 %v82_v23  ;;  %v1932_v13 = vcvt.s32.f32 %v83_v24  ;;  %v1936_v14 = vcvt.s32.f32 %v84_v25 }
  0x1a   :  { %v1940_v3 = vcvt.s32.f32 %v85_v27  ;;  %v1944_v16 = vcvt.s32.f32 %v86_v28  ;;  %v1948_v17 = vcvt.s32.f32 %v87_v29  ;;  %v1952_v4 = vcvt.s32.f32 %v88_v30 }
  0x1b   :  { %4651 = vst [vmem:[#allocation14_spill] sm:$0xff] %v1924_v12  ;;  %v1956_v18 = vcvt.s32.f32 %v89_v32  ;;  %v1960_v19 = vcvt.s32.f32 %v90_v33  ;;  %v1964_v5 = vcvt.s32.f32 %v91_v34  ;;  %v1968_v22 = vcvt.s32.f32 %v92_v35 }
  0x1c   :  { %4652 = vst [vmem:[#allocation15_spill] sm:$0xff] %v1928_v2  ;;  %v1972_v23 = vcvt.s32.f32 %v93_v38  ;;  %v1976_v10 = vcvt.s32.f32 %v94_v39  ;;  %v1980_v24 = vcvt.s32.f32 %v95_v40  ;;  %v1984_v25 = vcvt.s32.f32 %v96_v41 }
  0x1d   :  { %4653 = vst [vmem:[#allocation16_spill] sm:$0xff] %v1932_v13  ;;  %v1988_v15 = vcvt.s32.f32 %v97_v43  ;;  %v1992_v27 = vcvt.s32.f32 %v98_v44  ;;  %v1996_v28 = vcvt.s32.f32 %v99_v45  ;;  %v2000_v20 = vcvt.s32.f32 %v100_v46 }
  0x1e   :  { %4654 = vst [vmem:[#allocation17_spill] sm:$0xff] %v1936_v14  ;;  %v4671_v29 = vunpack.c.2.s8 %v1800_v26  ;;  %v4673_v32 = vunpack.c.0.s8 %v1806_v31  ;;  %v4675_v21 = vunpack.c.1.s8 %v1806_v31  ;;  %v4677_v35 = vunpack.c.2.s8 %v1806_v31 }
  0x1f   :  { %4655 = vst [vmem:[#allocation18_spill] sm:$0xff] %v1940_v3  ;;  %v4679_v39 = vunpack.c.0.s8 %v1812_v36  ;;  %v4681_v26 = vunpack.c.1.s8 %v1812_v36  ;;  %v4683_v43 = vunpack.c.2.s8 %v1812_v36  ;;  %v4685_v45 = vunpack.c.0.s8 %v1814_v37 }
  0x20   :  { %4656 = vst [vmem:[#allocation19_spill] sm:$0xff] %v1944_v16  ;;  %v2004_v30 = vcvt.s32.f32 %v4671_v29  ;;  %v2008_v33 = vcvt.s32.f32 %v4673_v32  ;;  %v2012_v34 = vcvt.s32.f32 %v4675_v21  ;;  %v2016_v38 = vcvt.s32.f32 %v4677_v35 }
  0x21   :  { %4657 = vst [vmem:[#allocation20_spill] sm:$0xff] %v1948_v17  ;;  %v2020_v40 = vcvt.s32.f32 %v4679_v39  ;;  %v2024_v41 = vcvt.s32.f32 %v4681_v26  ;;  %v2028_v44 = vcvt.s32.f32 %v4683_v43  ;;  %v2032_v46 = vcvt.s32.f32 %v4685_v45 }
  0x22   :  { %4658 = vst [vmem:[#allocation21_spill] sm:$0xff] %v1952_v4  ;;  %v4687_v31 = vunpack.c.1.s8 %v1814_v37  ;;  %v4689_v32 = vunpack.c.2.s8 %v1814_v37  ;;  %v4691_v35 = vunpack.c.0.s8 %v1820_v42  ;;  %v4693_v36 = vunpack.c.1.s8 %v1820_v42 }
  0x23   :  { %4659 = vst [vmem:[#allocation22_spill] sm:$0xff] %v1956_v18  ;;  %v4695_v43 = vunpack.c.2.s8 %v1820_v42  ;;  %v4697_v57 = vunpack.c.0.s8 %v1826_v47  ;;  %v4699_v37 = vunpack.c.1.s8 %v1826_v47  ;;  %v4701_v55 = vunpack.c.2.s8 %v1826_v47 }
  0x24   :  { %4660 = vst [vmem:[#allocation23_spill] sm:$0xff] %v1960_v19  ;;  %v2036_v29 = vcvt.s32.f32 %v4687_v31  ;;  %v2040_v21 = vcvt.s32.f32 %v4689_v32  ;;  %v2044_v39 = vcvt.s32.f32 %v4691_v35  ;;  %v2048_v26 = vcvt.s32.f32 %v4693_v36 }
  0x25   :  { %4661 = vst [vmem:[#allocation24_spill] sm:$0xff] %v1964_v5  ;;  %v2052_v45 = vcvt.s32.f32 %v4695_v43  ;;  %v2056_v31 = vcvt.s32.f32 %v4697_v57  ;;  %v2060_v32 = vcvt.s32.f32 %v4699_v37  ;;  %v2064_v35 = vcvt.s32.f32 %v4701_v55 }
  0x26   :  { %4662 = vst [vmem:[#allocation25_spill] sm:$0xff] %v1968_v22  ;;  %v4703_v59 = vunpack.c.0.s8 %v1832_v52  ;;  %v4705_v42 = vunpack.c.1.s8 %v1832_v52  ;;  %v4707_v61 = vunpack.c.2.s8 %v1832_v52  ;;  %v4709_v48 = vunpack.c.0.s8 %v1834_v53 }
  0x27   :  { %4663 = vst [vmem:[#allocation26_spill] sm:$0xff] %v1972_v23  ;;  %v4711_v47 = vunpack.c.1.s8 %v1834_v53  ;;  %v4717_v52 = vunpack.c.1.s8 %v1840_v58  ;;  %vm827_vm2 = vcmask 1044480   ;;  %vm972_vm3 = vcmask 1043456  }
  0x28   :  { %4664 = vst [vmem:[#allocation27_spill] sm:$0xff] %v1976_v10  ;;  %v2068_v36 = vcvt.s32.f32 %v4703_v59  ;;  %v2072_v43 = vcvt.s32.f32 %v4705_v42  ;;  %v2076_v57 = vcvt.s32.f32 %v4707_v61  ;;  %v2080_v37 = vcvt.s32.f32 %v4709_v48 }
  0x29   :  { %4665 = vst [vmem:[#allocation28_spill] sm:$0xff] %v1980_v24  ;;  %v2084_v55 = vcvt.s32.f32 %v4711_v47  ;;  %v2096_v61 = vcvt.s32.f32 %v4717_v52  ;;  %vm1117_vm4 = vcmask 1042432   ;;  %vm1262_vm5 = vcmask 1041408  }
  0x2a   :  { %4666 = vst [vmem:[#allocation29_spill] sm:$0xff] %v1984_v25 }
  0x2b   :  { %4667 = vst [vmem:[#allocation30_spill] sm:$0xff] %v1988_v15 }
  0x2c   :  { %4668 = vst [vmem:[#allocation31_spill] sm:$0xff] %v1992_v27 }
  0x2d   :  { %4669 = vst [vmem:[#allocation32_spill] sm:$0xff] %v1996_v28 }
  0x2e   :  { %4670 = vst [vmem:[#allocation33_spill] sm:$0xff] %v2000_v20 }
  0x2f   :  { %4672 = vst [vmem:[#allocation34_spill] sm:$0xff] %v2004_v30 }
  0x30   :  { %4674 = vst [vmem:[#allocation35_spill] sm:$0xff] %v2008_v33 }
  0x31   :  { %4676 = vst [vmem:[#allocation36_spill] sm:$0xff] %v2012_v34 }
  0x32   :  { %4678 = vst [vmem:[#allocation37_spill] sm:$0xff] %v2016_v38 }
  0x33   :  { %4680 = vst [vmem:[#allocation38_spill] sm:$0xff] %v2020_v40 }
  0x34   :  { %4682 = vst [vmem:[#allocation39_spill] sm:$0xff] %v2024_v41 }
  0x35   :  { %4684 = vst [vmem:[#allocation40_spill] sm:$0xff] %v2028_v44 }
  0x36   :  { %4686 = vst [vmem:[#allocation41_spill] sm:$0xff] %v2032_v46 }
  0x37   :  { %4688 = vst [vmem:[#allocation42_spill] sm:$0xff] %v2036_v29 }
  0x38   :  { %4690 = vst [vmem:[#allocation43_spill] sm:$0xff] %v2040_v21 }
  0x39   :  { %4692 = vst [vmem:[#allocation44_spill] sm:$0xff] %v2044_v39 }
  0x3a   :  { %4694 = vst [vmem:[#allocation45_spill] sm:$0xff] %v2048_v26 }
  0x3b   :  { %4696 = vst [vmem:[#allocation46_spill] sm:$0xff] %v2052_v45 }
  0x3c   :  { %4698 = vst [vmem:[#allocation47_spill] sm:$0xff] %v2056_v31 }
  0x3d   :  { %4700 = vst [vmem:[#allocation48_spill] sm:$0xff] %v2060_v32 }
  0x3e   :  { %4702 = vst [vmem:[#allocation49_spill] sm:$0xff] %v2064_v35  ;;  %v4713_v35 = vunpack.c.2.s8 %v1834_v53  ;;  %v4723_v53 = vunpack.c.1.s8 %v1846_v63 }
  0x3f   :  { %4704 = vst [vmem:[#allocation50_spill] sm:$0xff] %v2068_v36  ;;  %v4715_v36 = vunpack.c.0.s8 %v1840_v58 }
  0x40   :  { %4706 = vst [vmem:[#allocation51_spill] sm:$0xff] %v2072_v43  ;;  %v2088_v59 = vcvt.s32.f32 %v4713_v35  ;;  %v2108_v35 = vcvt.s32.f32 %v4723_v53 }
  0x41   :  { %4708 = vst [vmem:[#allocation52_spill] sm:$0xff] %v2076_v57  ;;  %v2092_v42 = vcvt.s32.f32 %v4715_v36  ;;  %v4719_v57 = vunpack.c.2.s8 %v1840_v58  ;;  %v4729_v58 = vunpack.c.1.s8 %v1852_v51 }
  0x42   :  { %4710 = vst [vmem:[#allocation53_spill] sm:$0xff] %v2080_v37  ;;  %v4721_v37 = vunpack.c.0.s8 %v1846_v63 }
  0x43   :  { %4712 = vst [vmem:[#allocation54_spill] sm:$0xff] %v2084_v55  ;;  %v2100_v48 = vcvt.s32.f32 %v4719_v57  ;;  %v2120_v57 = vcvt.s32.f32 %v4729_v58  ;;  %v201_v58 = vmax.f32 %v1876_v49, %v1888_v54  ;;  %v208_v49 = vmax.f32 %v1904_v0, %v1916_v1 }
  0x44   :  { %4714 = vst [vmem:[#allocation55_spill] sm:$0xff] %v2088_v59  ;;  %v2104_v47 = vcvt.s32.f32 %v4721_v37  ;;  %v4725_v59 = vunpack.c.2.s8 %v1846_v63  ;;  %v4735_v63 = vunpack.c.1.s8 %v1854_v50  ;;  %v222_v55 = vmax.f32 %v1960_v19, %v1972_v23 }
  0x45   :  { %4716 = vst [vmem:[#allocation56_spill] sm:$0xff] %v2092_v42  ;;  %v4727_v42 = vunpack.c.0.s8 %v1852_v51 }
  0x46   :  { %4718 = vst [vmem:[#allocation57_spill] sm:$0xff] %v2096_v61  ;;  %v2112_v36 = vcvt.s32.f32 %v4725_v59  ;;  %v2132_v59 = vcvt.s32.f32 %v4735_v63  ;;  %v205_v63 = vmax.f32 %v1892_v56, %v1904_v0  ;;  %v221_v61 = vmax.f32 %v1956_v18, %v1968_v22 }
  0x47   :  { %4720 = vst [vmem:[#allocation58_spill] sm:$0xff] %v2100_v48  ;;  %v2116_v52 = vcvt.s32.f32 %v4727_v42  ;;  %v4731_v48 = vunpack.c.2.s8 %v1852_v51  ;;  %v202_v51 = vmax.f32 %v1880_v60, %v1892_v56  ;;  %v209_v60 = vmax.f32 %v1908_v8, %v1920_v11 }
  0x48   :  { %4722 = vst [vmem:[#allocation59_spill] sm:$0xff] %v2104_v47  ;;  %v4733_v47 = vunpack.c.0.s8 %v1854_v50  ;;  %v212_v56 = vmax.f32 %v1920_v11, %v1932_v13 }
  0x49   :  { %4724 = vst [vmem:[#allocation60_spill] sm:$0xff] %v2108_v35  ;;  %v2124_v37 = vcvt.s32.f32 %v4731_v48  ;;  %v203_v48 = vmax.f32 %v1884_v62, %v1896_v6  ;;  %v210_v62 = vmax.f32 %v1912_v9, %v1924_v12  ;;  %v220_v35 = vmax.f32 %v1952_v4, %v1964_v5 }
  0x4a   :  { %4726 = vst [vmem:[#allocation61_spill] sm:$0xff] %v2112_v36  ;;  %v2128_v53 = vcvt.s32.f32 %v4733_v47  ;;  %v4737_v36 = vunpack.c.2.s8 %v1854_v50  ;;  %v204_v47 = vmax.f32 %v1888_v54, %v1900_v7  ;;  %v206_v50 = vmax.f32 %v1896_v6, %v1908_v8 }
  0x4b   :  { %4728 = vst [vmem:[#allocation62_spill] sm:$0xff] %v2116_v52  ;;  %v211_v54 = vmax.f32 %v1916_v1, %v1928_v2  ;;  %v213_v6 = vmax.f32 %v1924_v12, %v1936_v14  ;;  %v219_v52 = vmax.f32 %v1948_v17, %v1960_v19  ;;  %v229_v19 = vmax.f32 %v1988_v15, %v2000_v20  ;;  %v4741_v12 = vld [vmem:[#allocation52_spill] sm:$0xff] }
  0x4c   :  { %4730 = vst [vmem:[#allocation63_spill] sm:$0xff] %v2120_v57  ;;  %v2136_v42 = vcvt.s32.f32 %v4737_v36  ;;  %v207_v36 = vmax.f32 %v1900_v7, %v1912_v9  ;;  %v218_v57 = vmax.f32 %v1944_v16, %v1956_v18  ;;  %v228_v18 = vmax.f32 %v1984_v25, %v1996_v28 }
  0x4d   :  { %4732 = vst [vmem:[#allocation64_spill] sm:$0xff] %v2124_v37  ;;  %v217_v37 = vmax.f32 %v1940_v3, %v1952_v4  ;;  %v227_v4 = vmax.f32 %v1980_v24, %v1992_v27 }
  0x4e   :  { %4734 = vst [vmem:[#allocation65_spill] sm:$0xff] %v2128_v53  ;;  %v216_v53 = vmax.f32 %v1936_v14, %v1948_v17  ;;  %v223_v14 = vmax.f32 %v1964_v5, %v1976_v10  ;;  %v226_v17 = vmax.f32 %v1976_v10, %v1988_v15  ;;  %v230_v5 = vmax.f32 %v1992_v27, %v2004_v30 }
  0x4f   :  { %4736 = vst [vmem:[#allocation66_spill] sm:$0xff] %v2132_v59  ;;  %v215_v59 = vmax.f32 %v1932_v13, %v1944_v16  ;;  %v225_v16 = vmax.f32 %v1972_v23, %v1984_v25  ;;  %v232_v23 = vmax.f32 %v2000_v20, %v2012_v34  ;;  %v233_v10 = vmax.f32 %v2004_v30, %v2016_v38  ;;  %v4739_v13 = vld [vmem:[#allocation49_spill] sm:$0xff] }
  0x50   :  { %4738 = vst [vmem:[#allocation67_spill] sm:$0xff] %v2136_v42  ;;  %v214_v42 = vmax.f32 %v1928_v2, %v1940_v3  ;;  %v224_v3 = vmax.f32 %v1968_v22, %v1980_v24  ;;  %v231_v22 = vmax.f32 %v1996_v28, %v2008_v33  ;;  %v234_v24 = vmax.f32 %v2008_v33, %v2020_v40  ;;  %v4740_v2 = vld [vmem:[#allocation50_spill] sm:$0xff] }
  0x51   :  { %v235_v25 = vmax.f32 %v2012_v34, %v2024_v41  ;;  %v236_v15 = vmax.f32 %v2016_v38, %v2028_v44  ;;  %v237_v27 = vmax.f32 %v2020_v40, %v2032_v46  ;;  %v238_v28 = vmax.f32 %v2024_v41, %v2036_v29 }
  0x52   :  { %v239_v20 = vmax.f32 %v2028_v44, %v2040_v21  ;;  %v240_v30 = vmax.f32 %v2032_v46, %v2044_v39  ;;  %v241_v33 = vmax.f32 %v2036_v29, %v2048_v26  ;;  %v242_v34 = vmax.f32 %v2040_v21, %v2052_v45 }
  0x53   :  { %v243_v38 = vmax.f32 %v2044_v39, %v2056_v31  ;;  %v244_v40 = vmax.f32 %v2048_v26, %v2060_v32  ;;  %v245_v41 = vmax.f32 %v2052_v45, %v4739_v13  ;;  %v246_v44 = vmax.f32 %v2056_v31, %v4740_v2 }
  0x54   :  { %v247_v46 = vmax.f32 %v2060_v32, %v2072_v43  ;;  %v248_v29 = vmax.f32 %v4739_v13, %v4741_v12  ;;  %v2235_v21 = vmax.f32 %v201_v58, %v1900_v7  ;;  %v2238_v39 = vmax.f32 %v202_v51, %v1904_v0  ;;  %v4745_v32 = vld [vmem:[#allocation14_spill] sm:$0xff]  ;;  %v4747_v7 = vld [vmem:[#allocation15_spill] sm:$0xff]  ;;  %v4749_v0 = vld [vmem:[#allocation16_spill] sm:$0xff] }
  0x55   :  { %v2241_v26 = vmax.f32 %v203_v48, %v1908_v8  ;;  %v2244_v45 = vmax.f32 %v204_v47, %v1912_v9  ;;  %v2247_v2 = vmax.f32 %v205_v63, %v1916_v1  ;;  %v2250_v43 = vmax.f32 %v206_v50, %v1920_v11  ;;  %v4751_v8 = vld [vmem:[#allocation17_spill] sm:$0xff]  ;;  %v4753_v47 = vld [vmem:[#allocation18_spill] sm:$0xff]  ;;  %v4755_v63 = vld [vmem:[#allocation19_spill] sm:$0xff] }
  0x56   :  { %v2253_v12 = vmax.f32 %v207_v36, %v4745_v32  ;;  %v2256_v58 = vmax.f32 %v208_v49, %v4747_v7  ;;  %v2259_v51 = vmax.f32 %v209_v60, %v4749_v0  ;;  %v2262_v48 = vmax.f32 %v210_v62, %v4751_v8  ;;  %v4757_v50 = vld [vmem:[#allocation20_spill] sm:$0xff]  ;;  %v4759_v36 = vld [vmem:[#allocation21_spill] sm:$0xff]  ;;  %v4761_v49 = vld [vmem:[#allocation22_spill] sm:$0xff] }
  0x57   :  { %4742 = vst [vmem:[#allocation68_spill] sm:$0xff] %v2244_v45  ;;  %v2265_v45 = vmax.f32 %v211_v54, %v4753_v47  ;;  %v4763_v60 = vld [vmem:[#allocation23_spill] sm:$0xff]  ;;  %v4765_v62 = vld [vmem:[#allocation24_spill] sm:$0xff]  ;;  %v4767_v54 = vld [vmem:[#allocation25_spill] sm:$0xff] }
  0x58   :  { %4743 = vst [vmem:[#allocation69_spill] sm:$0xff] %v2247_v2  ;;  %v2268_v2 = vmax.f32 %v212_v56, %v4755_v63  ;;  %v4769_v56 = vld [vmem:[#allocation26_spill] sm:$0xff] }
  0x59   :  { %4744 = vst [vmem:[#allocation70_spill] sm:$0xff] %v2250_v43  ;;  %v2271_v43 = vmax.f32 %v213_v6, %v4757_v50  ;;  %v4771_v6 = vld [vmem:[#allocation27_spill] sm:$0xff] }
  0x5a   :  { %4746 = vst [vmem:[#allocation71_spill] sm:$0xff] %v2253_v12  ;;  %v2274_v12 = vmax.f32 %v214_v42, %v4759_v36  ;;  %v4773_v42 = vld [vmem:[#allocation28_spill] sm:$0xff] }
  0x5b   :  { %4748 = vst [vmem:[#allocation72_spill] sm:$0xff] %v2256_v58  ;;  %v2277_v58 = vmax.f32 %v215_v59, %v4761_v49  ;;  %v4775_v59 = vld [vmem:[#allocation29_spill] sm:$0xff] }
  0x5c   :  { %4750 = vst [vmem:[#allocation73_spill] sm:$0xff] %v2259_v51  ;;  %v2280_v51 = vmax.f32 %v216_v53, %v4763_v60  ;;  %v4777_v53 = vld [vmem:[#allocation30_spill] sm:$0xff] }
  0x5d   :  { %4752 = vst [vmem:[#allocation74_spill] sm:$0xff] %v2262_v48  ;;  %v2283_v48 = vmax.f32 %v217_v37, %v4765_v62  ;;  %v4779_v37 = vld [vmem:[#allocation31_spill] sm:$0xff] }
  0x5e   :  { %4754 = vst [vmem:[#allocation75_spill] sm:$0xff] %v2265_v45  ;;  %v2286_v45 = vmax.f32 %v218_v57, %v4767_v54  ;;  %v4781_v57 = vld [vmem:[#allocation32_spill] sm:$0xff] }
  0x5f   :  { %4756 = vst [vmem:[#allocation76_spill] sm:$0xff] %v2268_v2  ;;  %v2289_v2 = vmax.f32 %v219_v52, %v4769_v56  ;;  %v4783_v52 = vld [vmem:[#allocation33_spill] sm:$0xff] }
  0x60   :  { %4758 = vst [vmem:[#allocation77_spill] sm:$0xff] %v2271_v43  ;;  %v2292_v43 = vmax.f32 %v220_v35, %v4771_v6  ;;  %v4785_v35 = vld [vmem:[#allocation34_spill] sm:$0xff] }
  0x61   :  { %4760 = vst [vmem:[#allocation78_spill] sm:$0xff] %v2274_v12  ;;  %v2295_v12 = vmax.f32 %v221_v61, %v4773_v42  ;;  %v4787_v61 = vld [vmem:[#allocation35_spill] sm:$0xff] }
  0x62   :  { %4762 = vst [vmem:[#allocation79_spill] sm:$0xff] %v2277_v58  ;;  %v2298_v58 = vmax.f32 %v222_v55, %v4775_v59  ;;  %v4789_v55 = vld [vmem:[#allocation36_spill] sm:$0xff] }
  0x63   :  { %4764 = vst [vmem:[#allocation80_spill] sm:$0xff] %v2280_v51  ;;  %v2301_v51 = vmax.f32 %v223_v14, %v4777_v53  ;;  %v4791_v14 = vld [vmem:[#allocation37_spill] sm:$0xff] }
  0x64   :  { %4766 = vst [vmem:[#allocation81_spill] sm:$0xff] %v2283_v48  ;;  %v2304_v48 = vmax.f32 %v224_v3, %v4779_v37  ;;  %v4793_v3 = vld [vmem:[#allocation38_spill] sm:$0xff] }
  0x65   :  { %4768 = vst [vmem:[#allocation82_spill] sm:$0xff] %v2286_v45  ;;  %v2307_v45 = vmax.f32 %v225_v16, %v4781_v57  ;;  %v4795_v16 = vld [vmem:[#allocation39_spill] sm:$0xff] }
  0x66   :  { %4770 = vst [vmem:[#allocation83_spill] sm:$0xff] %v2289_v2  ;;  %v2310_v2 = vmax.f32 %v226_v17, %v4783_v52  ;;  %v4797_v17 = vld [vmem:[#allocation40_spill] sm:$0xff] }
  0x67   :  { %4772 = vst [vmem:[#allocation84_spill] sm:$0xff] %v2292_v43  ;;  %v2313_v43 = vmax.f32 %v227_v4, %v4785_v35  ;;  %v4798_v4 = vld [vmem:[#allocation41_spill] sm:$0xff] }
  0x68   :  { %4774 = vst [vmem:[#allocation85_spill] sm:$0xff] %v2295_v12  ;;  %v2316_v12 = vmax.f32 %v228_v18, %v4787_v61  ;;  %v4800_v18 = vld [vmem:[#allocation42_spill] sm:$0xff] }
  0x69   :  { %4776 = vst [vmem:[#allocation86_spill] sm:$0xff] %v2298_v58  ;;  %v2319_v58 = vmax.f32 %v229_v19, %v4789_v55  ;;  %v4801_v19 = vld [vmem:[#allocation43_spill] sm:$0xff] }
  0x6a   :  { %4778 = vst [vmem:[#allocation87_spill] sm:$0xff] %v2301_v51  ;;  %v2322_v51 = vmax.f32 %v230_v5, %v4791_v14  ;;  %v4803_v5 = vld [vmem:[#allocation44_spill] sm:$0xff] }
  0x6b   :  { %4780 = vst [vmem:[#allocation88_spill] sm:$0xff] %v2304_v48  ;;  %v2325_v48 = vmax.f32 %v231_v22, %v4793_v3  ;;  %v4805_v22 = vld [vmem:[#allocation45_spill] sm:$0xff] }
  0x6c   :  { %4782 = vst [vmem:[#allocation89_spill] sm:$0xff] %v2307_v45  ;;  %v2328_v45 = vmax.f32 %v232_v23, %v4795_v16  ;;  %v4807_v23 = vld [vmem:[#allocation46_spill] sm:$0xff] }
  0x6d   :  { %4784 = vst [vmem:[#allocation90_spill] sm:$0xff] %v2310_v2  ;;  %v2331_v2 = vmax.f32 %v233_v10, %v4797_v17  ;;  %v2352_v10 = vmax.f32 %v240_v30, %v2056_v31  ;;  %v4818_v30 = vld [vmem:[#allocation54_spill] sm:$0xff] }
  0x6e   :  { %4786 = vst [vmem:[#allocation91_spill] sm:$0xff] %v2313_v43  ;;  %v2334_v43 = vmax.f32 %v234_v24, %v4798_v4  ;;  %v4810_v24 = vld [vmem:[#allocation48_spill] sm:$0xff] }
  0x6f   :  { %4788 = vst [vmem:[#allocation92_spill] sm:$0xff] %v2316_v12  ;;  %v2337_v12 = vmax.f32 %v235_v25, %v4800_v18  ;;  %v2358_v25 = vmax.f32 %v242_v34, %v4739_v13  ;;  %v297_v34 = vmax.f32 %v2235_v21, %v1912_v9  ;;  %v4826_v9 = vld [vmem:[#allocation72_spill] sm:$0xff] }
  0x70   :  { %4790 = vst [vmem:[#allocation93_spill] sm:$0xff] %v2319_v58  ;;  %v2340_v58 = vmax.f32 %v236_v15, %v4801_v19  ;;  %v4812_v15 = vld [vmem:[#allocation50_spill] sm:$0xff]  ;;  %v304_v21 = vmax.f32 %v4826_v9, %v4753_v47  ;;  %v4833_v9 = vld [vmem:[#allocation79_spill] sm:$0xff] }
  0x71   :  { %4792 = vst [vmem:[#allocation94_spill] sm:$0xff] %v2322_v51  ;;  %v2343_v51 = vmax.f32 %v237_v27, %v4803_v5  ;;  %v4813_v27 = vld [vmem:[#allocation51_spill] sm:$0xff]  ;;  %v311_v47 = vmax.f32 %v4833_v9, %v4767_v54  ;;  %v4840_v9 = vld [vmem:[#allocation86_spill] sm:$0xff] }
  0x72   :  { %4794 = vst [vmem:[#allocation95_spill] sm:$0xff] %v2325_v48  ;;  %v2346_v48 = vmax.f32 %v238_v28, %v4805_v22  ;;  %v4814_v28 = vld [vmem:[#allocation52_spill] sm:$0xff]  ;;  %v318_v54 = vmax.f32 %v4840_v9, %v4781_v57 }
  0x73   :  { %4796 = vst [vmem:[#allocation96_spill] sm:$0xff] %v2328_v45  ;;  %v2349_v45 = vmax.f32 %v239_v20, %v4807_v23  ;;  %v4816_v20 = vld [vmem:[#allocation53_spill] sm:$0xff] }
  0x74   :  { %4799 = vst [vmem:[#allocation97_spill] sm:$0xff] %v2334_v43  ;;  %v2355_v43 = vmax.f32 %v241_v33, %v4810_v24  ;;  %v4820_v33 = vld [vmem:[#allocation55_spill] sm:$0xff] }
  0x75   :  { %4802 = vst [vmem:[#allocation98_spill] sm:$0xff] %v2340_v58  ;;  %v2361_v58 = vmax.f32 %v243_v38, %v4812_v15  ;;  %v298_v38 = vmax.f32 %v2238_v39, %v1916_v1  ;;  %v4827_v1 = vld [vmem:[#allocation73_spill] sm:$0xff] }
  0x76   :  { %4804 = vst [vmem:[#allocation99_spill] sm:$0xff] %v2343_v51  ;;  %v2364_v51 = vmax.f32 %v244_v40, %v4813_v27  ;;  %v299_v40 = vmax.f32 %v2241_v26, %v1920_v11  ;;  %v305_v39 = vmax.f32 %v4827_v1, %v4755_v63  ;;  %v4828_v11 = vld [vmem:[#allocation74_spill] sm:$0xff]  ;;  %v4834_v1 = vld [vmem:[#allocation80_spill] sm:$0xff] }
  0x77   :  { %4806 = vst [vmem:[#allocation100_spill] sm:$0xff] %v2346_v48  ;;  %v2367_v48 = vmax.f32 %v245_v41, %v4814_v28  ;;  %v4822_v41 = vld [vmem:[#allocation68_spill] sm:$0xff]  ;;  %v306_v26 = vmax.f32 %v4828_v11, %v4757_v50  ;;  %v312_v63 = vmax.f32 %v4834_v1, %v4769_v56  ;;  %v4835_v11 = vld [vmem:[#allocation81_spill] sm:$0xff]  ;;  %v4841_v1 = vld [vmem:[#allocation87_spill] sm:$0xff] }
  0x78   :  { %4808 = vst [vmem:[#allocation101_spill] sm:$0xff] %v2349_v45  ;;  %v2370_v45 = vmax.f32 %v246_v44, %v4816_v20  ;;  %v4823_v44 = vld [vmem:[#allocation69_spill] sm:$0xff]  ;;  %v313_v50 = vmax.f32 %v4835_v11, %v4771_v6  ;;  %v319_v56 = vmax.f32 %v4841_v1, %v4783_v52  ;;  %v4842_v11 = vld [vmem:[#allocation88_spill] sm:$0xff]  ;;  %v4848_v1 = vld [vmem:[#allocation94_spill] sm:$0xff] }
  0x79   :  { %4809 = vst [vmem:[#allocation102_spill] sm:$0xff] %v2352_v10  ;;  %v2373_v10 = vmax.f32 %v247_v46, %v4818_v30  ;;  %v4824_v46 = vld [vmem:[#allocation70_spill] sm:$0xff]  ;;  %v320_v6 = vmax.f32 %v4842_v11, %v4785_v35  ;;  %v4847_v9 = vld [vmem:[#allocation93_spill] sm:$0xff]  ;;  %v326_v52 = vmax.f32 %v4848_v1, %v4797_v17  ;;  %v4849_v11 = vld [vmem:[#allocation95_spill] sm:$0xff] }
  0x7a   :  { %4811 = vst [vmem:[#allocation103_spill] sm:$0xff] %v2355_v43  ;;  %v2376_v43 = vmax.f32 %v248_v29, %v4820_v33  ;;  %v4825_v29 = vld [vmem:[#allocation71_spill] sm:$0xff]  ;;  %v325_v57 = vmax.f32 %v4847_v9, %v4795_v16  ;;  %v327_v35 = vmax.f32 %v4849_v11, %v4798_v4 }
  0x7b   :  { %4815 = vst [vmem:[#allocation104_spill] sm:$0xff] %v2367_v48  ;;  %v300_v48 = vmax.f32 %v4822_v41, %v4745_v32  ;;  %v4829_v41 = vld [vmem:[#allocation75_spill] sm:$0xff] }
  0x7c   :  { %4817 = vst [vmem:[#allocation105_spill] sm:$0xff] %v2370_v45  ;;  %v301_v45 = vmax.f32 %v4823_v44, %v4747_v7  ;;  %v307_v32 = vmax.f32 %v4829_v41, %v4759_v36  ;;  %v4830_v44 = vld [vmem:[#allocation76_spill] sm:$0xff]  ;;  %v4836_v41 = vld [vmem:[#allocation82_spill] sm:$0xff] }
  0x7d   :  { %4819 = vst [vmem:[#allocation106_spill] sm:$0xff] %v2373_v10  ;;  %v302_v10 = vmax.f32 %v4824_v46, %v4749_v0  ;;  %v308_v7 = vmax.f32 %v4830_v44, %v4761_v49  ;;  %v4831_v46 = vld [vmem:[#allocation77_spill] sm:$0xff]  ;;  %v314_v36 = vmax.f32 %v4836_v41, %v4773_v42  ;;  %v4837_v44 = vld [vmem:[#allocation83_spill] sm:$0xff]  ;;  %v4852_v9 = vld [vmem:[#allocation98_spill] sm:$0xff] }
  0x7e   :  { %4821 = vst [vmem:[#allocation107_spill] sm:$0xff] %v2376_v43  ;;  %v303_v43 = vmax.f32 %v4825_v29, %v4751_v8  ;;  %v309_v0 = vmax.f32 %v4831_v46, %v4763_v60  ;;  %v4832_v29 = vld [vmem:[#allocation78_spill] sm:$0xff]  ;;  %v315_v49 = vmax.f32 %v4837_v44, %v4775_v59  ;;  %v4838_v46 = vld [vmem:[#allocation84_spill] sm:$0xff]  ;;  %v4843_v41 = vld [vmem:[#allocation89_spill] sm:$0xff]  ;;  %v332_v16 = vmax.f32 %v4852_v9, %v4807_v23 }
  0x7f   :  { %v310_v8 = vmax.f32 %v4832_v29, %v4765_v62  ;;  %v316_v60 = vmax.f32 %v4838_v46, %v4777_v53  ;;  %v4839_v29 = vld [vmem:[#allocation85_spill] sm:$0xff]  ;;  %v321_v42 = vmax.f32 %v4843_v41, %v4787_v61  ;;  %v4844_v44 = vld [vmem:[#allocation90_spill] sm:$0xff]  ;;  %v4845_v46 = vld [vmem:[#allocation91_spill] sm:$0xff]  ;;  %v339_v9 = vmax.f32 %v2361_v58, %v4816_v20 }
  0x80   :  { %v317_v62 = vmax.f32 %v4839_v29, %v4779_v37  ;;  %v322_v59 = vmax.f32 %v4844_v44, %v4789_v55  ;;  %v323_v53 = vmax.f32 %v4845_v46, %v4791_v14  ;;  %v4846_v29 = vld [vmem:[#allocation92_spill] sm:$0xff]  ;;  %v329_v44 = vmax.f32 %v2331_v2, %v4801_v19  ;;  %v4851_v46 = vld [vmem:[#allocation97_spill] sm:$0xff]  ;;  %v4853_v1 = vld [vmem:[#allocation99_spill] sm:$0xff] }
  0x81   :  { %v324_v37 = vmax.f32 %v4846_v29, %v4793_v3  ;;  %v4850_v41 = vld [vmem:[#allocation96_spill] sm:$0xff]  ;;  %v330_v14 = vmax.f32 %v4851_v46, %v4803_v5  ;;  %v331_v29 = vmax.f32 %v2337_v12, %v4805_v22  ;;  %v333_v17 = vmax.f32 %v4853_v1, %v2056_v31  ;;  %v4856_v2 = vld [vmem:[#allocation102_spill] sm:$0xff]  ;;  %v4857_v46 = vld [vmem:[#allocation103_spill] sm:$0xff] }
  0x82   :  { %v328_v61 = vmax.f32 %v4850_v41, %v4800_v18  ;;  %v4854_v11 = vld [vmem:[#allocation100_spill] sm:$0xff]  ;;  %v4855_v41 = vld [vmem:[#allocation101_spill] sm:$0xff]  ;;  %v336_v19 = vmax.f32 %v4856_v2, %v4812_v15  ;;  %v337_v5 = vmax.f32 %v4857_v46, %v4813_v27  ;;  %v338_v12 = vmax.f32 %v2358_v25, %v4814_v28  ;;  %v4863_v22 = vld [vmem:[#allocation58_spill] sm:$0xff] }
  0x83   :  { %v334_v4 = vmax.f32 %v4854_v11, %v4810_v24  ;;  %v335_v18 = vmax.f32 %v4855_v41, %v4739_v13  ;;  %v340_v1 = vmax.f32 %v2364_v51, %v4818_v30  ;;  %v4858_v11 = vld [vmem:[#allocation104_spill] sm:$0xff]  ;;  %v4860_v41 = vld [vmem:[#allocation105_spill] sm:$0xff]  ;;  %v4865_v3 = vld [vmem:[#allocation14_spill] sm:$0xff] }
  0x84   :  { %v341_v24 = vmax.f32 %v4858_v11, %v4820_v33  ;;  %v4859_v31 = vld [vmem:[#allocation56_spill] sm:$0xff]  ;;  %v4861_v23 = vld [vmem:[#allocation57_spill] sm:$0xff]  ;;  %v4862_v2 = vld [vmem:[#allocation106_spill] sm:$0xff]  ;;  %v2475_v25 = vmax.f32 %v297_v34, %v4865_v3 }
  0x85   :  { %v342_v13 = vmax.f32 %v4860_v41, %v4859_v31  ;;  %v343_v15 = vmax.f32 %v4862_v2, %v4861_v23  ;;  %v4864_v46 = vld [vmem:[#allocation107_spill] sm:$0xff]  ;;  %v4867_v20 = vld [vmem:[#allocation16_spill] sm:$0xff]  ;;  %v4868_v30 = vld [vmem:[#allocation17_spill] sm:$0xff] }
  0x86   :  { %v344_v27 = vmax.f32 %v4864_v46, %v4863_v22  ;;  %v4866_v28 = vld [vmem:[#allocation15_spill] sm:$0xff]  ;;  %v2481_v51 = vmax.f32 %v299_v40, %v4867_v20  ;;  %v2484_v11 = vmax.f32 %v300_v48, %v4868_v30  ;;  %v4870_v33 = vld [vmem:[#allocation18_spill] sm:$0xff]  ;;  %v4874_v23 = vld [vmem:[#allocation20_spill] sm:$0xff] }
  0x87   :  { %v2478_v58 = vmax.f32 %v298_v38, %v4866_v28  ;;  %v2487_v41 = vmax.f32 %v301_v45, %v4870_v33  ;;  %v4872_v31 = vld [vmem:[#allocation19_spill] sm:$0xff]  ;;  %v2493_v46 = vmax.f32 %v303_v43, %v4874_v23  ;;  %v4876_v3 = vld [vmem:[#allocation21_spill] sm:$0xff]  ;;  %v4878_v28 = vld [vmem:[#allocation22_spill] sm:$0xff] }
  0x88   :  { %4869 = vst [vmem:[#allocation68_spill] sm:$0xff] %v2484_v11  ;;  %v2490_v2 = vmax.f32 %v302_v10, %v4872_v31  ;;  %v2496_v34 = vmax.f32 %v304_v21, %v4876_v3  ;;  %v2499_v38 = vmax.f32 %v305_v39, %v4878_v28  ;;  %v4880_v20 = vld [vmem:[#allocation23_spill] sm:$0xff]  ;;  %v4882_v48 = vld [vmem:[#allocation24_spill] sm:$0xff]  ;;  %v4884_v45 = vld [vmem:[#allocation25_spill] sm:$0xff] }
  0x89   :  { %4871 = vst [vmem:[#allocation69_spill] sm:$0xff] %v2487_v41  ;;  %v2502_v40 = vmax.f32 %v306_v26, %v4880_v20  ;;  %v2505_v11 = vmax.f32 %v307_v32, %v4882_v48  ;;  %v2508_v41 = vmax.f32 %v308_v7, %v4884_v45  ;;  %v4886_v10 = vld [vmem:[#allocation26_spill] sm:$0xff]  ;;  %v4888_v43 = vld [vmem:[#allocation27_spill] sm:$0xff]  ;;  %v4890_v21 = vld [vmem:[#allocation28_spill] sm:$0xff] }
  0x8a   :  { %4873 = vst [vmem:[#allocation70_spill] sm:$0xff] %v2490_v2  ;;  %v2511_v2 = vmax.f32 %v309_v0, %v4886_v10  ;;  %v4892_v39 = vld [vmem:[#allocation29_spill] sm:$0xff]  ;;  %v4893_v26 = vld [vmem:[#allocation30_spill] sm:$0xff]  ;;  %v4895_v32 = vld [vmem:[#allocation31_spill] sm:$0xff] }
  0x8b   :  { %4875 = vst [vmem:[#allocation71_spill] sm:$0xff] %v2493_v46  ;;  %v2514_v46 = vmax.f32 %v310_v8, %v4888_v43  ;;  %v4897_v7 = vld [vmem:[#allocation32_spill] sm:$0xff]  ;;  %v4899_v0 = vld [vmem:[#allocation33_spill] sm:$0xff]  ;;  %v4901_v8 = vld [vmem:[#allocation34_spill] sm:$0xff] }
  0x8c   :  { %4877 = vst [vmem:[#allocation72_spill] sm:$0xff] %v2496_v34  ;;  %v2517_v34 = vmax.f32 %v311_v47, %v4890_v21  ;;  %v4903_v47 = vld [vmem:[#allocation35_spill] sm:$0xff] }
  0x8d   :  { %4879 = vst [vmem:[#allocation73_spill] sm:$0xff] %v2499_v38  ;;  %v2520_v38 = vmax.f32 %v312_v63, %v4892_v39  ;;  %v2541_v63 = vmax.f32 %v319_v56, %v4789_v55  ;;  %v4918_v56 = vld [vmem:[#allocation43_spill] sm:$0xff] }
  0x8e   :  { %4881 = vst [vmem:[#allocation74_spill] sm:$0xff] %v2502_v40  ;;  %v2523_v40 = vmax.f32 %v313_v50, %v4893_v26  ;;  %v4906_v50 = vld [vmem:[#allocation37_spill] sm:$0xff] }
  0x8f   :  { %4883 = vst [vmem:[#allocation75_spill] sm:$0xff] %v2505_v11  ;;  %v2526_v11 = vmax.f32 %v314_v36, %v4895_v32  ;;  %v4908_v36 = vld [vmem:[#allocation38_spill] sm:$0xff] }
  0x90   :  { %4885 = vst [vmem:[#allocation76_spill] sm:$0xff] %v2508_v41  ;;  %v2529_v41 = vmax.f32 %v315_v49, %v4897_v7  ;;  %v4910_v49 = vld [vmem:[#allocation39_spill] sm:$0xff] }
  0x91   :  { %4887 = vst [vmem:[#allocation77_spill] sm:$0xff] %v2511_v2  ;;  %v2532_v2 = vmax.f32 %v316_v60, %v4899_v0  ;;  %v4912_v60 = vld [vmem:[#allocation40_spill] sm:$0xff] }
  0x92   :  { %4889 = vst [vmem:[#allocation78_spill] sm:$0xff] %v2514_v46  ;;  %v2535_v46 = vmax.f32 %v317_v62, %v4901_v8  ;;  %v4914_v62 = vld [vmem:[#allocation41_spill] sm:$0xff] }
  0x93   :  { %4891 = vst [vmem:[#allocation79_spill] sm:$0xff] %v2517_v34  ;;  %v2538_v34 = vmax.f32 %v318_v54, %v4903_v47  ;;  %v4916_v54 = vld [vmem:[#allocation42_spill] sm:$0xff] }
  0x94   :  { %4894 = vst [vmem:[#allocation80_spill] sm:$0xff] %v2523_v40  ;;  %v2544_v40 = vmax.f32 %v320_v6, %v4906_v50  ;;  %v4920_v6 = vld [vmem:[#allocation44_spill] sm:$0xff] }
  0x95   :  { %4896 = vst [vmem:[#allocation81_spill] sm:$0xff] %v2526_v11  ;;  %v2547_v11 = vmax.f32 %v321_v42, %v4908_v36  ;;  %v4922_v42 = vld [vmem:[#allocation45_spill] sm:$0xff] }
  0x96   :  { %4898 = vst [vmem:[#allocation82_spill] sm:$0xff] %v2529_v41  ;;  %v2550_v41 = vmax.f32 %v322_v59, %v4910_v49  ;;  %v4924_v59 = vld [vmem:[#allocation46_spill] sm:$0xff] }
  0x97   :  { %4900 = vst [vmem:[#allocation83_spill] sm:$0xff] %v2532_v2  ;;  %v2553_v2 = vmax.f32 %v323_v53, %v4912_v60  ;;  %v4926_v53 = vld [vmem:[#allocation47_spill] sm:$0xff] }
  0x98   :  { %4902 = vst [vmem:[#allocation84_spill] sm:$0xff] %v2535_v46  ;;  %v2556_v46 = vmax.f32 %v324_v37, %v4914_v62  ;;  %v4928_v37 = vld [vmem:[#allocation48_spill] sm:$0xff] }
  0x99   :  { %4904 = vst [vmem:[#allocation85_spill] sm:$0xff] %v2538_v34  ;;  %v2559_v34 = vmax.f32 %v325_v57, %v4916_v54  ;;  %v4930_v57 = vld [vmem:[#allocation49_spill] sm:$0xff] }
  0x9a   :  { %4905 = vst [vmem:[#allocation86_spill] sm:$0xff] %v2541_v63  ;;  %v2562_v63 = vmax.f32 %v326_v52, %v4918_v56  ;;  %v4932_v52 = vld [vmem:[#allocation50_spill] sm:$0xff] }
  0x9b   :  { %4907 = vst [vmem:[#allocation87_spill] sm:$0xff] %v2544_v40  ;;  %v2565_v40 = vmax.f32 %v327_v35, %v4920_v6  ;;  %v4934_v35 = vld [vmem:[#allocation51_spill] sm:$0xff] }
  0x9c   :  { %4909 = vst [vmem:[#allocation88_spill] sm:$0xff] %v2547_v11  ;;  %v2568_v11 = vmax.f32 %v328_v61, %v4922_v42  ;;  %v4935_v61 = vld [vmem:[#allocation52_spill] sm:$0xff] }
  0x9d   :  { %4911 = vst [vmem:[#allocation89_spill] sm:$0xff] %v2550_v41  ;;  %v2571_v41 = vmax.f32 %v329_v44, %v4924_v59  ;;  %v4937_v44 = vld [vmem:[#allocation53_spill] sm:$0xff] }
  0x9e   :  { %4913 = vst [vmem:[#allocation90_spill] sm:$0xff] %v2553_v2  ;;  %v2574_v2 = vmax.f32 %v330_v14, %v4926_v53  ;;  %v4939_v14 = vld [vmem:[#allocation54_spill] sm:$0xff] }
  0x9f   :  { %4915 = vst [vmem:[#allocation91_spill] sm:$0xff] %v2556_v46  ;;  %v2577_v46 = vmax.f32 %v331_v29, %v4928_v37  ;;  %v4941_v29 = vld [vmem:[#allocation55_spill] sm:$0xff] }
  0xa0   :  { %4917 = vst [vmem:[#allocation92_spill] sm:$0xff] %v2559_v34  ;;  %v2580_v34 = vmax.f32 %v332_v16, %v4930_v57  ;;  %v4942_v16 = vld [vmem:[#allocation56_spill] sm:$0xff] }
  0xa1   :  { %4919 = vst [vmem:[#allocation93_spill] sm:$0xff] %v2562_v63  ;;  %v2583_v63 = vmax.f32 %v333_v17, %v4932_v52  ;;  %v4943_v17 = vld [vmem:[#allocation57_spill] sm:$0xff] }
  0xa2   :  { %4921 = vst [vmem:[#allocation94_spill] sm:$0xff] %v2565_v40  ;;  %v2586_v40 = vmax.f32 %v334_v4, %v4934_v35  ;;  %v2607_v4 = vmax.f32 %v341_v24, %v4863_v22  ;;  %v4951_v24 = vld [vmem:[#allocation68_spill] sm:$0xff] }
  0xa3   :  { %4923 = vst [vmem:[#allocation95_spill] sm:$0xff] %v2568_v11  ;;  %v2589_v11 = vmax.f32 %v335_v18, %v4935_v61  ;;  %v4945_v18 = vld [vmem:[#allocation59_spill] sm:$0xff] }
  0xa4   :  { %4925 = vst [vmem:[#allocation96_spill] sm:$0xff] %v2571_v41  ;;  %v2592_v41 = vmax.f32 %v336_v19, %v4937_v44  ;;  %v4947_v19 = vld [vmem:[#allocation60_spill] sm:$0xff] }
  0xa5   :  { %4927 = vst [vmem:[#allocation97_spill] sm:$0xff] %v2574_v2  ;;  %v2595_v2 = vmax.f32 %v337_v5, %v4939_v14  ;;  %v4949_v5 = vld [vmem:[#allocation61_spill] sm:$0xff] }
  0xa6   :  { %4929 = vst [vmem:[#allocation98_spill] sm:$0xff] %v2577_v46  ;;  %v2598_v46 = vmax.f32 %v338_v12, %v4941_v29  ;;  %v393_v12 = vmax.f32 %v2475_v25, %v4868_v30  ;;  %v4955_v30 = vld [vmem:[#allocation72_spill] sm:$0xff] }
  0xa7   :  { %4931 = vst [vmem:[#allocation99_spill] sm:$0xff] %v2580_v34  ;;  %v2601_v34 = vmax.f32 %v339_v9, %v4942_v16  ;;  %v394_v9 = vmax.f32 %v2478_v58, %v4870_v33  ;;  %v400_v25 = vmax.f32 %v4955_v30, %v4882_v48  ;;  %v4956_v33 = vld [vmem:[#allocation73_spill] sm:$0xff]  ;;  %v4962_v30 = vld [vmem:[#allocation79_spill] sm:$0xff] }
  0xa8   :  { %4933 = vst [vmem:[#allocation100_spill] sm:$0xff] %v2583_v63  ;;  %v2604_v63 = vmax.f32 %v340_v1, %v4943_v17  ;;  %v395_v1 = vmax.f32 %v2481_v51, %v4872_v31  ;;  %v401_v58 = vmax.f32 %v4956_v33, %v4884_v45  ;;  %v4957_v31 = vld [vmem:[#allocation74_spill] sm:$0xff]  ;;  %v407_v48 = vmax.f32 %v4962_v30, %v4895_v32  ;;  %v4968_v30 = vld [vmem:[#allocation85_spill] sm:$0xff] }
  0xa9   :  { %4936 = vst [vmem:[#allocation101_spill] sm:$0xff] %v2589_v11  ;;  %v2610_v11 = vmax.f32 %v342_v13, %v4945_v18  ;;  %v4952_v13 = vld [vmem:[#allocation69_spill] sm:$0xff]  ;;  %v402_v51 = vmax.f32 %v4957_v31, %v4886_v10  ;;  %v408_v33 = vmax.f32 %v2520_v38, %v4897_v7  ;;  %v4963_v31 = vld [vmem:[#allocation80_spill] sm:$0xff]  ;;  %v414_v32 = vmax.f32 %v4968_v30, %v4908_v36  ;;  %v4969_v38 = vld [vmem:[#allocation86_spill] sm:$0xff] }
  0xaa   :  { %4938 = vst [vmem:[#allocation102_spill] sm:$0xff] %v2592_v41  ;;  %v2613_v41 = vmax.f32 %v343_v15, %v4947_v19  ;;  %v4953_v15 = vld [vmem:[#allocation70_spill] sm:$0xff]  ;;  %v409_v10 = vmax.f32 %v4963_v31, %v4899_v0  ;;  %v415_v7 = vmax.f32 %v4969_v38, %v4910_v49  ;;  %v4970_v31 = vld [vmem:[#allocation87_spill] sm:$0xff]  ;;  %v4975_v30 = vld [vmem:[#allocation92_spill] sm:$0xff] }
  0xab   :  { %4940 = vst [vmem:[#allocation103_spill] sm:$0xff] %v2595_v2  ;;  %v2616_v2 = vmax.f32 %v344_v27, %v4949_v5  ;;  %v4954_v27 = vld [vmem:[#allocation71_spill] sm:$0xff]  ;;  %v416_v0 = vmax.f32 %v4970_v31, %v4912_v60  ;;  %v421_v36 = vmax.f32 %v4975_v30, %v4922_v42  ;;  %v4976_v38 = vld [vmem:[#allocation93_spill] sm:$0xff]  ;;  %v4977_v31 = vld [vmem:[#allocation94_spill] sm:$0xff] }
  0xac   :  { %4944 = vst [vmem:[#allocation104_spill] sm:$0xff] %v2607_v4  ;;  %v396_v4 = vmax.f32 %v4951_v24, %v4874_v23  ;;  %v4958_v24 = vld [vmem:[#allocation75_spill] sm:$0xff]  ;;  %v422_v49 = vmax.f32 %v4976_v38, %v4924_v59  ;;  %v423_v60 = vmax.f32 %v4977_v31, %v4926_v53  ;;  %v430_v31 = vmax.f32 %v2586_v40, %v4939_v14  ;;  %v4994_v53 = vld [vmem:[#allocation20_spill] sm:$0xff] }
  0xad   :  { %4946 = vst [vmem:[#allocation105_spill] sm:$0xff] %v2610_v11  ;;  %v397_v11 = vmax.f32 %v4952_v13, %v4876_v3  ;;  %v403_v23 = vmax.f32 %v4958_v24, %v4888_v43  ;;  %v4959_v13 = vld [vmem:[#allocation76_spill] sm:$0xff]  ;;  %v4964_v24 = vld [vmem:[#allocation81_spill] sm:$0xff] }
  0xae   :  { %4948 = vst [vmem:[#allocation106_spill] sm:$0xff] %v2613_v41  ;;  %v398_v41 = vmax.f32 %v4953_v15, %v4878_v28  ;;  %v404_v3 = vmax.f32 %v4959_v13, %v4890_v21  ;;  %v4960_v15 = vld [vmem:[#allocation77_spill] sm:$0xff]  ;;  %v410_v43 = vmax.f32 %v4964_v24, %v4901_v8  ;;  %v4965_v13 = vld [vmem:[#allocation82_spill] sm:$0xff]  ;;  %v4971_v24 = vld [vmem:[#allocation88_spill] sm:$0xff] }
  0xaf   :  { %4950 = vst [vmem:[#allocation107_spill] sm:$0xff] %v2616_v2  ;;  %v399_v2 = vmax.f32 %v4954_v27, %v4880_v20  ;;  %v405_v28 = vmax.f32 %v4960_v15, %v4892_v39  ;;  %v4961_v27 = vld [vmem:[#allocation78_spill] sm:$0xff]  ;;  %v411_v21 = vmax.f32 %v4965_v13, %v4903_v47  ;;  %v4966_v15 = vld [vmem:[#allocation83_spill] sm:$0xff]  ;;  %v417_v8 = vmax.f32 %v4971_v24, %v4914_v62  ;;  %v4972_v13 = vld [vmem:[#allocation89_spill] sm:$0xff] }
  0xb0   :  { %v406_v20 = vmax.f32 %v4961_v27, %v4893_v26  ;;  %v412_v39 = vmax.f32 %v4966_v15, %v4789_v55  ;;  %v4967_v27 = vld [vmem:[#allocation84_spill] sm:$0xff]  ;;  %v418_v47 = vmax.f32 %v4972_v13, %v4916_v54  ;;  %v4973_v15 = vld [vmem:[#allocation90_spill] sm:$0xff]  ;;  %v4978_v24 = vld [vmem:[#allocation95_spill] sm:$0xff] }
  0xb1   :  { %v413_v26 = vmax.f32 %v4967_v27, %v4906_v50  ;;  %v419_v55 = vmax.f32 %v4973_v15, %v4918_v56  ;;  %v4974_v27 = vld [vmem:[#allocation91_spill] sm:$0xff]  ;;  %v424_v62 = vmax.f32 %v4978_v24, %v4928_v37  ;;  %v4979_v13 = vld [vmem:[#allocation96_spill] sm:$0xff]  ;;  %v4980_v15 = vld [vmem:[#allocation97_spill] sm:$0xff] }
  0xb2   :  { %v420_v50 = vmax.f32 %v4974_v27, %v4920_v6  ;;  %v425_v54 = vmax.f32 %v4979_v13, %v4930_v57  ;;  %v426_v56 = vmax.f32 %v4980_v15, %v4932_v52  ;;  %v4981_v27 = vld [vmem:[#allocation98_spill] sm:$0xff]  ;;  %v4982_v30 = vld [vmem:[#allocation99_spill] sm:$0xff]  ;;  %v4983_v38 = vld [vmem:[#allocation100_spill] sm:$0xff] }
  0xb3   :  { %v427_v6 = vmax.f32 %v4981_v27, %v4934_v35  ;;  %v428_v42 = vmax.f32 %v4982_v30, %v4935_v61  ;;  %v429_v59 = vmax.f32 %v4983_v38, %v4937_v44  ;;  %v4984_v24 = vld [vmem:[#allocation101_spill] sm:$0xff]  ;;  %v4985_v13 = vld [vmem:[#allocation102_spill] sm:$0xff]  ;;  %v4986_v15 = vld [vmem:[#allocation103_spill] sm:$0xff]  ;;  %v434_v27 = vmax.f32 %v2598_v46, %v4863_v22 }
  0xb4   :  { %v431_v37 = vmax.f32 %v4984_v24, %v4941_v29  ;;  %v432_v57 = vmax.f32 %v4985_v13, %v4942_v16  ;;  %v433_v52 = vmax.f32 %v4986_v15, %v4943_v17  ;;  %v435_v30 = vmax.f32 %v2601_v34, %v4945_v18  ;;  %v4987_v40 = vld [vmem:[#allocation104_spill] sm:$0xff]  ;;  %v4988_v44 = vld [vmem:[#allocation62_spill] sm:$0xff]  ;;  %v4989_v24 = vld [vmem:[#allocation105_spill] sm:$0xff] }
  0xb5   :  { %v436_v38 = vmax.f32 %v2604_v63, %v4947_v19  ;;  %v437_v14 = vmax.f32 %v4987_v40, %v4949_v5  ;;  %v438_v29 = vmax.f32 %v4989_v24, %v4988_v44  ;;  %v4990_v61 = vld [vmem:[#allocation63_spill] sm:$0xff]  ;;  %v4991_v13 = vld [vmem:[#allocation106_spill] sm:$0xff]  ;;  %v4992_v35 = vld [vmem:[#allocation64_spill] sm:$0xff]  ;;  %v2715_v46 = vmax.f32 %v393_v12, %v4994_v53 }
  0xb6   :  { %v439_v16 = vmax.f32 %v4991_v13, %v4990_v61  ;;  %v4993_v15 = vld [vmem:[#allocation107_spill] sm:$0xff]  ;;  %v4996_v22 = vld [vmem:[#allocation21_spill] sm:$0xff]  ;;  %v4998_v18 = vld [vmem:[#allocation22_spill] sm:$0xff]  ;;  %v2730_v13 = vmax.f32 %v398_v41, %v4884_v45 }
  0xb7   :  { %v440_v17 = vmax.f32 %v4993_v15, %v4992_v35  ;;  %4995 = vst [vmem:[#allocation14_spill] sm:$0xff] %v2715_v46  ;;  %v2718_v34 = vmax.f32 %v394_v9, %v4996_v22  ;;  %v2721_v63 = vmax.f32 %v395_v1, %v4998_v18  ;;  %v5000_v19 = vld [vmem:[#allocation23_spill] sm:$0xff]  ;;  %v5002_v5 = vld [vmem:[#allocation24_spill] sm:$0xff]  ;;  %v5005_v61 = vld [vmem:[#allocation26_spill] sm:$0xff] }
  0xb8   :  { %v2724_v40 = vmax.f32 %v396_v4, %v5000_v19  ;;  %v2727_v24 = vmax.f32 %v397_v11, %v5002_v5  ;;  %5004 = vst [vmem:[#allocation19_spill] sm:$0xff] %v2730_v13  ;;  %v2733_v15 = vmax.f32 %v399_v2, %v5005_v61  ;;  %v5007_v53 = vld [vmem:[#allocation27_spill] sm:$0xff]  ;;  %v5009_v22 = vld [vmem:[#allocation28_spill] sm:$0xff]  ;;  %v5011_v18 = vld [vmem:[#allocation29_spill] sm:$0xff] }
  0xb9   :  { %4997 = vst [vmem:[#allocation15_spill] sm:$0xff] %v2718_v34  ;;  %v2736_v12 = vmax.f32 %v400_v25, %v5007_v53  ;;  %v2739_v9 = vmax.f32 %v401_v58, %v5009_v22  ;;  %v2742_v1 = vmax.f32 %v402_v51, %v5011_v18  ;;  %v5013_v4 = vld [vmem:[#allocation30_spill] sm:$0xff]  ;;  %v5015_v11 = vld [vmem:[#allocation31_spill] sm:$0xff]  ;;  %v5017_v41 = vld [vmem:[#allocation32_spill] sm:$0xff] }
  0xba   :  { %4999 = vst [vmem:[#allocation16_spill] sm:$0xff] %v2721_v63  ;;  %v2745_v19 = vmax.f32 %v403_v23, %v5013_v4  ;;  %v2748_v5 = vmax.f32 %v404_v3, %v5015_v11  ;;  %v2751_v45 = vmax.f32 %v405_v28, %v5017_v41  ;;  %v5019_v2 = vld [vmem:[#allocation33_spill] sm:$0xff]  ;;  %v5021_v25 = vld [vmem:[#allocation34_spill] sm:$0xff]  ;;  %v5023_v58 = vld [vmem:[#allocation35_spill] sm:$0xff] }
  0xbb   :  { %5001 = vst [vmem:[#allocation17_spill] sm:$0xff] %v2724_v40  ;;  %v2754_v61 = vmax.f32 %v406_v20, %v5019_v2  ;;  %v2757_v53 = vmax.f32 %v407_v48, %v5021_v25  ;;  %v2760_v22 = vmax.f32 %v408_v33, %v5023_v58  ;;  %v5025_v51 = vld [vmem:[#allocation36_spill] sm:$0xff]  ;;  %v5027_v23 = vld [vmem:[#allocation37_spill] sm:$0xff]  ;;  %v5029_v3 = vld [vmem:[#allocation38_spill] sm:$0xff] }
  0xbc   :  { %5003 = vst [vmem:[#allocation18_spill] sm:$0xff] %v2727_v24  ;;  %v2763_v18 = vmax.f32 %v409_v10, %v5025_v51  ;;  %v2766_v4 = vmax.f32 %v410_v43, %v5027_v23  ;;  %v2769_v11 = vmax.f32 %v411_v21, %v5029_v3  ;;  %v5031_v28 = vld [vmem:[#allocation39_spill] sm:$0xff]  ;;  %v5033_v20 = vld [vmem:[#allocation40_spill] sm:$0xff]  ;;  %v5035_v48 = vld [vmem:[#allocation41_spill] sm:$0xff] }
  0xbd   :  { %5006 = vst [vmem:[#allocation25_spill] sm:$0xff] %v2733_v15  ;;  %v2772_v41 = vmax.f32 %v412_v39, %v5031_v28  ;;  %v2775_v2 = vmax.f32 %v413_v26, %v5033_v20  ;;  %v2778_v25 = vmax.f32 %v414_v32, %v5035_v48  ;;  %v5037_v33 = vld [vmem:[#allocation42_spill] sm:$0xff]  ;;  %v5039_v10 = vld [vmem:[#allocation43_spill] sm:$0xff]  ;;  %v5041_v43 = vld [vmem:[#allocation44_spill] sm:$0xff] }
  0xbe   :  { %5008 = vst [vmem:[#allocation68_spill] sm:$0xff] %v2736_v12  ;;  %v2781_v58 = vmax.f32 %v415_v7, %v5037_v33  ;;  %v2784_v51 = vmax.f32 %v416_v0, %v5039_v10  ;;  %v2787_v23 = vmax.f32 %v417_v8, %v5041_v43  ;;  %v5043_v21 = vld [vmem:[#allocation45_spill] sm:$0xff]  ;;  %v5045_v39 = vld [vmem:[#allocation46_spill] sm:$0xff]  ;;  %v5047_v26 = vld [vmem:[#allocation47_spill] sm:$0xff] }
  0xbf   :  { %5010 = vst [vmem:[#allocation69_spill] sm:$0xff] %v2739_v9  ;;  %v2790_v3 = vmax.f32 %v418_v47, %v5043_v21  ;;  %v2793_v28 = vmax.f32 %v419_v55, %v5045_v39  ;;  %v2796_v20 = vmax.f32 %v420_v50, %v5047_v26  ;;  %v5049_v32 = vld [vmem:[#allocation48_spill] sm:$0xff]  ;;  %v5051_v7 = vld [vmem:[#allocation49_spill] sm:$0xff]  ;;  %v5053_v0 = vld [vmem:[#allocation50_spill] sm:$0xff] }
  0xc0   :  { %5012 = vst [vmem:[#allocation70_spill] sm:$0xff] %v2742_v1  ;;  %v2799_v48 = vmax.f32 %v421_v36, %v5049_v32  ;;  %v2802_v33 = vmax.f32 %v422_v49, %v5051_v7  ;;  %v2805_v10 = vmax.f32 %v423_v60, %v5053_v0  ;;  %v5055_v8 = vld [vmem:[#allocation51_spill] sm:$0xff]  ;;  %v5057_v47 = vld [vmem:[#allocation52_spill] sm:$0xff]  ;;  %v5059_v55 = vld [vmem:[#allocation53_spill] sm:$0xff] }
  0xc1   :  { %5014 = vst [vmem:[#allocation71_spill] sm:$0xff] %v2745_v19  ;;  %v2808_v43 = vmax.f32 %v424_v62, %v5055_v8  ;;  %v2811_v21 = vmax.f32 %v425_v54, %v5057_v47  ;;  %v2814_v39 = vmax.f32 %v426_v56, %v5059_v55  ;;  %v5061_v50 = vld [vmem:[#allocation54_spill] sm:$0xff]  ;;  %v5063_v36 = vld [vmem:[#allocation55_spill] sm:$0xff]  ;;  %v5065_v49 = vld [vmem:[#allocation56_spill] sm:$0xff] }
  0xc2   :  { %5016 = vst [vmem:[#allocation72_spill] sm:$0xff] %v2748_v5  ;;  %v2817_v26 = vmax.f32 %v427_v6, %v5061_v50  ;;  %v2820_v32 = vmax.f32 %v428_v42, %v5063_v36  ;;  %v2823_v7 = vmax.f32 %v429_v59, %v5065_v49  ;;  %v5067_v60 = vld [vmem:[#allocation57_spill] sm:$0xff]  ;;  %v5069_v62 = vld [vmem:[#allocation58_spill] sm:$0xff]  ;;  %v5071_v54 = vld [vmem:[#allocation59_spill] sm:$0xff]  ;;  %v538_v6 = vrot.slane %v2715_v46, 1 }
  0xc3   :  { %5018 = vst [vmem:[#allocation73_spill] sm:$0xff] %v2751_v45  ;;  %v2826_v0 = vmax.f32 %v430_v31, %v5067_v60  ;;  %v2829_v8 = vmax.f32 %v431_v37, %v5069_v62  ;;  %v2832_v47 = vmax.f32 %v432_v57, %v5071_v54  ;;  %v5073_v56 = vld [vmem:[#allocation60_spill] sm:$0xff]  ;;  %v539_v42 = vrot.slane %v2718_v34, 1  ;;  %v5075_v36 = vld [vmem:[#allocation61_spill] sm:$0xff] }
  0xc4   :  { %5020 = vst [vmem:[#allocation74_spill] sm:$0xff] %v2754_v61  ;;  %v2835_v55 = vmax.f32 %v433_v52, %v5073_v56  ;;  %v541_v50 = vrot.slane %v2721_v63, 1  ;;  %v543_v59 = vrot.slane %v2724_v40, 1  ;;  %v544_v31 = vrot.slane %v2727_v24, 1  ;;  %v5078_v52 = vld [vmem:[#allocation63_spill] sm:$0xff]  ;;  %v5081_v54 = vld [vmem:[#allocation65_spill] sm:$0xff] }
  0xc5   :  { %5022 = vst [vmem:[#allocation75_spill] sm:$0xff] %v2757_v53  ;;  %v546_v37 = vrot.slane %v2730_v13, 1  ;;  %v2844_v49 = vmax.f32 %v434_v27, %v5075_v36  ;;  %v2847_v57 = vmax.f32 %v435_v30, %v4988_v44  ;;  %v2850_v60 = vmax.f32 %v436_v38, %v5078_v52  ;;  %v5083_v63 = vld [vmem:[#allocation66_spill] sm:$0xff]  ;;  %v5085_v24 = vld [vmem:[#allocation67_spill] sm:$0xff] }
  0xc6   :  { %5024 = vst [vmem:[#allocation76_spill] sm:$0xff] %v2760_v22  ;;  %v2853_v62 = vmax.f32 %v437_v14, %v4992_v35  ;;  %v2856_v56 = vmax.f32 %v438_v29, %v5081_v54  ;;  %v2859_v40 = vmax.f32 %v439_v16, %v5083_v63  ;;  %v2862_v13 = vmax.f32 %v440_v17, %v5085_v24 }
  0xc7   :  { %5026 = vst [vmem:[#allocation77_spill] sm:$0xff] %v2763_v18  ;;  %v548_v27 = vrot.slane %v2733_v15, 1  ;;  %v2866_v44 = vsel %vm537_vm0, %v538_v6, %v539_v42  ;;  %v2869_v30 = vsel %vm537_vm0, %v539_v42, %v541_v50  ;;  %v549_v35 = vrot.slane %v2736_v12, 1 }
  0xc8   :  { %5028 = vst [vmem:[#allocation78_spill] sm:$0xff] %v2766_v4  ;;  %v551_v14 = vrot.slane %v2739_v9, 1  ;;  %v2874_v29 = vsel %vm537_vm0, %v543_v59, %v544_v31  ;;  %v2877_v16 = vsel %vm537_vm0, %v544_v31, %v546_v37  ;;  %v553_v17 = vrot.slane %v2742_v1, 1 }
  0xc9   :  { %5030 = vst [vmem:[#allocation79_spill] sm:$0xff] %v2769_v11  ;;  %v554_v38 = vrot.slane %v2745_v19, 1  ;;  %v556_v63 = vrot.slane %v2748_v5, 1  ;;  %v558_v24 = vrot.slane %v2751_v45, 1  ;;  %v559_v6 = vrot.slane %v2754_v61, 1 }
  0xca   :  { %5032 = vst [vmem:[#allocation80_spill] sm:$0xff] %v2772_v41  ;;  %v561_v42 = vrot.slane %v2757_v53, 1  ;;  %v563_v50 = vrot.slane %v2760_v22, 1  ;;  %v564_v59 = vrot.slane %v2763_v18, 1  ;;  %v566_v36 = vrot.slane %v2766_v4, 1 }
  0xcb   :  { %5034 = vst [vmem:[#allocation81_spill] sm:$0xff] %v2775_v2  ;;  %v568_v31 = vrot.slane %v2769_v11, 1  ;;  %v569_v37 = vrot.slane %v2772_v41, 1  ;;  %v571_v52 = vrot.slane %v2775_v2, 1  ;;  %v573_v54 = vrot.slane %v2778_v25, 1 }
  0xcc   :  { %5036 = vst [vmem:[#allocation82_spill] sm:$0xff] %v2778_v25  ;;  %v574_v5 = vrot.slane %v2781_v58, 1  ;;  %v2894_v9 = vsel %vm537_vm0, %v548_v27, %v549_v35  ;;  %v2897_v53 = vsel %vm537_vm0, %v549_v35, %v551_v14  ;;  %v2900_v18 = vsel %vm537_vm0, %v553_v17, %v554_v38 }
  0xcd   :  { %5038 = vst [vmem:[#allocation83_spill] sm:$0xff] %v2781_v58  ;;  %v576_v4 = vrot.slane %v2784_v51, 1  ;;  %v2904_v11 = vsel %vm537_vm0, %v554_v38, %v556_v63  ;;  %v578_v2 = vrot.slane %v2787_v23, 1  ;;  %v579_v25 = vrot.slane %v2790_v3, 1 }
  0xce   :  { %5040 = vst [vmem:[#allocation84_spill] sm:$0xff] %v2784_v51  ;;  %v581_v58 = vrot.slane %v2793_v28, 1  ;;  %v2910_v27 = vsel %vm537_vm0, %v558_v24, %v559_v6  ;;  %v2913_v35 = vsel %vm537_vm0, %v559_v6, %v561_v42  ;;  %v2916_v14 = vsel %vm537_vm0, %v563_v50, %v564_v59 }
  0xcf   :  { %5042 = vst [vmem:[#allocation85_spill] sm:$0xff] %v2787_v23  ;;  %v2919_v17 = vsel %vm537_vm0, %v564_v59, %v566_v36  ;;  %v2922_v38 = vsel %vm537_vm0, %v568_v31, %v569_v37  ;;  %v2925_v63 = vsel %vm537_vm0, %v569_v37, %v571_v52  ;;  %v583_v24 = vrot.slane %v2796_v20, 1 }
  0xd0   :  { %5044 = vst [vmem:[#allocation86_spill] sm:$0xff] %v2790_v3  ;;  %v2932_v6 = vsel %vm537_vm0, %v574_v5, %v576_v4  ;;  %v584_v42 = vrot.slane %v2799_v48, 1  ;;  %v586_v50 = vrot.slane %v2802_v33, 1  ;;  %v588_v59 = vrot.slane %v2805_v10, 1 }
  0xd1   :  { %5046 = vst [vmem:[#allocation87_spill] sm:$0xff] %v2793_v28  ;;  %v2928_v28 = vsel %vm537_vm0, %v573_v54, %v574_v5  ;;  %v2938_v36 = vsel %vm537_vm0, %v578_v2, %v579_v25  ;;  %v2941_v31 = vsel %vm537_vm0, %v579_v25, %v581_v58  ;;  %v589_v37 = vrot.slane %v2808_v43, 1 }
  0xd2   :  { %5048 = vst [vmem:[#allocation88_spill] sm:$0xff] %v2796_v20  ;;  %v591_v52 = vrot.slane %v2811_v21, 1  ;;  %v593_v54 = vrot.slane %v2814_v39, 1  ;;  %v594_v5 = vrot.slane %v2817_v26, 1  ;;  %v596_v4 = vrot.slane %v2820_v32, 1 }
  0xd3   :  { %5050 = vst [vmem:[#allocation89_spill] sm:$0xff] %v2799_v48  ;;  %v599_v51 = vrot.slane %v2826_v0, 1  ;;  %v601_v2 = vrot.slane %v2829_v8, 1  ;;  %v604_v25 = vrot.slane %v2835_v55, 1  ;;  %v606_v58 = vrot.slane %v2844_v49, 1 }
  0xd4   :  { %5052 = vst [vmem:[#allocation90_spill] sm:$0xff] %v2802_v33  ;;  %v598_v33 = vrot.slane %v2823_v7, 1 }
  0xd5   :  { %5054 = vst [vmem:[#allocation91_spill] sm:$0xff] %v2805_v10  ;;  %v603_v10 = vrot.slane %v2832_v47, 1 }
  0xd6   :  { %5056 = vst [vmem:[#allocation92_spill] sm:$0xff] %v2808_v43 }
  0xd7   :  { %5058 = vst [vmem:[#allocation93_spill] sm:$0xff] %v2811_v21  ;;  %v608_v21 = vrot.slane %v2847_v57, 1 }
  0xd8   :  { %5060 = vst [vmem:[#allocation94_spill] sm:$0xff] %v2814_v39  ;;  %v609_v39 = vrot.slane %v2850_v60, 1 }
  0xd9   :  { %5062 = vst [vmem:[#allocation95_spill] sm:$0xff] %v2817_v26  ;;  %v611_v26 = vrot.slane %v2853_v62, 1 }
  0xda   :  { %5064 = vst [vmem:[#allocation96_spill] sm:$0xff] %v2820_v32  ;;  %v2958_v32 = vsel %vm537_vm0, %v583_v24, %v584_v42  ;;  %v2976_v24 = vsel %vm537_vm0, %v594_v5, %v596_v4  ;;  %v5117_v4 = vld [vmem:[#allocation83_spill] sm:$0xff] }
  0xdb   :  { %5066 = vst [vmem:[#allocation97_spill] sm:$0xff] %v2823_v7  ;;  %v2961_v7 = vsel %vm537_vm0, %v584_v42, %v586_v50  ;;  %v2979_v42 = vsel %vm537_vm0, %v598_v33, %v599_v51  ;;  %v2982_v50 = vsel %vm537_vm0, %v599_v51, %v601_v2  ;;  %v5112_v2 = vld [vmem:[#allocation18_spill] sm:$0xff] }
  0xdc   :  { %5068 = vst [vmem:[#allocation98_spill] sm:$0xff] %v2826_v0 }
  0xdd   :  { %5070 = vst [vmem:[#allocation99_spill] sm:$0xff] %v2829_v8  ;;  %v613_v8 = vrot.slane %v2856_v56, 1 }
  0xde   :  { %5072 = vst [vmem:[#allocation100_spill] sm:$0xff] %v2832_v47  ;;  %v614_v47 = vrot.slane %v2859_v40, 1 }
  0xdf   :  { %5074 = vst [vmem:[#allocation101_spill] sm:$0xff] %v2835_v55  ;;  %v2966_v55 = vsel %vm537_vm0, %v588_v59, %v589_v37  ;;  %v2985_v59 = vsel %vm537_vm0, %v603_v10, %v604_v25  ;;  %v5111_v10 = vld [vmem:[#allocation17_spill] sm:$0xff] }
  0xe0   :  { %5076 = vst [vmem:[#allocation102_spill] sm:$0xff] %v2844_v49  ;;  %v2969_v49 = vsel %vm537_vm0, %v589_v37, %v591_v52  ;;  %v2988_v37 = vsel %vm537_vm0, %v604_v25, %v606_v58  ;;  %v2991_v52 = vsel %vm537_vm0, %v608_v21, %v609_v39  ;;  %v2999_v33 = vsel %vm537_vm0, %v613_v8, %v614_v47  ;;  %v5116_v58 = vld [vmem:[#allocation82_spill] sm:$0xff]  ;;  %v5118_v8 = vld [vmem:[#allocation91_spill] sm:$0xff] }
  0xe1   :  { %5077 = vst [vmem:[#allocation103_spill] sm:$0xff] %v2847_v57  ;;  %v5120_v25 = vld [vmem:[#allocation95_spill] sm:$0xff]  ;;  %v688_v51 = vrot.slane %v5111_v10, 2 }
  0xe2   :  { %5079 = vst [vmem:[#allocation104_spill] sm:$0xff] %v2850_v60  ;;  %v2972_v60 = vsel %vm537_vm0, %v593_v54, %v594_v5  ;;  %v2994_v54 = vsel %vm537_vm0, %v609_v39, %v611_v26  ;;  %v5115_v26 = vld [vmem:[#allocation79_spill] sm:$0xff]  ;;  %v684_v39 = vrot.slane %v2718_v34, 2  ;;  %v5123_v5 = vld [vmem:[#allocation97_spill] sm:$0xff] }
  0xe3   :  { %5080 = vst [vmem:[#allocation62_spill] sm:$0xff] %v2853_v62  ;;  %v616_v62 = vrot.slane %v2862_v13, 1 }
  0xe4   :  { %5082 = vst [vmem:[#allocation105_spill] sm:$0xff] %v2856_v56 }
  0xe5   :  { %5084 = vst [vmem:[#allocation106_spill] sm:$0xff] %v2859_v40  ;;  %v3008_v21 = vsel %vm537_vm0, %v614_v47, %v616_v62  ;;  %v5114_v62 = vld [vmem:[#allocation77_spill] sm:$0xff]  ;;  %v683_v47 = vrot.slane %v2715_v46, 2 }
  0xe6   :  { %5086 = vst [vmem:[#allocation64_spill] sm:$0xff] %v2862_v13 }
  0xe7   :  { %5087 = vst [vmem:[#allocation107_spill] sm:$0xff] %v2904_v11  ;;  %v5132_v11 = vld [vmem:[#allocation84_spill] sm:$0xff] }
  0xe8   :  { %5088 = vst [vmem:[#allocation20_spill] sm:$0xff] %v2910_v27  ;;  %v5119_v27 = vld [vmem:[#allocation94_spill] sm:$0xff] }
  0xe9   :  { %5089 = vst [vmem:[#allocation21_spill] sm:$0xff] %v2913_v35 }
  0xea   :  { %5090 = vst [vmem:[#allocation22_spill] sm:$0xff] %v2916_v14  ;;  %v698_v14 = vrot.slane %v2742_v1, 2 }
  0xeb   :  { %5091 = vst [vmem:[#allocation23_spill] sm:$0xff] %v2919_v17 }
  0xec   :  { %5092 = vst [vmem:[#allocation24_spill] sm:$0xff] %v2922_v38 }
  0xed   :  { %5093 = vst [vmem:[#allocation26_spill] sm:$0xff] %v2925_v63  ;;  %v689_v63 = vrot.slane %v5112_v2, 2 }
  0xee   :  { %5094 = vst [vmem:[#allocation27_spill] sm:$0xff] %v2928_v28 }
  0xef   :  { %5095 = vst [vmem:[#allocation28_spill] sm:$0xff] %v2932_v6  ;;  %v3082_v38 = vsel %vm682_vm1, %v688_v51, %v689_v63  ;;  %v699_v6 = vrot.slane %v2745_v19, 2  ;;  %v708_v51 = vrot.slane %v2760_v22, 2  ;;  %v5133_v19 = vld [vmem:[#allocation87_spill] sm:$0xff] }
  0xf0   :  { %5096 = vst [vmem:[#allocation29_spill] sm:$0xff] %v2938_v36  ;;  %v693_v36 = vrot.slane %v2733_v15, 2 }
  0xf1   :  { %5097 = vst [vmem:[#allocation30_spill] sm:$0xff] %v2941_v31  ;;  %v700_v22 = vsel %vm682_vm1, %v698_v14, %v699_v6 }
  0xf2   :  { %5098 = vst [vmem:[#allocation31_spill] sm:$0xff] %v2958_v32  ;;  %v5121_v32 = vld [vmem:[#allocation16_spill] sm:$0xff] }
  0xf3   :  { %5099 = vst [vmem:[#allocation32_spill] sm:$0xff] %v2961_v7  ;;  %v686_v31 = vrot.slane %v5121_v32, 2  ;;  %v5125_v32 = vld [vmem:[#allocation101_spill] sm:$0xff] }
  0xf4   :  { %5100 = vst [vmem:[#allocation33_spill] sm:$0xff] %v2966_v55  ;;  %v5122_v55 = vld [vmem:[#allocation19_spill] sm:$0xff] }
  0xf5   :  { %5101 = vst [vmem:[#allocation34_spill] sm:$0xff] %v2969_v49  ;;  %v691_v7 = vrot.slane %v5122_v55, 2  ;;  %v5126_v55 = vld [vmem:[#allocation104_spill] sm:$0xff] }
  0xf6   :  { %5102 = vst [vmem:[#allocation35_spill] sm:$0xff] %v2972_v60  ;;  %v5124_v60 = vld [vmem:[#allocation100_spill] sm:$0xff] }
  0xf7   :  { %5103 = vst [vmem:[#allocation36_spill] sm:$0xff] %v2976_v24  ;;  %v694_v24 = vrot.slane %v2736_v12, 2  ;;  %v3085_v17 = vsel %vm682_vm1, %v689_v63, %v691_v7  ;;  %v709_v7 = vrot.slane %v5114_v62, 2  ;;  %v5130_v63 = vld [vmem:[#allocation78_spill] sm:$0xff]  ;;  %v723_v62 = vrot.slane %v2787_v23, 2 }
  0xf8   :  { %5104 = vst [vmem:[#allocation37_spill] sm:$0xff] %v2979_v42  ;;  %v5127_v42 = vld [vmem:[#allocation69_spill] sm:$0xff]  ;;  %v728_v23 = vrot.slane %v2796_v20, 2  ;;  %v5139_v20 = vld [vmem:[#allocation62_spill] sm:$0xff] }
  0xf9   :  { %5105 = vst [vmem:[#allocation38_spill] sm:$0xff] %v2982_v50  ;;  %v3075_v50 = vsel %vm682_vm1, %v683_v47, %v684_v39  ;;  %v696_v28 = vrot.slane %v5127_v42, 2  ;;  %v3089_v49 = vsel %vm682_vm1, %v693_v36, %v694_v24  ;;  %v5128_v47 = vld [vmem:[#allocation72_spill] sm:$0xff]  ;;  %v703_v42 = vrot.slane %v2751_v45, 2 }
  0xfa   :  { %5106 = vst [vmem:[#allocation39_spill] sm:$0xff] %v2985_v59  ;;  %v3079_v59 = vsel %vm682_vm1, %v684_v39, %v686_v31  ;;  %v704_v31 = vrot.slane %v2754_v61, 2  ;;  %v5129_v39 = vld [vmem:[#allocation75_spill] sm:$0xff]  ;;  %v714_v36 = vrot.slane %v2772_v41, 2  ;;  %v718_v45 = vrot.slane %v5116_v58, 2 }
  0xfb   :  { %5107 = vst [vmem:[#allocation40_spill] sm:$0xff] %v2988_v37  ;;  %v5131_v37 = vld [vmem:[#allocation81_spill] sm:$0xff]  ;;  %v719_v61 = vrot.slane %v5117_v4, 2 }
  0xfc   :  { %5108 = vst [vmem:[#allocation41_spill] sm:$0xff] %v2991_v52  ;;  %v713_v52 = vrot.slane %v5115_v26, 2  ;;  %v716_v35 = vrot.slane %v5131_v37, 2  ;;  %v726_v26 = vrot.slane %v5133_v19, 2  ;;  %v705_v37 = vsel %vm682_vm1, %v703_v42, %v704_v31 }
  0xfd   :  { %5109 = vst [vmem:[#allocation42_spill] sm:$0xff] %v2994_v54  ;;  %v711_v54 = vrot.slane %v5130_v63, 2  ;;  %v724_v63 = vrot.slane %v2790_v3, 2  ;;  %v720_v3 = vsel %vm682_vm1, %v718_v45, %v719_v61  ;;  %v739_v45 = vrot.slane %v5120_v25, 2 }
  0xfe   :  { %5110 = vst [vmem:[#allocation43_spill] sm:$0xff] %v2999_v33  ;;  %v706_v33 = vrot.slane %v5129_v39, 2  ;;  %v721_v39 = vrot.slane %v5132_v11, 2  ;;  %v715_v11 = vsel %vm682_vm1, %v713_v52, %v714_v36  ;;  %v717_v14 = vsel %vm682_vm1, %v714_v36, %v716_v35  ;;  %v5136_v36 = vld [vmem:[#allocation96_spill] sm:$0xff] }
  0xff   :  { %5113 = vst [vmem:[#allocation44_spill] sm:$0xff] %v3008_v21  ;;  %v701_v21 = vrot.slane %v5128_v47, 2  ;;  %v697_v47 = vsel %vm682_vm1, %v694_v24, %v696_v28  ;;  %v710_v24 = vsel %vm682_vm1, %v708_v51, %v709_v7  ;;  %v712_v4 = vsel %vm682_vm1, %v709_v7, %v711_v54  ;;  %v5135_v51 = vld [vmem:[#allocation93_spill] sm:$0xff] }
 0x100   :  { %v707_v28 = vsel %vm682_vm1, %v704_v31, %v706_v33  ;;  %v722_v19 = vsel %vm682_vm1, %v719_v61, %v721_v39  ;;  %v725_v33 = vsel %vm682_vm1, %v723_v62, %v724_v63  ;;  %v727_v31 = vsel %vm682_vm1, %v724_v63, %v726_v26 }
 0x101   :  { %v702_v41 = vsel %vm682_vm1, %v699_v6, %v701_v21  ;;  %v729_v6 = vrot.slane %v2799_v48, 2  ;;  %v5134_v21 = vld [vmem:[#allocation90_spill] sm:$0xff]  ;;  %v733_v54 = vrot.slane %v5118_v8, 2  ;;  %v734_v52 = vrot.slane %v2808_v43, 2  ;;  %v5137_v48 = vld [vmem:[#allocation99_spill] sm:$0xff] }
 0x102   :  { %v731_v42 = vrot.slane %v5134_v21, 2  ;;  %v736_v35 = vrot.slane %v5135_v51, 2  ;;  %v738_v7 = vrot.slane %v5119_v27, 2  ;;  %v741_v61 = vrot.slane %v5136_v36, 2  ;;  %v5138_v8 = vld [vmem:[#allocation102_spill] sm:$0xff] }
 0x103   :  { %v743_v39 = vrot.slane %v5123_v5, 2  ;;  %v744_v21 = vrot.slane %v2826_v0, 2  ;;  %v746_v62 = vrot.slane %v5137_v48, 2  ;;  %v748_v26 = vrot.slane %v5124_v60, 2 }
 0x104   :  { %v749_v63 = vrot.slane %v5125_v32, 2  ;;  %v751_v43 = vrot.slane %v5138_v8, 2  ;;  %v753_v51 = vrot.slane %v2847_v57, 2  ;;  %v754_v27 = vrot.slane %v5126_v55, 2 }
 0x105   :  { %v730_v25 = vsel %vm682_vm1, %v728_v23, %v729_v6  ;;  %v732_v36 = vsel %vm682_vm1, %v729_v6, %v731_v42  ;;  %v735_v5 = vsel %vm682_vm1, %v733_v54, %v734_v52  ;;  %v756_v0 = vrot.slane %v5139_v20, 2 }
 0x106   :  { %v737_v48 = vsel %vm682_vm1, %v734_v52, %v736_v35  ;;  %v758_v60 = vrot.slane %v2856_v56, 2  ;;  %v759_v32 = vrot.slane %v2859_v40, 2  ;;  %v761_v8 = vrot.slane %v2862_v13, 2 }
 0x107   :  { %v740_v57 = vsel %vm682_vm1, %v738_v7, %v739_v45  ;;  %v742_v55 = vsel %vm682_vm1, %v739_v45, %v741_v61  ;;  %v745_v23 = vsel %vm682_vm1, %v743_v39, %v744_v21  ;;  %v747_v6 = vsel %vm682_vm1, %v744_v21, %v746_v62  ;;  %v5151_v62 = vld [vmem:[#allocation20_spill] sm:$0xff] }
 0x108   :  { %v750_v42 = vsel %vm682_vm1, %v748_v26, %v749_v63  ;;  %v752_v54 = vsel %vm682_vm1, %v749_v63, %v751_v43  ;;  %v755_v52 = vsel %vm682_vm1, %v753_v51, %v754_v27  ;;  %v5140_v35 = vmax.f32 %v2715_v46, %v2866_v44  ;;  %v5147_v51 = vld [vmem:[#allocation71_spill] sm:$0xff]  ;;  %v5154_v26 = vld [vmem:[#allocation74_spill] sm:$0xff]  ;;  %v5155_v63 = vld [vmem:[#allocation21_spill] sm:$0xff] }
 0x109   :  { %v757_v7 = vsel %vm682_vm1, %v754_v27, %v756_v0  ;;  %v5141_v45 = vmax.f32 %v2718_v34, %v2869_v30  ;;  %v5142_v43 = vmax.f32 %v5111_v10, %v2874_v29  ;;  %v5143_v44 = vmax.f32 %v5112_v2, %v2877_v16 }
 0x10a   :  { %v3157_v20 = vmax.f32 %v5140_v35, %v3075_v50  ;;  %v760_v0 = vsel %vm682_vm1, %v758_v60, %v759_v32  ;;  %v762_v27 = vsel %vm682_vm1, %v759_v32, %v761_v8  ;;  %v5144_v30 = vmax.f32 %v2733_v15, %v2894_v9  ;;  %v5148_v60 = vld [vmem:[#allocation107_spill] sm:$0xff]  ;;  %v5150_v8 = vld [vmem:[#allocation73_spill] sm:$0xff]  ;;  %v5158_v35 = vld [vmem:[#allocation76_spill] sm:$0xff] }
 0x10b   :  { %v3164_v61 = vmax.f32 %v5141_v45, %v3079_v59  ;;  %v3170_v21 = vmax.f32 %v5142_v43, %v3082_v38  ;;  %v3176_v50 = vmax.f32 %v5143_v44, %v3085_v17  ;;  %v5145_v29 = vmax.f32 %v2736_v12, %v2897_v53  ;;  %v5159_v45 = vld [vmem:[#allocation22_spill] sm:$0xff]  ;;  %v5162_v43 = vld [vmem:[#allocation77_spill] sm:$0xff]  ;;  %v5163_v44 = vld [vmem:[#allocation23_spill] sm:$0xff] }
 0x10c   :  { %v3184_v59 = vmax.f32 %v5144_v30, %v3089_v49  ;;  %v5146_v16 = vmax.f32 %v2742_v1, %v2900_v18  ;;  %v5149_v39 = vmax.f32 %v5147_v51, %v5148_v60  ;;  %v5152_v9 = vmax.f32 %v5150_v8, %v5151_v62  ;;  %v5171_v62 = vld [vmem:[#allocation26_spill] sm:$0xff] }
 0x10d   :  { %v3189_v38 = vmax.f32 %v5145_v29, %v697_v47  ;;  %v5156_v53 = vmax.f32 %v5154_v26, %v5155_v63  ;;  %v5160_v18 = vmax.f32 %v5158_v35, %v5159_v45  ;;  %v5164_v30 = vmax.f32 %v5162_v43, %v5163_v44  ;;  %v5166_v29 = vld [vmem:[#allocation79_spill] sm:$0xff] }
 0x10e   :  { %v3194_v17 = vmax.f32 %v5146_v16, %v700_v22  ;;  %v3199_v32 = vmax.f32 %v5149_v39, %v702_v41  ;;  %v3204_v49 = vmax.f32 %v5152_v9, %v705_v37  ;;  %v5167_v16 = vld [vmem:[#allocation24_spill] sm:$0xff]  ;;  %v5174_v63 = vld [vmem:[#allocation27_spill] sm:$0xff] }
 0x10f   :  { %v3209_v47 = vmax.f32 %v5156_v53, %v707_v28  ;;  %v3214_v22 = vmax.f32 %v5160_v18, %v710_v24  ;;  %v3219_v41 = vmax.f32 %v5164_v30, %v712_v4  ;;  %v5168_v60 = vmax.f32 %v5166_v29, %v5167_v16  ;;  %v5170_v39 = vld [vmem:[#allocation80_spill] sm:$0xff]  ;;  %v5177_v45 = vld [vmem:[#allocation83_spill] sm:$0xff]  ;;  %v5181_v30 = vld [vmem:[#allocation85_spill] sm:$0xff] }
 0x110   :  { %5153 = vst [vmem:[#allocation45_spill] sm:$0xff] %v3204_v49  ;;  %v5172_v9 = vmax.f32 %v5170_v39, %v5171_v62  ;;  %v5175_v53 = vmax.f32 %v5116_v58, %v5174_v63  ;;  %v5178_v18 = vld [vmem:[#allocation28_spill] sm:$0xff]  ;;  %v5342_v49 = vld [vmem:[#allocation105_spill] sm:$0xff] }
 0x111   :  { %5157 = vst [vmem:[#allocation46_spill] sm:$0xff] %v3209_v47  ;;  %v3224_v37 = vmax.f32 %v5168_v60, %v715_v11  ;;  %v5179_v44 = vmax.f32 %v5177_v45, %v5178_v18  ;;  %v5185_v60 = vld [vmem:[#allocation86_spill] sm:$0xff] }
 0x112   :  { %5161 = vst [vmem:[#allocation47_spill] sm:$0xff] %v3214_v22  ;;  %v3229_v28 = vmax.f32 %v5172_v9, %v717_v14  ;;  %v3234_v24 = vmax.f32 %v5175_v53, %v720_v3  ;;  %v5189_v9 = vld [vmem:[#allocation88_spill] sm:$0xff]  ;;  %v5193_v53 = vld [vmem:[#allocation89_spill] sm:$0xff]  ;;  %v5236_v47 = vld [vmem:[#allocation42_spill] sm:$0xff] }
 0x113   :  { %5165 = vst [vmem:[#allocation48_spill] sm:$0xff] %v3219_v41  ;;  %v3239_v4 = vmax.f32 %v5179_v44, %v722_v19  ;;  %v5182_v41 = vld [vmem:[#allocation29_spill] sm:$0xff]  ;;  %v5197_v44 = vld [vmem:[#allocation91_spill] sm:$0xff] }
 0x114   :  { %5169 = vst [vmem:[#allocation49_spill] sm:$0xff] %v3224_v37  ;;  %v5183_v16 = vmax.f32 %v5181_v30, %v5182_v41  ;;  %v5186_v37 = vld [vmem:[#allocation30_spill] sm:$0xff] }
 0x115   :  { %5173 = vst [vmem:[#allocation50_spill] sm:$0xff] %v3229_v28  ;;  %v5187_v62 = vmax.f32 %v5185_v60, %v5186_v37  ;;  %v5190_v28 = vld [vmem:[#allocation31_spill] sm:$0xff] }
 0x116   :  { %5176 = vst [vmem:[#allocation51_spill] sm:$0xff] %v3234_v24  ;;  %v3244_v11 = vmax.f32 %v5183_v16, %v725_v33  ;;  %v5191_v63 = vmax.f32 %v5189_v9, %v5190_v28  ;;  %v5194_v24 = vld [vmem:[#allocation32_spill] sm:$0xff] }
 0x117   :  { %5180 = vst [vmem:[#allocation52_spill] sm:$0xff] %v3239_v4  ;;  %v3249_v14 = vmax.f32 %v5187_v62, %v727_v31  ;;  %v5195_v18 = vmax.f32 %v5193_v53, %v5194_v24  ;;  %v5198_v4 = vld [vmem:[#allocation33_spill] sm:$0xff]  ;;  %v5201_v16 = vld [vmem:[#allocation92_spill] sm:$0xff]  ;;  %v5205_v62 = vld [vmem:[#allocation94_spill] sm:$0xff] }
 0x118   :  { %5184 = vst [vmem:[#allocation53_spill] sm:$0xff] %v3244_v11  ;;  %v3254_v3 = vmax.f32 %v5191_v63, %v730_v25  ;;  %v5199_v41 = vmax.f32 %v5197_v44, %v5198_v4  ;;  %v5202_v11 = vld [vmem:[#allocation34_spill] sm:$0xff]  ;;  %v5209_v63 = vld [vmem:[#allocation95_spill] sm:$0xff] }
 0x119   :  { %5188 = vst [vmem:[#allocation54_spill] sm:$0xff] %v3249_v14  ;;  %v3259_v19 = vmax.f32 %v5195_v18, %v732_v36  ;;  %v5203_v37 = vmax.f32 %v5201_v16, %v5202_v11  ;;  %v5206_v14 = vld [vmem:[#allocation35_spill] sm:$0xff]  ;;  %v5213_v18 = vld [vmem:[#allocation97_spill] sm:$0xff]  ;;  %v5217_v11 = vld [vmem:[#allocation16_spill] sm:$0xff] }
 0x11a   :  { %5192 = vst [vmem:[#allocation55_spill] sm:$0xff] %v3254_v3  ;;  %v3264_v33 = vmax.f32 %v5199_v41, %v735_v5  ;;  %v5207_v28 = vmax.f32 %v5205_v62, %v5206_v14  ;;  %v5210_v3 = vld [vmem:[#allocation36_spill] sm:$0xff]  ;;  %v828_v41 = vrot.slane %v2715_v46, 3  ;;  %v833_v14 = vrot.slane %v5111_v10, 3  ;;  %v5227_v10 = vld [vmem:[#allocation101_spill] sm:$0xff] }
 0x11b   :  { %5196 = vst [vmem:[#allocation56_spill] sm:$0xff] %v3259_v19  ;;  %v3269_v31 = vmax.f32 %v5203_v37, %v737_v48  ;;  %v5211_v24 = vmax.f32 %v5209_v63, %v5210_v3  ;;  %v5214_v19 = vld [vmem:[#allocation37_spill] sm:$0xff]  ;;  %v829_v48 = vrot.slane %v2718_v34, 3  ;;  %v831_v37 = vrot.slane %v5217_v11, 3  ;;  %v5223_v46 = vld [vmem:[#allocation100_spill] sm:$0xff]  ;;  %v5224_v34 = vld [vmem:[#allocation39_spill] sm:$0xff] }
 0x11c   :  { %5200 = vst [vmem:[#allocation57_spill] sm:$0xff] %v3264_v33  ;;  %v3274_v25 = vmax.f32 %v5207_v28, %v740_v57  ;;  %v5215_v4 = vmax.f32 %v5213_v18, %v5214_v19  ;;  %v834_v57 = vrot.slane %v5112_v2, 3  ;;  %v5218_v28 = vld [vmem:[#allocation19_spill] sm:$0xff]  ;;  %v5219_v19 = vld [vmem:[#allocation98_spill] sm:$0xff]  ;;  %v5232_v33 = vld [vmem:[#allocation41_spill] sm:$0xff] }
 0x11d   :  { %5204 = vst [vmem:[#allocation58_spill] sm:$0xff] %v3269_v31  ;;  %v3279_v36 = vmax.f32 %v5211_v24, %v742_v55  ;;  %v836_v3 = vrot.slane %v5218_v28, 3  ;;  %v838_v55 = vrot.slane %v2733_v15, 3  ;;  %v839_v24 = vrot.slane %v2736_v12, 3  ;;  %v5231_v28 = vld [vmem:[#allocation103_spill] sm:$0xff]  ;;  %v5235_v12 = vld [vmem:[#allocation104_spill] sm:$0xff] }
 0x11e   :  { %5208 = vst [vmem:[#allocation59_spill] sm:$0xff] %v3274_v25  ;;  %v3284_v5 = vmax.f32 %v5215_v4, %v745_v23  ;;  %v5220_v23 = vld [vmem:[#allocation38_spill] sm:$0xff]  ;;  %v5228_v25 = vld [vmem:[#allocation40_spill] sm:$0xff]  ;;  %v5233_v15 = vmax.f32 %v5231_v28, %v5232_v33 }
 0x11f   :  { %5212 = vst [vmem:[#allocation60_spill] sm:$0xff] %v3279_v36  ;;  %v5221_v4 = vmax.f32 %v5219_v19, %v5220_v23  ;;  %v5225_v36 = vmax.f32 %v5223_v46, %v5224_v34  ;;  %v5229_v2 = vmax.f32 %v5227_v10, %v5228_v25  ;;  %v5237_v23 = vmax.f32 %v5235_v12, %v5236_v47 }
 0x120   :  { %5216 = vst [vmem:[#allocation61_spill] sm:$0xff] %v3284_v5  ;;  %v3312_v22 = vmax.f32 %v5233_v15, %v755_v52  ;;  %v3331_v15 = vsel %vm827_vm2, %v828_v41, %v829_v48  ;;  %v3334_v52 = vsel %vm827_vm2, %v829_v48, %v831_v37  ;;  %v843_v47 = vrot.slane %v2742_v1, 3  ;;  %v5247_v37 = vld [vmem:[#allocation75_spill] sm:$0xff]  ;;  %v5249_v1 = vld [vmem:[#allocation81_spill] sm:$0xff] }
 0x121   :  { %v3297_v5 = vmax.f32 %v5221_v4, %v747_v6  ;;  %v3302_v11 = vmax.f32 %v5225_v36, %v750_v42  ;;  %v3307_v31 = vmax.f32 %v5229_v2, %v752_v54  ;;  %v3317_v6 = vmax.f32 %v5237_v23, %v757_v7  ;;  %v5239_v4 = vld [vmem:[#allocation43_spill] sm:$0xff]  ;;  %v5242_v36 = vld [vmem:[#allocation44_spill] sm:$0xff]  ;;  %v5245_v54 = vld [vmem:[#allocation69_spill] sm:$0xff] }
 0x122   :  { %5234 = vst [vmem:[#allocation67_spill] sm:$0xff] %v3312_v22  ;;  %v5240_v34 = vmax.f32 %v2856_v56, %v5239_v4  ;;  %v5243_v25 = vmax.f32 %v2859_v40, %v5242_v36  ;;  %v3337_v7 = vsel %vm827_vm2, %v833_v14, %v834_v57  ;;  %v3344_v33 = vsel %vm827_vm2, %v838_v55, %v839_v24  ;;  %v5246_v23 = vld [vmem:[#allocation72_spill] sm:$0xff]  ;;  %v5310_v22 = vld [vmem:[#allocation70_spill] sm:$0xff] }
 0x123   :  { %5222 = vst [vmem:[#allocation63_spill] sm:$0xff] %v3297_v5  ;;  %v846_v4 = vrot.slane %v5246_v23, 3  ;;  %v848_v41 = vrot.slane %v5150_v8, 3  ;;  %v849_v48 = vrot.slane %v5154_v26, 3  ;;  %v853_v14 = vrot.slane %v5158_v35, 3 }
 0x124   :  { %5226 = vst [vmem:[#allocation65_spill] sm:$0xff] %v3302_v11  ;;  %v3322_v42 = vmax.f32 %v5240_v34, %v760_v0  ;;  %v3327_v2 = vmax.f32 %v5243_v25, %v762_v27  ;;  %v3341_v0 = vsel %vm827_vm2, %v834_v57, %v836_v3  ;;  %v844_v27 = vrot.slane %v5147_v51, 3  ;;  %v5248_v25 = vld [vmem:[#allocation78_spill] sm:$0xff] }
 0x125   :  { %5230 = vst [vmem:[#allocation66_spill] sm:$0xff] %v3307_v31  ;;  %v841_v31 = vrot.slane %v5245_v54, 3  ;;  %v851_v34 = vrot.slane %v5247_v37, 3  ;;  %v854_v36 = vrot.slane %v5162_v43, 3  ;;  %v856_v57 = vrot.slane %v5248_v25, 3  ;;  %v5250_v54 = vld [vmem:[#allocation84_spill] sm:$0xff] }
 0x126   :  { %5238 = vst [vmem:[#allocation107_spill] sm:$0xff] %v3317_v6  ;;  %v858_v3 = vrot.slane %v5166_v29, 3  ;;  %v859_v55 = vrot.slane %v5170_v39, 3  ;;  %v861_v51 = vrot.slane %v5249_v1, 3  ;;  %v863_v23 = vrot.slane %v5116_v58, 3  ;;  %v5251_v25 = vld [vmem:[#allocation87_spill] sm:$0xff] }
 0x127   :  { %5241 = vst [vmem:[#allocation20_spill] sm:$0xff] %v3322_v42  ;;  %v864_v8 = vrot.slane %v5177_v45, 3  ;;  %v866_v26 = vrot.slane %v5250_v54, 3  ;;  %v3361_v37 = vsel %vm827_vm2, %v839_v24, %v841_v31  ;;  %v868_v35 = vrot.slane %v5181_v30, 3  ;;  %v5313_v42 = vld [vmem:[#allocation73_spill] sm:$0xff]  ;;  %v5314_v6 = vld [vmem:[#allocation74_spill] sm:$0xff] }
 0x128   :  { %5244 = vst [vmem:[#allocation21_spill] sm:$0xff] %v3327_v2  ;;  %v869_v43 = vrot.slane %v5185_v60, 3  ;;  %v871_v2 = vrot.slane %v5251_v25, 3  ;;  %v3367_v29 = vsel %vm827_vm2, %v843_v47, %v844_v27  ;;  %v3370_v1 = vsel %vm827_vm2, %v844_v27, %v846_v4  ;;  %v5268_v60 = vld [vmem:[#allocation102_spill] sm:$0xff] }
 0x129   :  { %5252 = vst [vmem:[#allocation22_spill] sm:$0xff] %v3370_v1  ;;  %v873_v58 = vrot.slane %v5189_v9, 3  ;;  %v874_v45 = vrot.slane %v5193_v53, 3  ;;  %v3375_v54 = vsel %vm827_vm2, %v848_v41, %v849_v48  ;;  %v3378_v31 = vsel %vm827_vm2, %v849_v48, %v851_v34  ;;  %v5343_v1 = vld [vmem:[#allocation64_spill] sm:$0xff] }
 0x12a   :  { %5253 = vst [vmem:[#allocation23_spill] sm:$0xff] %v3375_v54  ;;  %v3381_v24 = vsel %vm827_vm2, %v853_v14, %v854_v36  ;;  %v3384_v25 = vsel %vm827_vm2, %v854_v36, %v856_v57  ;;  %v3387_v47 = vsel %vm827_vm2, %v858_v3, %v859_v55  ;;  %v3390_v27 = vsel %vm827_vm2, %v859_v55, %v861_v51  ;;  %v5263_v14 = vld [vmem:[#allocation90_spill] sm:$0xff] }
 0x12b   :  { %5254 = vst [vmem:[#allocation24_spill] sm:$0xff] %v3378_v31  ;;  %v3393_v4 = vsel %vm827_vm2, %v863_v23, %v864_v8  ;;  %v3396_v41 = vsel %vm827_vm2, %v864_v8, %v866_v26  ;;  %v3399_v48 = vsel %vm827_vm2, %v868_v35, %v869_v43  ;;  %v3402_v34 = vsel %vm827_vm2, %v869_v43, %v871_v2  ;;  %v5265_v23 = vld [vmem:[#allocation93_spill] sm:$0xff]  ;;  %v5266_v35 = vld [vmem:[#allocation96_spill] sm:$0xff] }
 0x12c   :  { %5255 = vst [vmem:[#allocation26_spill] sm:$0xff] %v3381_v24  ;;  %v876_v36 = vrot.slane %v5263_v14, 3  ;;  %v878_v57 = vrot.slane %v5197_v44, 3  ;;  %v3407_v3 = vsel %vm827_vm2, %v873_v58, %v874_v45  ;;  %v879_v51 = vrot.slane %v5201_v16, 3  ;;  %v5267_v14 = vld [vmem:[#allocation99_spill] sm:$0xff]  ;;  %v5321_v24 = vld [vmem:[#allocation82_spill] sm:$0xff] }
 0x12d   :  { %5256 = vst [vmem:[#allocation27_spill] sm:$0xff] %v3384_v25  ;;  %v881_v55 = vrot.slane %v5265_v23, 3  ;;  %v883_v8 = vrot.slane %v5205_v62, 3  ;;  %v884_v26 = vrot.slane %v5209_v63, 3  ;;  %v886_v53 = vrot.slane %v5266_v35, 3  ;;  %v5270_v35 = vld [vmem:[#allocation62_spill] sm:$0xff] }
 0x12e   :  { %5257 = vst [vmem:[#allocation28_spill] sm:$0xff] %v3387_v47  ;;  %v888_v43 = vrot.slane %v5213_v18, 3  ;;  %v889_v2 = vrot.slane %v5219_v19, 3  ;;  %v891_v9 = vrot.slane %v5267_v14, 3  ;;  %v893_v44 = vrot.slane %v5223_v46, 3  ;;  %v5309_v25 = vld [vmem:[#allocation69_spill] sm:$0xff] }
 0x12f   :  { %5258 = vst [vmem:[#allocation29_spill] sm:$0xff] %v3390_v27  ;;  %v894_v58 = vrot.slane %v5227_v10, 3  ;;  %v896_v16 = vrot.slane %v5268_v60, 3  ;;  %v3421_v23 = vsel %vm827_vm2, %v874_v45, %v876_v36  ;;  %v898_v62 = vrot.slane %v5231_v28, 3  ;;  %v5301_v27 = vld [vmem:[#allocation16_spill] sm:$0xff] }
 0x130   :  { %5259 = vst [vmem:[#allocation30_spill] sm:$0xff] %v3393_v4  ;;  %v899_v63 = vrot.slane %v5235_v12, 3  ;;  %v901_v30 = vrot.slane %v5270_v35, 3  ;;  %v3427_v18 = vsel %vm827_vm2, %v878_v57, %v879_v51  ;;  %v903_v14 = vrot.slane %v2856_v56, 3  ;;  %v5302_v4 = vld [vmem:[#allocation17_spill] sm:$0xff]  ;;  %v5323_v31 = vld [vmem:[#allocation84_spill] sm:$0xff] }
 0x131   :  { %5260 = vst [vmem:[#allocation31_spill] sm:$0xff] %v3396_v41  ;;  %v904_v46 = vrot.slane %v2859_v40, 3  ;;  %v906_v10 = vrot.slane %v2862_v13, 3  ;;  %v3433_v60 = vsel %vm827_vm2, %v879_v51, %v881_v55  ;;  %v3436_v45 = vsel %vm827_vm2, %v883_v8, %v884_v26  ;;  %v5303_v51 = vld [vmem:[#allocation18_spill] sm:$0xff]  ;;  %v5324_v8 = vld [vmem:[#allocation85_spill] sm:$0xff] }
 0x132   :  { %5261 = vst [vmem:[#allocation32_spill] sm:$0xff] %v3399_v48  ;;  %v3439_v36 = vsel %vm827_vm2, %v884_v26, %v886_v53  ;;  %v3442_v35 = vsel %vm827_vm2, %v888_v43, %v889_v2  ;;  %v3445_v57 = vsel %vm827_vm2, %v889_v2, %v891_v9  ;;  %v3448_v56 = vsel %vm827_vm2, %v893_v44, %v894_v58  ;;  %v5325_v26 = vld [vmem:[#allocation86_spill] sm:$0xff]  ;;  %v5334_v43 = vld [vmem:[#allocation95_spill] sm:$0xff]  ;;  %v5339_v2 = vld [vmem:[#allocation101_spill] sm:$0xff] }
 0x133   :  { %5262 = vst [vmem:[#allocation33_spill] sm:$0xff] %v3402_v34  ;;  %v3451_v13 = vsel %vm827_vm2, %v894_v58, %v896_v16  ;;  %v3456_v55 = vsel %vm827_vm2, %v898_v62, %v899_v63  ;;  %v3459_v53 = vsel %vm827_vm2, %v899_v63, %v901_v30  ;;  %v3466_v44 = vsel %vm827_vm2, %v903_v14, %v904_v46  ;;  %v5316_v34 = vld [vmem:[#allocation76_spill] sm:$0xff]  ;;  %v5326_v58 = vld [vmem:[#allocation87_spill] sm:$0xff]  ;;  %v5332_v14 = vld [vmem:[#allocation93_spill] sm:$0xff] }
 0x134   :  { %5264 = vst [vmem:[#allocation34_spill] sm:$0xff] %v3407_v3  ;;  %v3469_v16 = vsel %vm827_vm2, %v904_v46, %v906_v10  ;;  %v5299_v3 = vld [vmem:[#allocation14_spill] sm:$0xff]  ;;  %v979_v41 = vrot.slane %v5303_v51, 4  ;;  %v5311_v51 = vld [vmem:[#allocation71_spill] sm:$0xff]  ;;  %v5336_v63 = vld [vmem:[#allocation97_spill] sm:$0xff] }
 0x135   :  { %5269 = vst [vmem:[#allocation35_spill] sm:$0xff] %v3421_v23  ;;  %v973_v47 = vrot.slane %v5299_v3, 4  ;;  %v5300_v23 = vld [vmem:[#allocation15_spill] sm:$0xff]  ;;  %v5307_v3 = vld [vmem:[#allocation25_spill] sm:$0xff]  ;;  %v5329_v10 = vld [vmem:[#allocation90_spill] sm:$0xff] }
 0x136   :  { %5271 = vst [vmem:[#allocation36_spill] sm:$0xff] %v3427_v18  ;;  %v974_v9 = vrot.slane %v5300_v23, 4  ;;  %v976_v18 = vrot.slane %v5301_v27, 4  ;;  %v988_v23 = vrot.slane %v5310_v22, 4  ;;  %v5337_v30 = vld [vmem:[#allocation99_spill] sm:$0xff]  ;;  %v5338_v62 = vld [vmem:[#allocation100_spill] sm:$0xff] }
 0x137   :  { %5272 = vst [vmem:[#allocation37_spill] sm:$0xff] %v3433_v60  ;;  %v978_v60 = vrot.slane %v5302_v4, 4  ;;  %v5312_v4 = vld [vmem:[#allocation72_spill] sm:$0xff]  ;;  %v5341_v46 = vld [vmem:[#allocation62_spill] sm:$0xff] }
 0x138   :  { %5273 = vst [vmem:[#allocation38_spill] sm:$0xff] %v3436_v45  ;;  %v5304_v45 = vld [vmem:[#allocation19_spill] sm:$0xff]  ;;  %v3538_v48 = vsel %vm972_vm3, %v973_v47, %v974_v9  ;;  %v993_v47 = vrot.slane %v5313_v42, 4 }
 0x139   :  { %5274 = vst [vmem:[#allocation39_spill] sm:$0xff] %v3439_v36  ;;  %v981_v54 = vrot.slane %v5304_v45, 4  ;;  %v983_v45 = vrot.slane %v5307_v3, 4  ;;  %v5318_v3 = vld [vmem:[#allocation78_spill] sm:$0xff]  ;;  %v5322_v36 = vld [vmem:[#allocation83_spill] sm:$0xff] }
 0x13a   :  { %5275 = vst [vmem:[#allocation40_spill] sm:$0xff] %v3442_v35  ;;  %v3541_v35 = vsel %vm972_vm3, %v974_v9, %v976_v18  ;;  %v5315_v18 = vld [vmem:[#allocation75_spill] sm:$0xff]  ;;  %v1009_v42 = vrot.slane %v5322_v36, 4 }
 0x13b   :  { %5276 = vst [vmem:[#allocation41_spill] sm:$0xff] %v3445_v57  ;;  %v5308_v57 = vld [vmem:[#allocation68_spill] sm:$0xff]  ;;  %v3549_v27 = vsel %vm972_vm3, %v979_v41, %v981_v54  ;;  %v996_v9 = vrot.slane %v5315_v18, 4  ;;  %v1004_v54 = vrot.slane %v5170_v39, 4 }
 0x13c   :  { %5277 = vst [vmem:[#allocation42_spill] sm:$0xff] %v3448_v56  ;;  %v984_v5 = vrot.slane %v5308_v57, 4  ;;  %v5317_v57 = vld [vmem:[#allocation77_spill] sm:$0xff]  ;;  %v5319_v56 = vld [vmem:[#allocation79_spill] sm:$0xff] }
 0x13d   :  { %5278 = vst [vmem:[#allocation43_spill] sm:$0xff] %v3451_v13  ;;  %v994_v13 = vrot.slane %v5314_v6, 4  ;;  %v999_v22 = vrot.slane %v5317_v57, 4  ;;  %v1003_v11 = vrot.slane %v5319_v56, 4  ;;  %v1011_v6 = vrot.slane %v5323_v31, 4 }
 0x13e   :  { %5279 = vst [vmem:[#allocation44_spill] sm:$0xff] %v3456_v55  ;;  %v986_v55 = vrot.slane %v5309_v25, 4  ;;  %v998_v25 = vrot.slane %v5316_v34, 4  ;;  %v985_v18 = vsel %vm972_vm3, %v983_v45, %v984_v5  ;;  %v1013_v57 = vrot.slane %v5324_v8, 4  ;;  %v5327_v8 = vld [vmem:[#allocation88_spill] sm:$0xff] }
 0x13f   :  { %5280 = vst [vmem:[#allocation108_spill] sm:$0xff] %v3459_v53  ;;  %v3546_v53 = vsel %vm972_vm3, %v978_v60, %v979_v41  ;;  %v1001_v60 = vrot.slane %v5318_v3, 4  ;;  %v5320_v41 = vld [vmem:[#allocation81_spill] sm:$0xff]  ;;  %v1014_v3 = vrot.slane %v5325_v26, 4  ;;  %v997_v36 = vsel %vm972_vm3, %v994_v13, %v996_v9  ;;  %v5330_v9 = vld [vmem:[#allocation91_spill] sm:$0xff] }
 0x140   :  { %5281 = vst [vmem:[#allocation109_spill] sm:$0xff] %v3466_v44  ;;  %v991_v44 = vrot.slane %v5312_v4, 4  ;;  %v1008_v4 = vrot.slane %v5321_v24, 4  ;;  %v987_v34 = vsel %vm972_vm3, %v984_v5, %v986_v55  ;;  %v1016_v24 = vrot.slane %v5326_v58, 4 }
 0x141   :  { %5282 = vst [vmem:[#allocation110_spill] sm:$0xff] %v3469_v16  ;;  %v989_v16 = vrot.slane %v5311_v51, 4  ;;  %v1006_v51 = vrot.slane %v5320_v41, 4  ;;  %v995_v41 = vsel %vm972_vm3, %v993_v47, %v994_v13  ;;  %v1000_v31 = vsel %vm972_vm3, %v998_v25, %v999_v22  ;;  %v5328_v47 = vld [vmem:[#allocation89_spill] sm:$0xff] }
 0x142   :  { %v1002_v45 = vsel %vm972_vm3, %v999_v22, %v1001_v60  ;;  %v1005_v5 = vsel %vm972_vm3, %v1003_v11, %v1004_v54  ;;  %v1010_v26 = vsel %vm972_vm3, %v1008_v4, %v1009_v42  ;;  %v1019_v58 = vrot.slane %v5328_v47, 4  ;;  %v5331_v60 = vld [vmem:[#allocation92_spill] sm:$0xff] }
 0x143   :  { %v990_v56 = vsel %vm972_vm3, %v988_v23, %v989_v16  ;;  %v992_v39 = vsel %vm972_vm3, %v989_v16, %v991_v44  ;;  %v1007_v55 = vsel %vm972_vm3, %v1004_v54, %v1006_v51  ;;  %v1012_v23 = vsel %vm972_vm3, %v1009_v42, %v1011_v6  ;;  %v5333_v54 = vld [vmem:[#allocation94_spill] sm:$0xff]  ;;  %v5335_v42 = vld [vmem:[#allocation96_spill] sm:$0xff] }
 0x144   :  { %v1018_v44 = vrot.slane %v5327_v8, 4  ;;  %v1015_v16 = vsel %vm972_vm3, %v1013_v57, %v1014_v3  ;;  %v1021_v13 = vrot.slane %v5329_v10, 4  ;;  %v1023_v25 = vrot.slane %v5330_v9, 4 }
 0x145   :  { %v1017_v22 = vsel %vm972_vm3, %v1014_v3, %v1016_v24  ;;  %v1024_v11 = vrot.slane %v5331_v60, 4  ;;  %v1026_v51 = vrot.slane %v5332_v14, 4  ;;  %v1028_v4 = vrot.slane %v5333_v54, 4  ;;  %v5340_v3 = vld [vmem:[#allocation102_spill] sm:$0xff] }
 0x146   :  { %v1029_v6 = vrot.slane %v5334_v43, 4  ;;  %v1031_v8 = vrot.slane %v5335_v42, 4  ;;  %v1033_v57 = vrot.slane %v5336_v63, 4  ;;  %v1034_v47 = vrot.slane %v5219_v19, 4 }
 0x147   :  { %v1036_v10 = vrot.slane %v5337_v30, 4  ;;  %v1038_v9 = vrot.slane %v5338_v62, 4  ;;  %v1039_v24 = vrot.slane %v5339_v2, 4  ;;  %v1041_v60 = vrot.slane %v5340_v3, 4 }
 0x148   :  { %v1020_v14 = vsel %vm972_vm3, %v1018_v44, %v1019_v58  ;;  %v1043_v54 = vrot.slane %v5231_v28, 4  ;;  %v1044_v43 = vrot.slane %v5235_v12, 4  ;;  %v1046_v42 = vrot.slane %v5341_v46, 4 }
 0x149   :  { %v1022_v63 = vsel %vm972_vm3, %v1019_v58, %v1021_v13  ;;  %v1048_v19 = vrot.slane %v5342_v49, 4  ;;  %v1049_v30 = vrot.slane %v2859_v40, 4  ;;  %v1051_v62 = vrot.slane %v5343_v1, 4 }
 0x14a   :  { %v1025_v2 = vsel %vm972_vm3, %v1023_v25, %v1024_v11  ;;  %v1027_v3 = vsel %vm972_vm3, %v1024_v11, %v1026_v51  ;;  %v1030_v44 = vsel %vm972_vm3, %v1028_v4, %v1029_v6  ;;  %v1032_v28 = vsel %vm972_vm3, %v1029_v6, %v1031_v8  ;;  %v5366_v4 = vld [vmem:[#allocation28_spill] sm:$0xff] }
 0x14b   :  { %v1035_v12 = vsel %vm972_vm3, %v1033_v57, %v1034_v47  ;;  %v1037_v46 = vsel %vm972_vm3, %v1034_v47, %v1036_v10  ;;  %v1040_v58 = vsel %vm972_vm3, %v1038_v9, %v1039_v24  ;;  %v1042_v13 = vsel %vm972_vm3, %v1039_v24, %v1041_v60  ;;  %v5363_v60 = vld [vmem:[#allocation27_spill] sm:$0xff]  ;;  %v5369_v57 = vld [vmem:[#allocation29_spill] sm:$0xff] }
 0x14c   :  { %v1045_v40 = vsel %vm972_vm3, %v1043_v54, %v1044_v43  ;;  %v1047_v1 = vsel %vm972_vm3, %v1044_v43, %v1046_v42  ;;  %v5344_v25 = vmax.f32 %v3157_v20, %v3331_v15  ;;  %v5345_v8 = vmax.f32 %v3164_v61, %v3334_v52  ;;  %v5365_v54 = vld [vmem:[#allocation49_spill] sm:$0xff]  ;;  %v5368_v42 = vld [vmem:[#allocation50_spill] sm:$0xff] }
 0x14d   :  { %v1050_v10 = vsel %vm972_vm3, %v1048_v19, %v1049_v30  ;;  %v1052_v47 = vsel %vm972_vm3, %v1049_v30, %v1051_v62  ;;  %v5346_v43 = vmax.f32 %v3170_v21, %v3337_v7  ;;  %v5347_v20 = vmax.f32 %v3176_v50, %v3341_v0  ;;  %v5356_v62 = vld [vmem:[#allocation46_spill] sm:$0xff]  ;;  %v5357_v30 = vld [vmem:[#allocation24_spill] sm:$0xff] }
 0x14e   :  { %v3619_v11 = vmax.f32 %v5344_v25, %v3538_v48  ;;  %v3625_v51 = vmax.f32 %v5345_v8, %v3541_v35  ;;  %v5348_v61 = vmax.f32 %v3184_v59, %v3344_v33  ;;  %v5349_v19 = vmax.f32 %v3189_v38, %v3361_v37  ;;  %v5351_v35 = vld [vmem:[#allocation22_spill] sm:$0xff]  ;;  %v5371_v25 = vld [vmem:[#allocation51_spill] sm:$0xff] }
 0x14f   :  { %v3633_v9 = vmax.f32 %v5346_v43, %v3546_v53  ;;  %v3639_v15 = vmax.f32 %v5347_v20, %v3549_v27  ;;  %v5350_v21 = vmax.f32 %v3194_v17, %v3367_v29  ;;  %v5352_v50 = vmax.f32 %v3199_v32, %v5351_v35  ;;  %v5353_v27 = vld [vmem:[#allocation45_spill] sm:$0xff]  ;;  %v5354_v53 = vld [vmem:[#allocation23_spill] sm:$0xff]  ;;  %v5362_v29 = vld [vmem:[#allocation48_spill] sm:$0xff] }
 0x150   :  { %v3644_v52 = vmax.f32 %v5348_v61, %v985_v18  ;;  %v3649_v48 = vmax.f32 %v5349_v19, %v987_v34  ;;  %v5355_v59 = vmax.f32 %v5353_v27, %v5354_v53  ;;  %v5358_v38 = vmax.f32 %v5356_v62, %v5357_v30  ;;  %v5359_v34 = vld [vmem:[#allocation47_spill] sm:$0xff]  ;;  %v5360_v18 = vld [vmem:[#allocation26_spill] sm:$0xff]  ;;  %v5374_v20 = vld [vmem:[#allocation52_spill] sm:$0xff] }
 0x151   :  { %v3654_v7 = vmax.f32 %v5350_v21, %v990_v56  ;;  %v3659_v0 = vmax.f32 %v5352_v50, %v992_v39  ;;  %v5361_v17 = vmax.f32 %v5359_v34, %v5360_v18  ;;  %v5364_v32 = vmax.f32 %v5362_v29, %v5363_v60  ;;  %v5372_v8 = vld [vmem:[#allocation30_spill] sm:$0xff]  ;;  %v5375_v61 = vld [vmem:[#allocation31_spill] sm:$0xff]  ;;  %v5377_v21 = vld [vmem:[#allocation53_spill] sm:$0xff] }
 0x152   :  { %v3664_v33 = vmax.f32 %v5355_v59, %v995_v41  ;;  %v3669_v37 = vmax.f32 %v5358_v38, %v997_v36  ;;  %v5367_v6 = vmax.f32 %v5365_v54, %v5366_v4  ;;  %v5370_v24 = vmax.f32 %v5368_v42, %v5369_v57  ;;  %v5378_v35 = vld [vmem:[#allocation32_spill] sm:$0xff]  ;;  %v5381_v27 = vld [vmem:[#allocation54_spill] sm:$0xff]  ;;  %v5382_v53 = vld [vmem:[#allocation33_spill] sm:$0xff] }
 0x153   :  { %v3674_v56 = vmax.f32 %v5361_v17, %v1000_v31  ;;  %v3679_v39 = vmax.f32 %v5364_v32, %v1002_v45  ;;  %v5373_v43 = vmax.f32 %v5371_v25, %v5372_v8  ;;  %v5376_v19 = vmax.f32 %v5374_v20, %v5375_v61  ;;  %v5385_v62 = vld [vmem:[#allocation55_spill] sm:$0xff]  ;;  %v5386_v30 = vld [vmem:[#allocation34_spill] sm:$0xff]  ;;  %v5389_v34 = vld [vmem:[#allocation56_spill] sm:$0xff] }
 0x154   :  { %v3684_v41 = vmax.f32 %v5367_v6, %v1005_v5  ;;  %v3689_v36 = vmax.f32 %v5370_v24, %v1007_v55  ;;  %v5379_v50 = vmax.f32 %v5377_v21, %v5378_v35  ;;  %v5383_v59 = vmax.f32 %v5381_v27, %v5382_v53  ;;  %v5390_v18 = vld [vmem:[#allocation35_spill] sm:$0xff]  ;;  %v5393_v29 = vld [vmem:[#allocation57_spill] sm:$0xff]  ;;  %v5394_v60 = vld [vmem:[#allocation36_spill] sm:$0xff] }
 0x155   :  { %v3694_v31 = vmax.f32 %v5373_v43, %v1010_v26  ;;  %v3699_v45 = vmax.f32 %v5376_v19, %v1012_v23  ;;  %v5387_v38 = vmax.f32 %v5385_v62, %v5386_v30  ;;  %v5391_v17 = vmax.f32 %v5389_v34, %v5390_v18  ;;  %v5397_v54 = vld [vmem:[#allocation58_spill] sm:$0xff]  ;;  %v5398_v4 = vld [vmem:[#allocation37_spill] sm:$0xff]  ;;  %v5401_v42 = vld [vmem:[#allocation59_spill] sm:$0xff] }
 0x156   :  { %v3704_v5 = vmax.f32 %v5379_v50, %v1015_v16  ;;  %v3709_v55 = vmax.f32 %v5383_v59, %v1017_v22  ;;  %v5395_v32 = vmax.f32 %v5393_v29, %v5394_v60  ;;  %v5399_v6 = vmax.f32 %v5397_v54, %v5398_v4  ;;  %v5402_v57 = vld [vmem:[#allocation38_spill] sm:$0xff]  ;;  %v5405_v25 = vld [vmem:[#allocation60_spill] sm:$0xff]  ;;  %v5406_v8 = vld [vmem:[#allocation39_spill] sm:$0xff] }
 0x157   :  { %v3714_v26 = vmax.f32 %v5387_v38, %v1020_v14  ;;  %v3719_v23 = vmax.f32 %v5391_v17, %v1022_v63  ;;  %v5403_v24 = vmax.f32 %v5401_v42, %v5402_v57  ;;  %v5407_v43 = vmax.f32 %v5405_v25, %v5406_v8  ;;  %v5409_v20 = vld [vmem:[#allocation61_spill] sm:$0xff]  ;;  %v5410_v61 = vld [vmem:[#allocation40_spill] sm:$0xff]  ;;  %v5413_v21 = vld [vmem:[#allocation63_spill] sm:$0xff] }
 0x158   :  { %5380 = vst [vmem:[#allocation22_spill] sm:$0xff] %v3704_v5  ;;  %v3724_v16 = vmax.f32 %v5395_v32, %v1025_v2  ;;  %v3729_v22 = vmax.f32 %v5399_v6, %v1027_v3  ;;  %v5411_v19 = vmax.f32 %v5409_v20, %v5410_v61  ;;  %v5414_v35 = vld [vmem:[#allocation41_spill] sm:$0xff]  ;;  %v5418_v53 = vld [vmem:[#allocation42_spill] sm:$0xff]  ;;  %v5422_v38 = vld [vmem:[#allocation15_spill] sm:$0xff] }
 0x159   :  { %5384 = vst [vmem:[#allocation45_spill] sm:$0xff] %v3709_v55  ;;  %v3734_v14 = vmax.f32 %v5403_v24, %v1030_v44  ;;  %v3739_v63 = vmax.f32 %v5407_v43, %v1032_v28  ;;  %v5415_v50 = vmax.f32 %v5413_v21, %v5414_v35  ;;  %v5417_v27 = vld [vmem:[#allocation65_spill] sm:$0xff]  ;;  %v5421_v62 = vld [vmem:[#allocation14_spill] sm:$0xff]  ;;  %v1119_v28 = vrot.slane %v5422_v38, 5  ;;  %v5423_v34 = vld [vmem:[#allocation16_spill] sm:$0xff] }
 0x15a   :  { %5388 = vst [vmem:[#allocation23_spill] sm:$0xff] %v3714_v26  ;;  %v3744_v2 = vmax.f32 %v5411_v19, %v1035_v12  ;;  %v5419_v59 = vmax.f32 %v5417_v27, %v5418_v53  ;;  %v1118_v30 = vrot.slane %v5421_v62, 5  ;;  %v1121_v18 = vrot.slane %v5423_v34, 5  ;;  %v5424_v17 = vld [vmem:[#allocation17_spill] sm:$0xff]  ;;  %v5425_v12 = vld [vmem:[#allocation18_spill] sm:$0xff]  ;;  %v5426_v32 = vld [vmem:[#allocation19_spill] sm:$0xff] }
 0x15b   :  { %5392 = vst [vmem:[#allocation46_spill] sm:$0xff] %v3719_v23  ;;  %v3749_v3 = vmax.f32 %v5415_v50, %v1037_v46  ;;  %v1123_v29 = vrot.slane %v5424_v17, 5  ;;  %v1124_v60 = vrot.slane %v5425_v12, 5  ;;  %v1126_v54 = vrot.slane %v5426_v32, 5  ;;  %v5427_v46 = vld [vmem:[#allocation25_spill] sm:$0xff]  ;;  %v5428_v6 = vld [vmem:[#allocation68_spill] sm:$0xff] }
 0x15c   :  { %5396 = vst [vmem:[#allocation24_spill] sm:$0xff] %v3724_v16  ;;  %v3754_v44 = vmax.f32 %v5419_v59, %v1040_v58  ;;  %v1128_v4 = vrot.slane %v5427_v46, 5  ;;  %v1129_v42 = vrot.slane %v5428_v6, 5  ;;  %v5429_v57 = vld [vmem:[#allocation66_spill] sm:$0xff]  ;;  %v5430_v58 = vld [vmem:[#allocation43_spill] sm:$0xff]  ;;  %v5433_v8 = vld [vmem:[#allocation69_spill] sm:$0xff] }
 0x15d   :  { %5400 = vst [vmem:[#allocation47_spill] sm:$0xff] %v3729_v22  ;;  %v5431_v24 = vmax.f32 %v5429_v57, %v5430_v58  ;;  %v1131_v43 = vrot.slane %v5433_v8, 5  ;;  %v5434_v20 = vld [vmem:[#allocation70_spill] sm:$0xff]  ;;  %v5435_v19 = vld [vmem:[#allocation71_spill] sm:$0xff]  ;;  %v5437_v50 = vld [vmem:[#allocation44_spill] sm:$0xff]  ;;  %v1120_v22 = vsel %vm1117_vm4, %v1118_v30, %v1119_v28 }
 0x15e   :  { %5404 = vst [vmem:[#allocation26_spill] sm:$0xff] %v3734_v14  ;;  %v1133_v61 = vrot.slane %v5434_v20, 5  ;;  %v1134_v21 = vrot.slane %v5435_v19, 5  ;;  %v5436_v35 = vld [vmem:[#allocation67_spill] sm:$0xff]  ;;  %v5445_v57 = vld [vmem:[#allocation109_spill] sm:$0xff] }
 0x15f   :  { %5408 = vst [vmem:[#allocation48_spill] sm:$0xff] %v3739_v63  ;;  %v3767_v25 = vmax.f32 %v5431_v24, %v1042_v13  ;;  %v5438_v27 = vmax.f32 %v5436_v35, %v5437_v50  ;;  %v5440_v59 = vld [vmem:[#allocation107_spill] sm:$0xff]  ;;  %v5448_v24 = vld [vmem:[#allocation21_spill] sm:$0xff]  ;;  %v1125_v35 = vsel %vm1117_vm4, %v1123_v29, %v1124_v60  ;;  %v5452_v50 = vld [vmem:[#allocation72_spill] sm:$0xff] }
 0x160   :  { %5412 = vst [vmem:[#allocation27_spill] sm:$0xff] %v3744_v2  ;;  %v5444_v2 = vld [vmem:[#allocation20_spill] sm:$0xff]  ;;  %v5457_v29 = vld [vmem:[#allocation77_spill] sm:$0xff]  ;;  %v5463_v55 = vld [vmem:[#allocation83_spill] sm:$0xff] }
 0x161   :  { %5416 = vst [vmem:[#allocation49_spill] sm:$0xff] %v3749_v3  ;;  %v3775_v53 = vmax.f32 %v5438_v27, %v1045_v40  ;;  %v5446_v13 = vmax.f32 %v5444_v2, %v5445_v57  ;;  %v1122_v40 = vsel %vm1117_vm4, %v1119_v28, %v1121_v18  ;;  %v5453_v2 = vld [vmem:[#allocation73_spill] sm:$0xff]  ;;  %v5454_v27 = vld [vmem:[#allocation74_spill] sm:$0xff]  ;;  %v5456_v28 = vld [vmem:[#allocation76_spill] sm:$0xff]  ;;  %v1144_v57 = vrot.slane %v5457_v29, 5 }
 0x162   :  { %5420 = vst [vmem:[#allocation28_spill] sm:$0xff] %v3754_v44  ;;  %v5441_v44 = vld [vmem:[#allocation108_spill] sm:$0xff]  ;;  %v1143_v18 = vrot.slane %v5456_v28, 5  ;;  %v1231_v16 = vmax.f32 %v3625_v51, %v1122_v40  ;;  %v1154_v5 = vrot.slane %v5463_v55, 5  ;;  %v1273_v40 = vrot.slane %v5427_v46, 6 }
 0x163   :  { %5432 = vst [vmem:[#allocation50_spill] sm:$0xff] %v3767_v25  ;;  %v5442_v49 = vmax.f32 %v5440_v59, %v5441_v44  ;;  %v3785_v58 = vmax.f32 %v5446_v13, %v1050_v10  ;;  %v5449_v25 = vld [vmem:[#allocation110_spill] sm:$0xff]  ;;  %v1136_v44 = vrot.slane %v5452_v50, 5  ;;  %v1138_v10 = vrot.slane %v5453_v2, 5 }
 0x164   :  { %5439 = vst [vmem:[#allocation29_spill] sm:$0xff] %v3775_v53  ;;  %v5450_v63 = vmax.f32 %v5448_v24, %v5449_v25  ;;  %v1139_v59 = vrot.slane %v5454_v27, 5  ;;  %v3801_v25 = vsel %vm1117_vm4, %v1129_v42, %v1131_v43  ;;  %v5459_v24 = vld [vmem:[#allocation79_spill] sm:$0xff]  ;;  %v1268_v53 = vrot.slane %v5424_v17, 6 }
 0x165   :  { %v3780_v3 = vmax.f32 %v5442_v49, %v1047_v1  ;;  %5447 = vst [vmem:[#allocation30_spill] sm:$0xff] %v3785_v58  ;;  %v1127_v1 = vsel %vm1117_vm4, %v1124_v60, %v1126_v54  ;;  %v1130_v49 = vsel %vm1117_vm4, %v1128_v4, %v1129_v42  ;;  %v1263_v60 = vrot.slane %v5421_v62, 6  ;;  %v5458_v42 = vld [vmem:[#allocation78_spill] sm:$0xff]  ;;  %v5460_v58 = vld [vmem:[#allocation80_spill] sm:$0xff] }
 0x166   :  { %v3790_v14 = vmax.f32 %v5450_v63, %v1052_v47  ;;  %v3804_v47 = vsel %vm1117_vm4, %v1133_v61, %v1134_v21  ;;  %v5455_v63 = vld [vmem:[#allocation75_spill] sm:$0xff]  ;;  %v1264_v54 = vrot.slane %v5422_v38, 6  ;;  %v1266_v4 = vrot.slane %v5423_v34, 6  ;;  %v5461_v34 = vld [vmem:[#allocation81_spill] sm:$0xff] }
 0x167   :  { %5443 = vst [vmem:[#allocation51_spill] sm:$0xff] %v3780_v3  ;;  %v1141_v30 = vrot.slane %v5455_v63, 5  ;;  %v3813_v13 = vsel %vm1117_vm4, %v1134_v21, %v1136_v44  ;;  %v1146_v43 = vrot.slane %v5458_v42, 5  ;;  %v1148_v61 = vrot.slane %v5459_v24, 5 }
 0x168   :  { %5451 = vst [vmem:[#allocation52_spill] sm:$0xff] %v3790_v14  ;;  %v3818_v14 = vsel %vm1117_vm4, %v1138_v10, %v1139_v59  ;;  %v1149_v3 = vrot.slane %v5460_v58, 5  ;;  %v1269_v62 = vrot.slane %v5425_v12, 6  ;;  %v1151_v21 = vrot.slane %v5461_v34, 5 }
 0x169   :  { %v3824_v38 = vsel %vm1117_vm4, %v1139_v59, %v1141_v30  ;;  %v1230_v44 = vmax.f32 %v3619_v11, %v1120_v22  ;;  %v3830_v23 = vsel %vm1117_vm4, %v1143_v18, %v1144_v57  ;;  %v1265_v10 = vsel %vm1262_vm5, %v1263_v60, %v1264_v54  ;;  %v5462_v59 = vld [vmem:[#allocation82_spill] sm:$0xff] }
 0x16a   :  { %v1267_v26 = vsel %vm1262_vm5, %v1264_v54, %v1266_v4  ;;  %v1271_v17 = vrot.slane %v5426_v32, 6  ;;  %v3836_v12 = vsel %vm1117_vm4, %v1144_v57, %v1146_v43  ;;  %v1153_v30 = vrot.slane %v5462_v59, 5  ;;  %v5464_v4 = vld [vmem:[#allocation84_spill] sm:$0xff] }
 0x16b   :  { %v1232_v11 = vmax.f32 %v3633_v9, %v1125_v35  ;;  %v3842_v51 = vsel %vm1117_vm4, %v1148_v61, %v1149_v3  ;;  %v1270_v22 = vsel %vm1262_vm5, %v1268_v53, %v1269_v62  ;;  %v1274_v18 = vrot.slane %v5428_v6, 6  ;;  %v5465_v35 = vld [vmem:[#allocation85_spill] sm:$0xff]  ;;  %v5466_v6 = vld [vmem:[#allocation86_spill] sm:$0xff] }
 0x16c   :  { %v3848_v32 = vsel %vm1117_vm4, %v1149_v3, %v1151_v21  ;;  %v1233_v57 = vmax.f32 %v3639_v15, %v1127_v1  ;;  %v3851_v60 = vmax.f32 %v1230_v44, %v1265_v10  ;;  %v3853_v54 = vmax.f32 %v1231_v16, %v1267_v26  ;;  %v5467_v1 = vld [vmem:[#allocation87_spill] sm:$0xff] }
 0x16d   :  { %v1156_v9 = vrot.slane %v5464_v4, 5  ;;  %v1158_v43 = vrot.slane %v5465_v35, 5  ;;  %v1272_v61 = vsel %vm1262_vm5, %v1269_v62, %v1271_v17  ;;  %v1276_v53 = vrot.slane %v5433_v8, 6 }
 0x16e   :  { %v3860_v46 = vsel %vm1117_vm4, %v1153_v30, %v1154_v5  ;;  %v1159_v3 = vrot.slane %v5466_v6, 5  ;;  %v1234_v21 = vmax.f32 %v3644_v52, %v1130_v49  ;;  %v3864_v15 = vmax.f32 %v1232_v11, %v1270_v22  ;;  %v5468_v49 = vld [vmem:[#allocation88_spill] sm:$0xff] }
 0x16f   :  { %v1161_v26 = vrot.slane %v5467_v1, 5  ;;  %v1275_v16 = vsel %vm1262_vm5, %v1273_v40, %v1274_v18  ;;  %v1278_v44 = vrot.slane %v5434_v20, 6  ;;  %v1279_v10 = vrot.slane %v5435_v19, 6  ;;  %v5469_v40 = vld [vmem:[#allocation89_spill] sm:$0xff] }
 0x170   :  { %v1235_v8 = vmax.f32 %v3649_v48, %v3801_v25  ;;  %v3872_v62 = vmax.f32 %v1233_v57, %v1272_v61  ;;  %v3877_v52 = vsel %vm1117_vm4, %v1154_v5, %v1156_v9  ;;  %v1163_v11 = vrot.slane %v5468_v49, 5  ;;  %v5470_v61 = vld [vmem:[#allocation90_spill] sm:$0xff] }
 0x171   :  { %v1277_v22 = vsel %vm1262_vm5, %v1274_v18, %v1276_v53  ;;  %v1281_v20 = vrot.slane %v5452_v50, 6  ;;  %v1164_v19 = vrot.slane %v5469_v40, 5  ;;  %v1236_v48 = vmax.f32 %v3654_v7, %v3804_v47 }
 0x172   :  { %v3885_v25 = vmax.f32 %v1234_v21, %v1275_v16  ;;  %v1166_v30 = vrot.slane %v5470_v61, 5  ;;  %v1280_v5 = vsel %vm1262_vm5, %v1278_v44, %v1279_v10  ;;  %v1283_v9 = vrot.slane %v5453_v2, 6  ;;  %v5473_v44 = vld [vmem:[#allocation91_spill] sm:$0xff] }
 0x173   :  { %v1284_v17 = vrot.slane %v5454_v27, 6  ;;  %v1237_v50 = vmax.f32 %v3659_v0, %v3813_v13  ;;  %v3894_v18 = vmax.f32 %v1235_v8, %v1277_v22  ;;  %v5471_v7 = vsub.f32 1.0, %v3851_v60 }
 0x174   :  { %v5472_v47 = vsub.f32 1.0, %v3853_v54  ;;  %v3902_v16 = vsel %vm1117_vm4, %v1158_v43, %v1159_v3  ;;  %v1168_v57 = vrot.slane %v5473_v44, 5  ;;  %v1282_v2 = vsel %vm1262_vm5, %v1279_v10, %v1281_v20 }
 0x175   :  { %v1286_v27 = vrot.slane %v5455_v63, 6  ;;  %v1238_v0 = vmax.f32 %v3664_v33, %v3818_v14  ;;  %v3909_v13 = vmax.f32 %v1236_v48, %v1280_v5  ;;  %v1411_v8 = vsub.f32 1.0, %v3885_v25  ;;  %v5476_v5 = vld [vmem:[#allocation92_spill] sm:$0xff] }
 0x176   :  { %v1439_v21 = vadd.f32 %v5472_v47, %v5471_v7  ;;  %v5474_v22 = vsub.f32 1.0, %v3864_v15  ;;  %v3915_v7 = vsel %vm1117_vm4, %v1159_v3, %v1161_v26  ;;  %v1285_v43 = vsel %vm1262_vm5, %v1283_v9, %v1284_v17  ;;  %v5477_v3 = vld [vmem:[#allocation93_spill] sm:$0xff] }
 0x177   :  { %v1288_v47 = vrot.slane %v5456_v28, 6  ;;  %v1289_v10 = vrot.slane %v5457_v29, 6  ;;  %v1239_v63 = vmax.f32 %v3669_v37, %v3824_v38  ;;  %v3922_v33 = vmax.f32 %v1237_v50, %v1282_v2 }
 0x178   :  { %v1440_v53 = vadd.f32 %v1439_v21, %v5474_v22  ;;  %v1412_v14 = vsub.f32 1.0, %v3894_v18  ;;  %v5475_v20 = vsub.f32 1.0, %v3872_v62  ;;  %v1169_v21 = vrot.slane %v5476_v5, 5 }
 0x179   :  { %v1171_v26 = vrot.slane %v5477_v3, 5  ;;  %v1287_v9 = vsel %vm1262_vm5, %v1284_v17, %v1286_v27  ;;  %v1291_v28 = vrot.slane %v5458_v42, 6  ;;  %v1240_v29 = vmax.f32 %v3674_v56, %v3830_v23 }
 0x17a   :  { %v1441_v48 = vadd.f32 %v1440_v53, %v5475_v20  ;;  %v3933_v22 = vmax.f32 %v1238_v0, %v1285_v43  ;;  %v1413_v37 = vsub.f32 1.0, %v3909_v13  ;;  %v3939_v50 = vsel %vm1117_vm4, %v1163_v11, %v1164_v19  ;;  %v5478_v11 = vld [vmem:[#allocation94_spill] sm:$0xff]  ;;  %v5479_v20 = vld [vmem:[#allocation95_spill] sm:$0xff] }
 0x17b   :  { %v1290_v53 = vsel %vm1262_vm5, %v1288_v47, %v1289_v10  ;;  %v1293_v2 = vrot.slane %v5459_v24, 6  ;;  %v1294_v17 = vrot.slane %v5460_v58, 6  ;;  %v1241_v42 = vmax.f32 %v3679_v39, %v3836_v12 }
 0x17c   :  { %v1442_v38 = vadd.f32 %v1441_v48, %v1411_v8  ;;  %v3946_v56 = vmax.f32 %v1239_v63, %v1287_v9  ;;  %v1414_v23 = vsub.f32 1.0, %v3922_v33  ;;  %v3952_v0 = vsel %vm1117_vm4, %v1164_v19, %v1166_v30 }
 0x17d   :  { %v1173_v43 = vrot.slane %v5478_v11, 5  ;;  %v1292_v47 = vsel %vm1262_vm5, %v1289_v10, %v1291_v28  ;;  %v1296_v24 = vrot.slane %v5461_v34, 6  ;;  %v1242_v58 = vmax.f32 %v3684_v41, %v3842_v51 }
 0x17e   :  { %v1443_v27 = vadd.f32 %v1442_v38, %v1412_v14  ;;  %v3959_v39 = vmax.f32 %v1240_v29, %v1290_v53  ;;  %v4642_v12 = vsub.f32 1.0, %v3933_v22  ;;  %v1174_v48 = vrot.slane %v5479_v20, 5 }
 0x17f   :  { %v1295_v30 = vsel %vm1262_vm5, %v1293_v2, %v1294_v17  ;;  %v1298_v19 = vrot.slane %v5462_v59, 6  ;;  %v1299_v10 = vrot.slane %v5463_v55, 6  ;;  %v1243_v34 = vmax.f32 %v3689_v36, %v3848_v32  ;;  %v5480_v2 = vld [vmem:[#allocation96_spill] sm:$0xff] }
 0x180   :  { %v1444_v63 = vadd.f32 %v1443_v27, %v1413_v37  ;;  %v3970_v9 = vmax.f32 %v1241_v42, %v1292_v47  ;;  %v4638_v41 = vsub.f32 1.0, %v3946_v56  ;;  %v3976_v28 = vsel %vm1117_vm4, %v1168_v57, %v1169_v21  ;;  %v5481_v47 = vld [vmem:[#allocation97_spill] sm:$0xff] }
 0x181   :  { %v3979_v29 = vsel %vm1117_vm4, %v1169_v21, %v1171_v26  ;;  %v1297_v59 = vsel %vm1262_vm5, %v1294_v17, %v1296_v24  ;;  %v1301_v55 = vrot.slane %v5464_v4, 6  ;;  %v1244_v36 = vmax.f32 %v3694_v31, %v3860_v46 }
 0x182   :  { %v1445_v51 = vadd.f32 %v1444_v63, %v1414_v23  ;;  %v3985_v32 = vmax.f32 %v1242_v58, %v1295_v30  ;;  %v4637_v38 = vsub.f32 1.0, %v3959_v39  ;;  %v1176_v57 = vrot.slane %v5480_v2, 5 }
 0x183   :  { %v1300_v42 = vsel %vm1262_vm5, %v1298_v19, %v1299_v10  ;;  %v1303_v21 = vrot.slane %v5465_v35, 6  ;;  %v1304_v26 = vrot.slane %v5466_v6, 6  ;;  %v1245_v4 = vmax.f32 %v3699_v45, %v3877_v52  ;;  %v5482_v6 = vld [vmem:[#allocation22_spill] sm:$0xff] }
 0x184   :  { %v1446_v53 = vadd.f32 %v1445_v51, %v4642_v12  ;;  %v3996_v17 = vmax.f32 %v1243_v34, %v1297_v59  ;;  %v4639_v31 = vsub.f32 1.0, %v3970_v9  ;;  %v4002_v27 = vsel %vm1117_vm4, %v1173_v43, %v1174_v48  ;;  %v5483_v19 = vld [vmem:[#allocation98_spill] sm:$0xff] }
 0x185   :  { %v1178_v24 = vrot.slane %v5481_v47, 5  ;;  %v1302_v58 = vsel %vm1262_vm5, %v1299_v10, %v1301_v55  ;;  %v1306_v35 = vrot.slane %v5467_v1, 6  ;;  %v1246_v63 = vmax.f32 %v5482_v6, %v3902_v16  ;;  %v5484_v1 = vld [vmem:[#allocation45_spill] sm:$0xff] }
 0x186   :  { %v1447_v46 = vadd.f32 %v1446_v53, %v4638_v41  ;;  %v4009_v45 = vmax.f32 %v1244_v36, %v1300_v42  ;;  %v4640_v52 = vsub.f32 1.0, %v3985_v32  ;;  %v1179_v34 = vrot.slane %v5483_v19, 5  ;;  %v5485_v53 = vld [vmem:[#allocation99_spill] sm:$0xff] }
 0x187   :  { %v1305_v43 = vsel %vm1262_vm5, %v1303_v21, %v1304_v26  ;;  %v1308_v51 = vrot.slane %v5468_v49, 6  ;;  %v1309_v10 = vrot.slane %v5469_v40, 6  ;;  %v1247_v59 = vmax.f32 %v5484_v1, %v3915_v7  ;;  %v5487_v40 = vld [vmem:[#allocation23_spill] sm:$0xff] }
 0x188   :  { %v1448_v30 = vadd.f32 %v1447_v46, %v4637_v38  ;;  %v4020_v55 = vmax.f32 %v1245_v4, %v1302_v58  ;;  %v4641_v16 = vsub.f32 1.0, %v3996_v17  ;;  %v1181_v42 = vrot.slane %v5485_v53, 5  ;;  %v5486_v46 = vld [vmem:[#allocation100_spill] sm:$0xff] }
 0x189   :  { %v1183_v6 = vrot.slane %v5486_v46, 5  ;;  %v1307_v21 = vsel %vm1262_vm5, %v1304_v26, %v1306_v35  ;;  %v1311_v49 = vrot.slane %v5470_v61, 6  ;;  %v1248_v38 = vmax.f32 %v5487_v40, %v3939_v50  ;;  %v5488_v61 = vld [vmem:[#allocation46_spill] sm:$0xff] }
 0x18a   :  { %v1449_v36 = vadd.f32 %v1448_v30, %v4639_v31  ;;  %v4031_v41 = vmax.f32 %v1246_v63, %v1305_v43  ;;  %v4643_v7 = vsub.f32 1.0, %v4009_v45  ;;  %v1177_v58 = vsel %vm1117_vm4, %v1174_v48, %v1176_v57  ;;  %v5489_v43 = vld [vmem:[#allocation101_spill] sm:$0xff]  ;;  %v5490_v40 = vld [vmem:[#allocation102_spill] sm:$0xff] }
 0x18b   :  { %v1310_v30 = vsel %vm1262_vm5, %v1308_v51, %v1309_v10  ;;  %v1313_v1 = vrot.slane %v5473_v44, 6  ;;  %v1314_v26 = vrot.slane %v5476_v5, 6  ;;  %v1249_v35 = vmax.f32 %v5488_v61, %v3952_v0  ;;  %v5491_v5 = vld [vmem:[#allocation24_spill] sm:$0xff] }
 0x18c   :  { %v1450_v4 = vadd.f32 %v1449_v36, %v4640_v52  ;;  %v4042_v31 = vmax.f32 %v1247_v59, %v1307_v21  ;;  %v1422_v50 = vsub.f32 1.0, %v4020_v55  ;;  %v1184_v36 = vrot.slane %v5489_v43, 5  ;;  %v5492_v21 = vld [vmem:[#allocation103_spill] sm:$0xff] }
 0x18d   :  { %v1186_v48 = vrot.slane %v5490_v40, 5  ;;  %v1312_v57 = vsel %vm1262_vm5, %v1309_v10, %v1311_v49  ;;  %v1316_v44 = vrot.slane %v5477_v3, 6  ;;  %v1250_v51 = vmax.f32 %v5491_v5, %v3976_v28  ;;  %v5493_v3 = vld [vmem:[#allocation47_spill] sm:$0xff] }
 0x18e   :  { %v1451_v63 = vadd.f32 %v1450_v4, %v4641_v16  ;;  %v4053_v52 = vmax.f32 %v1248_v38, %v1310_v30  ;;  %v4644_v0 = vsub.f32 1.0, %v4031_v41  ;;  %v1188_v4 = vrot.slane %v5492_v21, 5 }
 0x18f   :  { %v1315_v61 = vsel %vm1262_vm5, %v1313_v1, %v1314_v26  ;;  %v1318_v16 = vrot.slane %v5478_v11, 6  ;;  %v1319_v10 = vrot.slane %v5479_v20, 6  ;;  %v1251_v49 = vmax.f32 %v5493_v3, %v3979_v29  ;;  %v5494_v20 = vld [vmem:[#allocation26_spill] sm:$0xff] }
 0x190   :  { %v1452_v59 = vadd.f32 %v1451_v63, %v4643_v7  ;;  %v4064_v12 = vmax.f32 %v1249_v35, %v1312_v57  ;;  %v1424_v28 = vsub.f32 1.0, %v4042_v31  ;;  %v1180_v30 = vsel %vm1117_vm4, %v1178_v24, %v1179_v34  ;;  %v5495_v57 = vld [vmem:[#allocation104_spill] sm:$0xff]  ;;  %v5497_v3 = vld [vmem:[#allocation62_spill] sm:$0xff] }
 0x191   :  { %v1182_v63 = vsel %vm1117_vm4, %v1179_v34, %v1181_v42  ;;  %v1317_v1 = vsel %vm1262_vm5, %v1314_v26, %v1316_v44  ;;  %v1321_v11 = vrot.slane %v5480_v2, 6  ;;  %v1252_v5 = vmax.f32 %v5494_v20, %v4002_v27  ;;  %v5496_v26 = vld [vmem:[#allocation48_spill] sm:$0xff] }
 0x192   :  { %v1453_v38 = vadd.f32 %v1452_v59, %v1422_v50  ;;  %v4075_v7 = vmax.f32 %v1250_v51, %v1315_v61  ;;  %v4645_v29 = vsub.f32 1.0, %v4053_v52  ;;  %v1189_v59 = vrot.slane %v5495_v57, 5 }
 0x193   :  { %v1320_v24 = vsel %vm1262_vm5, %v1318_v16, %v1319_v10  ;;  %v1323_v34 = vrot.slane %v5481_v47, 6  ;;  %v1324_v42 = vrot.slane %v5483_v19, 6  ;;  %v1253_v2 = vmax.f32 %v5496_v26, %v1177_v58  ;;  %v5498_v47 = vld [vmem:[#allocation27_spill] sm:$0xff] }
 0x194   :  { %v1454_v35 = vadd.f32 %v1453_v38, %v4644_v0  ;;  %v4085_v44 = vmax.f32 %v1251_v49, %v1317_v1  ;;  %v4646_v27 = vsub.f32 1.0, %v4064_v12  ;;  %v1185_v61 = vsel %vm1117_vm4, %v1183_v6, %v1184_v36 }
 0x195   :  { %v1191_v38 = vrot.slane %v5497_v3, 5  ;;  %v1322_v20 = vsel %vm1262_vm5, %v1319_v10, %v1321_v11  ;;  %v1326_v16 = vrot.slane %v5485_v53, 6  ;;  %v1254_v0 = vmax.f32 %v5498_v47, %v1180_v30  ;;  %v5499_v10 = vld [vmem:[#allocation49_spill] sm:$0xff] }
 0x196   :  { %v1455_v51 = vadd.f32 %v1454_v35, %v1424_v28  ;;  %v4095_v19 = vmax.f32 %v1252_v5, %v1320_v24  ;;  %v4647_v58 = vsub.f32 1.0, %v4075_v7  ;;  %v1187_v1 = vsel %vm1117_vm4, %v1184_v36, %v1186_v48  ;;  %v5500_v24 = vld [vmem:[#allocation105_spill] sm:$0xff] }
 0x197   :  { %v1325_v35 = vsel %vm1262_vm5, %v1323_v34, %v1324_v42  ;;  %v1328_v6 = vrot.slane %v5486_v46, 6  ;;  %v1329_v26 = vrot.slane %v5489_v43, 6  ;;  %v1255_v11 = vmax.f32 %v5499_v10, %v1182_v63  ;;  %v5502_v46 = vld [vmem:[#allocation28_spill] sm:$0xff] }
 0x198   :  { %v1456_v49 = vadd.f32 %v1455_v51, %v4645_v29  ;;  %v4105_v53 = vmax.f32 %v1253_v2, %v1322_v20  ;;  %v1428_v30 = vsub.f32 1.0, %v4085_v44  ;;  %v1193_v47 = vrot.slane %v5500_v24, 5  ;;  %v5501_v51 = vld [vmem:[#allocation106_spill] sm:$0xff] }
 0x199   :  { %v1194_v29 = vrot.slane %v5501_v51, 5  ;;  %v1327_v36 = vsel %vm1262_vm5, %v1324_v42, %v1326_v16  ;;  %v1331_v48 = vrot.slane %v5490_v40, 6  ;;  %v1256_v34 = vmax.f32 %v5502_v46, %v1185_v61  ;;  %v5503_v42 = vld [vmem:[#allocation50_spill] sm:$0xff] }
 0x19a   :  { %v1457_v5 = vadd.f32 %v1456_v49, %v4646_v27  ;;  %v4115_v43 = vmax.f32 %v1254_v0, %v1325_v35  ;;  %v1429_v63 = vsub.f32 1.0, %v4095_v19  ;;  %v1190_v20 = vsel %vm1117_vm4, %v1188_v4, %v1189_v59 }
 0x19b   :  { %v1330_v49 = vsel %vm1262_vm5, %v1328_v6, %v1329_v26  ;;  %v1333_v10 = vrot.slane %v5492_v21, 6  ;;  %v1334_v27 = vrot.slane %v5495_v57, 6  ;;  %v1257_v16 = vmax.f32 %v5503_v42, %v1187_v1  ;;  %v5505_v21 = vld [vmem:[#allocation29_spill] sm:$0xff] }
 0x19c   :  { %v1458_v2 = vadd.f32 %v1457_v5, %v4647_v58  ;;  %v4125_v40 = vmax.f32 %v1255_v11, %v1327_v36  ;;  %v1430_v0 = vsub.f32 1.0, %v4105_v53  ;;  %v1192_v35 = vsel %vm1117_vm4, %v1189_v59, %v1191_v38  ;;  %v5504_v5 = vld [vmem:[#allocation64_spill] sm:$0xff] }
 0x19d   :  { %v1196_v46 = vrot.slane %v5504_v5, 5  ;;  %v1332_v4 = vsel %vm1262_vm5, %v1329_v26, %v1331_v48  ;;  %v1336_v6 = vrot.slane %v5497_v3, 6  ;;  %v1258_v58 = vmax.f32 %v5505_v21, %v1190_v20  ;;  %v5506_v26 = vld [vmem:[#allocation51_spill] sm:$0xff] }
 0x19e   :  { %v1459_v61 = vadd.f32 %v1458_v2, %v1428_v30  ;;  %v4135_v57 = vmax.f32 %v1256_v34, %v1330_v49  ;;  %v1431_v1 = vsub.f32 1.0, %v4115_v43  ;;  %v1195_v36 = vsel %vm1117_vm4, %v1193_v47, %v1194_v29 }
 0x19f   :  { %v1335_v2 = vsel %vm1262_vm5, %v1333_v10, %v1334_v27  ;;  %v1338_v59 = vrot.slane %v5500_v24, 6  ;;  %v1339_v38 = vrot.slane %v5501_v51, 6  ;;  %v1259_v48 = vmax.f32 %v5506_v26, %v1192_v35  ;;  %v5507_v10 = vld [vmem:[#allocation30_spill] sm:$0xff] }
 0x1a0   :  { %v1460_v11 = vadd.f32 %v1459_v61, %v1429_v63  ;;  %v4145_v3 = vmax.f32 %v1257_v16, %v1332_v4  ;;  %v1432_v34 = vsub.f32 1.0, %v4125_v40  ;;  %v1197_v49 = vsel %vm1117_vm4, %v1194_v29, %v1196_v46  ;;  %v5508_v4 = vld [vmem:[#allocation52_spill] sm:$0xff] }
 0x1a1   :  { %v1337_v42 = vsel %vm1262_vm5, %v1334_v27, %v1336_v6  ;;  %v1341_v47 = vrot.slane %v5504_v5, 6  ;;  %v1260_v61 = vmax.f32 %v5507_v10, %v1195_v36  ;;  %v4154_v24 = vmax.f32 %v1258_v58, %v1335_v2 }
 0x1a2   :  { %v1461_v20 = vadd.f32 %v1460_v11, %v1430_v0  ;;  %v1433_v51 = vsub.f32 1.0, %v4135_v57  ;;  %v1340_v35 = vsel %vm1262_vm5, %v1338_v59, %v1339_v38  ;;  %v1261_v21 = vmax.f32 %v5508_v4, %v1197_v49 }
 0x1a3   :  { %v4161_v11 = vmax.f32 %v1259_v48, %v1337_v42  ;;  %v1434_v29 = vsub.f32 1.0, %v4145_v3  ;;  %v1342_v5 = vsel %vm1262_vm5, %v1339_v38, %v1341_v47  ;;  %v4167_v58 = vmax.f32 %v1260_v61, %v1340_v35 }
 0x1a4   :  { %v1462_v16 = vadd.f32 %v1461_v20, %v1431_v1  ;;  %v1435_v46 = vsub.f32 1.0, %v4154_v24  ;;  %v4172_v36 = vmax.f32 %v1261_v21, %v1342_v5  ;;  %v1483_v5 = vld [vmem:[#allocation2 + $0x8] sm:$0xff]  ;;  %v5513_v25 = vsub.f32 1.0, %v3933_v22 }
 0x1a5   :  { %v4648_v2 = vsub.f32 1.0, %v4161_v11  ;;  %v4649_v26 = vsub.f32 1.0, %v4167_v58  ;;  %v5514_v18 = vsub.f32 1.0, %v3946_v56  ;;  %v5515_v13 = vsub.f32 1.0, %v3959_v39 }
 0x1a6   :  { %v1463_v27 = vadd.f32 %v1462_v16, %v1432_v34  ;;  %v4650_v38 = vsub.f32 1.0, %v4172_v36  ;;  %v5516_v33 = vsub.f32 1.0, %v3970_v9  ;;  %v5517_v22 = vsub.f32 1.0, %v3985_v32 }
 0x1a7   :  { %v5518_v56 = vsub.f32 1.0, %v3996_v17  ;;  %v5519_v39 = vsub.f32 1.0, %v4009_v45  ;;  %v5520_v32 = vsub.f32 1.0, %v4031_v41  ;;  %v5521_v45 = vsub.f32 1.0, %v4053_v52 }
 0x1a8   :  { %v1464_v6 = vadd.f32 %v1463_v27, %v1433_v51  ;;  %v1482_v27 = vld [vmem:[#allocation2] sm:$0xff]  ;;  %v5522_v55 = vsub.f32 1.0, %v4064_v12  ;;  %v5523_v41 = vsub.f32 1.0, %v4075_v7  ;;  %v5525_v57 = vsub.f32 1.0, %v4167_v58 }
 0x1a9   :  { %v5526_v3 = vsub.f32 1.0, %v4172_v36 }
 0x1aa   :  { %v1465_v59 = vadd.f32 %v1464_v6, %v1434_v29  ;;  %v1484_v6 = vld [vmem:[#allocation2 + $0x10] sm:$0xff] }
 0x1ac   :  { %v1466_v48 = vadd.f32 %v1465_v59, %v1435_v46  ;;  %v1485_v59 = vld [vmem:[#allocation2 + $0x18] sm:$0xff] }
 0x1ae   :  { %v1467_v20 = vadd.f32 %v1466_v48, %v4648_v2  ;;  %v1486_v48 = vld [vmem:[#allocation2 + $0x20] sm:$0xff]  ;;  %v1487_v2 = vld [vmem:[#allocation2 + $0x28] sm:$0xff] }
 0x1b0   :  { %v1468_v49 = vadd.f32 %v1467_v20, %v4649_v26  ;;  %v5509_v20 = vsub.f32 1.0, %v3851_v60  ;;  %v1519_v60 = vmul.f32 %v1487_v2, %v1412_v14  ;;  %v1495_v2 = vld [vmem:[#allocation2 + $0x68] sm:$0xff] }
 0x1b2   :  { %v1469_v42 = vadd.f32 %v1468_v49, %v4650_v38  ;;  %v1514_v26 = vmul.f32 %v1482_v27, %v5509_v20  ;;  %v5510_v49 = vsub.f32 1.0, %v3853_v54  ;;  %v5511_v38 = vsub.f32 1.0, %v3864_v15  ;;  %v1491_v27 = vld [vmem:[#allocation2 + $0x48] sm:$0xff]  ;;  %v1492_v15 = vld [vmem:[#allocation2 + $0x50] sm:$0xff]  ;;  %1551 = vst [vmem:[#allocation7 + $0x28] sm:$0xff] %v1519_v60  ;;  %v1505_v60 = vld [vmem:[#allocation2 + $0xb8] sm:$0xff] }
 0x1b3   :  { %v1523_v14 = vmul.f32 %v1491_v27, %v5514_v18  ;;  %v1527_v20 = vmul.f32 %v1495_v2, %v5518_v56  ;;  %v1537_v12 = vmul.f32 %v1505_v60, %v1430_v0  ;;  %v1513_v0 = vld [vmem:[#allocation2 + $0xf8] sm:$0xff] }
 0x1b4   :  { %1470 = vadd.xlane.f32.xlu0 %v1469_v42  ;;  %v1515_v42 = vmul.f32 %v1483_v5, %v5510_v49  ;;  %1546 = vst [vmem:[#allocation7] sm:$0xff] %v1514_v26  ;;  %v1494_v26 = vld [vmem:[#allocation2 + $0x60] sm:$0xff]  ;;  %v1496_v5 = vld [vmem:[#allocation2 + $0x70] sm:$0xff]  ;;  %v1499_v49 = vld [vmem:[#allocation2 + $0x88] sm:$0xff]  ;;  %v1545_v24 = vmul.f32 %v1513_v0, %v5526_v3 }
 0x1b5   :  { %1555 = vst [vmem:[#allocation7 + $0x48] sm:$0xff] %v1523_v14  ;;  %v1531_v17 = vmul.f32 %v1499_v49, %v1424_v28  ;;  %v1507_v28 = vld [vmem:[#allocation2 + $0xc8] sm:$0xff] }
 0x1b6   :  { %1547 = vst [vmem:[#allocation7 + $0x8] sm:$0xff] %v1515_v42  ;;  %v1528_v42 = vmul.f32 %v1496_v5, %v5519_v39  ;;  %v1539_v44 = vmul.f32 %v1507_v28, %v1432_v34 }
 0x1b7   :  { %1559 = vst [vmem:[#allocation7 + $0x68] sm:$0xff] %v1527_v20 }
 0x1b8   :  { %1560 = vst [vmem:[#allocation7 + $0x70] sm:$0xff] %v1528_v42 }
 0x1b9   :  { %1563 = vst [vmem:[#allocation7 + $0x88] sm:$0xff] %v1531_v17 }
 0x1ba   :  { %1569 = vst [vmem:[#allocation7 + $0xb8] sm:$0xff] %v1537_v12 }
 0x1bb   :  { %1571 = vst [vmem:[#allocation7 + $0xc8] sm:$0xff] %v1539_v44 }
 0x1bc   :  { %1577 = vst [vmem:[#allocation7 + $0xf8] sm:$0xff] %v1545_v24 }
 0x227   :  { %v1471_v47 = vpop.xlane.xlu0 %1470 }
 0x228   :  { %v1472_v10 = vrot.slane %v1471_v47, 4 }
 0x22a   :  { %v1473_v61 = vadd.f32 %v1472_v10, %v1471_v47  ;;  %v1516_v47 = vmul.f32 %v1484_v6, %v5511_v38  ;;  %v1488_v10 = vld [vmem:[#allocation2 + $0x30] sm:$0xff]  ;;  %v1493_v38 = vld [vmem:[#allocation2 + $0x58] sm:$0xff] }
 0x22b   :  { %v1520_v54 = vmul.f32 %v1488_v10, %v1413_v37  ;;  %v1524_v37 = vmul.f32 %v1492_v15, %v5515_v13  ;;  %v1497_v6 = vld [vmem:[#allocation2 + $0x78] sm:$0xff]  ;;  %v1508_v15 = vld [vmem:[#allocation2 + $0xd0] sm:$0xff] }
 0x22c   :  { %v1474_v16 = vrot.slane %v1473_v61, 2  ;;  %1548 = vst [vmem:[#allocation7 + $0x10] sm:$0xff] %v1516_v47  ;;  %v1500_v47 = vld [vmem:[#allocation2 + $0x90] sm:$0xff]  ;;  %v1529_v9 = vmul.f32 %v1497_v6, %v1422_v50  ;;  %v1501_v10 = vld [vmem:[#allocation2 + $0x98] sm:$0xff]  ;;  %v1540_v19 = vmul.f32 %v1508_v15, %v1433_v51 }
 0x22d   :  { %1552 = vst [vmem:[#allocation7 + $0x30] sm:$0xff] %v1520_v54  ;;  %v1533_v50 = vmul.f32 %v1501_v10, %v5522_v55  ;;  %v1506_v54 = vld [vmem:[#allocation2 + $0xc0] sm:$0xff] }
 0x22e   :  { %v1475_v35 = vadd.f32 %v1474_v16, %v1473_v61  ;;  %v5512_v61 = vsub.f32 1.0, %v3872_v62  ;;  %1556 = vst [vmem:[#allocation7 + $0x50] sm:$0xff] %v1524_v37  ;;  %v1538_v7 = vmul.f32 %v1506_v54, %v1431_v1  ;;  %v5524_v1 = vsub.f32 1.0, %v4161_v11 }
 0x22f   :  { %1561 = vst [vmem:[#allocation7 + $0x78] sm:$0xff] %v1529_v9 }
 0x230   :  { %v1476_v4 = vrot.slane %v1475_v35, 1  ;;  %v1517_v16 = vmul.f32 %v1485_v59, %v5512_v61  ;;  %v1526_v59 = vmul.f32 %v1494_v26, %v5517_v22  ;;  %1565 = vst [vmem:[#allocation7 + $0x98] sm:$0xff] %v1533_v50 }
 0x231   :  { %1570 = vst [vmem:[#allocation7 + $0xc0] sm:$0xff] %v1538_v7 }
 0x232   :  { %v1477_v21 = vadd.f32 %v1476_v4, %v1475_v35  ;;  %v1489_v35 = vld [vmem:[#allocation2 + $0x38] sm:$0xff]  ;;  %v1518_v4 = vmul.f32 %v1486_v48, %v1411_v8  ;;  %1549 = vst [vmem:[#allocation7 + $0x18] sm:$0xff] %v1517_v16  ;;  %v1498_v48 = vld [vmem:[#allocation2 + $0x80] sm:$0xff] }
 0x233   :  { %v1521_v62 = vmul.f32 %v1489_v35, %v1414_v23  ;;  %v1525_v23 = vmul.f32 %v1493_v38, %v5516_v33  ;;  %v1530_v61 = vmul.f32 %v1498_v48, %v5520_v32  ;;  %1558 = vst [vmem:[#allocation7 + $0x60] sm:$0xff] %v1526_v59  ;;  %v1502_v16 = vld [vmem:[#allocation2 + $0xa0] sm:$0xff]  ;;  %v1503_v35 = vld [vmem:[#allocation2 + $0xa8] sm:$0xff] }
 0x234   :  { %1614 = vpush %v1477_v21  ;;  %v1490_v21 = vld [vmem:[#allocation2 + $0x40] sm:$0xff]  ;;  %v1534_v27 = vmul.f32 %v1502_v16, %v5523_v41  ;;  %v1535_v31 = vmul.f32 %v1503_v35, %v1428_v30  ;;  %v1511_v30 = vld [vmem:[#allocation2 + $0xe8] sm:$0xff] }
 0x235   :  { %v1522_v8 = vmul.f32 %v1490_v21, %v5513_v25  ;;  %1550 = vst [vmem:[#allocation7 + $0x20] sm:$0xff] %v1518_v4  ;;  %v1532_v4 = vmul.f32 %v1500_v47, %v5521_v45  ;;  %v1504_v21 = vld [vmem:[#allocation2 + $0xb0] sm:$0xff]  ;;  %v1510_v38 = vld [vmem:[#allocation2 + $0xe0] sm:$0xff]  ;;  %v1543_v40 = vmul.f32 %v1511_v30, %v5524_v1 }
 0x236   :  { %1553 = vst [vmem:[#allocation7 + $0x38] sm:$0xff] %v1521_v62  ;;  %v1536_v52 = vmul.f32 %v1504_v21, %v1429_v63  ;;  %v1509_v62 = vld [vmem:[#allocation2 + $0xd8] sm:$0xff]  ;;  %v1512_v63 = vld [vmem:[#allocation2 + $0xf0] sm:$0xff]  ;;  %v1542_v43 = vmul.f32 %v1510_v38, %v1435_v46 }
 0x237   :  { %1554 = vst [vmem:[#allocation7 + $0x40] sm:$0xff] %v1522_v8  ;;  %v1541_v53 = vmul.f32 %v1509_v62, %v1434_v29  ;;  %v1544_v34 = vmul.f32 %v1512_v63, %v5525_v57 }
 0x238   :  { %1557 = vst [vmem:[#allocation7 + $0x58] sm:$0xff] %v1525_v23 }
 0x239   :  { %1562 = vst [vmem:[#allocation7 + $0x80] sm:$0xff] %v1530_v61 }
 0x23a   :  { %1564 = vst [vmem:[#allocation7 + $0x90] sm:$0xff] %v1532_v4 }
 0x23b   :  { %1566 = vst [vmem:[#allocation7 + $0xa0] sm:$0xff] %v1534_v27 }
 0x23c   :  { %1567 = vst [vmem:[#allocation7 + $0xa8] sm:$0xff] %v1535_v31 }
 0x23d   :  { %1568 = vst [vmem:[#allocation7 + $0xb0] sm:$0xff] %v1536_v52 }
 0x23e   :  { %1572 = vst [vmem:[#allocation7 + $0xd0] sm:$0xff] %v1540_v19 }
 0x23f   :  { %1573 = vst [vmem:[#allocation7 + $0xd8] sm:$0xff] %v1541_v53 }
 0x240   :  { %1574 = vst [vmem:[#allocation7 + $0xe0] sm:$0xff] %v1542_v43 }
 0x241   :  { %1575 = vst [vmem:[#allocation7 + $0xe8] sm:$0xff] %v1543_v40 }
 0x242   :  { %1576 = vst [vmem:[#allocation7 + $0xf0] sm:$0xff] %v1544_v34 }
 0x243   :  { %1590 = dma.vmem_to_hbm [thread:$0]  %s1583_s1, 4096, %s1585_s26, [#allocation4], %s1727_s20, %s1727_s20, %s1728_s21  }
 0x265   :  { %s1615_s5 = spop %1614 }
 0x266   :  { %v1479_v51 = vstv %s1615_s5 }
 0x267   :  { %1481 = vst [vmem:[#allocation8] sm:$0xff] %v1479_v51 }
 0x268   :  { %1601 = dma.vmem_to_hbm [thread:$0]  %s1597_s28, 128, %s1599_s4, [#allocation9]  }
 0x269   :  { %1722 = dma.done.wait [#allocation4], 4096  }
 0x26a   :  { %1723 = vsyncadd [#allocation4], 4294963200 }
 0x26b   :  { %1724 = dma.done.wait [#allocation9], 128  }
 0x26c   :  { %1725 = vsyncadd [#allocation9], 4294967168 }
 0x26d   :  { %1610 = vsyncpa [#allocation3], 1 }
 0x26e   :  { %1611 = vsyncpa [#allocation6], 1 }
 0x26f   :  { %1612 = vsyncpa [#allocation4], 1 }
 0x270   :  { %1613 = vsyncpa [#allocation9], 1 }

</bundles_post_ra>
